<compile_context>
chip_gen: v7x
topology: tpu7x:2x2x1
jax: 0.10.0
libtpu: 0.0.40
codegen_flags: <defaults>
</compile_context>

<pallas_src>
import functools

import jax
import jax.numpy as jnp
from jax.experimental import pallas as pl
from jax.experimental.pallas import tpu as pltpu

_LANES = 128
# Combined HBM traffic (both inputs) per grid step.  8 MiB/step amortizes the
# ~0.35 us per-step overhead on all generations; double-buffered VMEM usage is
# 2x this (16 MiB), well inside the 40 MiB scoped limit requested below and
# inside v7x's 64 MiB physical VMEM.
_TARGET_STEP_BYTES = 8 << 20
_VMEM_LIMIT_BYTES = 40 << 20
# Inputs smaller than this (in bytes) are computed directly in jnp.
_SMALL_INPUT_BYTES = 1 << 20


def _num_core_splits() -> int:
    """2-way row split only on 2-TensorCore chips (v7x); 1 elsewhere."""
    try:
        kind = jax.devices()[0].device_kind.lower()
    except Exception:
        return 1
    return 2 if ("v7" in kind or "tpu7" in kind) else 1


def _nmse_kernel(xhat_ref, x_ref, out_ref, pow_acc, mse_acc, *, rows):
    """Accumulates per-lane partial sums of x^2 and (x_hat - x)^2."""
    c = pl.program_id(0)            # core-split axis ("parallel")
    i = pl.program_id(1)            # row-block within this split ("arbitrary")
    n_inner = pl.num_programs(1)
    tile_rows = x_ref.shape[0]

    @pl.when(i == 0)
    def _():
        pow_acc[...] = jnp.zeros_like(pow_acc)
        mse_acc[...] = jnp.zeros_like(mse_acc)

    # Unclamped global row-block id.  The index_map clamps the DMA so it never
    # starts past the last real block; blocks that are partially or fully past
    # `rows` (including clamped re-reads) are masked to zero below.
    block = c * n_inner + i
    row_start = block * tile_rows

    x = x_ref[...].astype(jnp.float32)
    d = xhat_ref[...].astype(jnp.float32) - x

    # Fast path: interior block, no masking work at all.
    @pl.when(row_start + tile_rows <= rows)
    def _():
        pow_acc[...] += jnp.sum(x * x, axis=0, keepdims=True)
        mse_acc[...] += jnp.sum(d * d, axis=0, keepdims=True)

    # Boundary / clamped re-read block: mask BEFORE squaring so both sums stay
    # unbiased (valid may be all-False for fully out-of-range blocks).
    @pl.when(row_start + tile_rows > rows)
    def _():
        row_ids = jax.lax.broadcasted_iota(jnp.int32, (tile_rows, 1), 0)
        valid = row_ids < (rows - row_start)
        xm = jnp.where(valid, x, 0.0)
        dm = jnp.where(valid, d, 0.0)
        pow_acc[...] += jnp.sum(xm * xm, axis=0, keepdims=True)
        mse_acc[...] += jnp.sum(dm * dm, axis=0, keepdims=True)

    @pl.when(i == n_inner - 1)
    def _():
        out_ref[0, 0:1, :] = pow_acc[...]
        out_ref[0, 1:2, :] = mse_acc[...]


def nmse_loss(x_hat: jax.Array, x: jax.Array) -> jax.Array:
    """Computes sum((x_hat - x)^2) / sum(x^2) with a Pallas TPU kernel."""
    assert x_hat.shape == x.shape, "x_hat and x must have identical shapes"

    n = x.size
    itemsize = max(x.dtype.itemsize, x_hat.dtype.itemsize)

    flat_hat = x_hat.reshape(-1)
    flat_x = x.reshape(-1)

    # Tiny-input fast path: pallas_call launch + pipeline prologue dominates.
    if n * itemsize < _SMALL_INPUT_BYTES or n < _LANES:
        xf = flat_x.astype(jnp.float32)
        hf = flat_hat.astype(jnp.float32)
        power = jnp.sum(xf * xf)
        mse = jnp.sum((hf - xf) ** 2)
        return mse / power

    # 128-aligned prefix goes through the kernel; the <=127-element tail is
    # handled in jnp below (no full-array pad / HBM copy).
    rows = n // _LANES
    n_aligned = rows * _LANES
    slab_hat = flat_hat[:n_aligned].reshape(rows, _LANES)
    slab_x = flat_x[:n_aligned].reshape(rows, _LANES)

    # ~8 MiB of combined input HBM traffic per grid step (dtype-aware).
    tile_rows_max = max(8, (_TARGET_STEP_BYTES // (2 * _LANES * itemsize)) // 8 * 8)
    tile_rows = rows if rows <= tile_rows_max else tile_rows_max

    n_blocks = pl.cdiv(rows, tile_rows)
    splits = _num_core_splits() if n_blocks > 1 else 1
    inner = pl.cdiv(n_blocks, splits)

    def row_block_map(c, i):
        # Clamp so the DMA never starts past the last real block; the kernel
        # masks re-read / out-of-range blocks to zero using the unclamped id.
        return (jnp.minimum(c * inner + i, n_blocks - 1), 0)

    kernel = functools.partial(_nmse_kernel, rows=rows)

    partials = pl.pallas_call(
        kernel,
        out_shape=jax.ShapeDtypeStruct((splits, 2, _LANES), jnp.float32),
        grid_spec=pltpu.PrefetchScalarGridSpec(
            num_scalar_prefetch=0,
            grid=(splits, inner),
            in_specs=[
                pl.BlockSpec((tile_rows, _LANES), row_block_map),
                pl.BlockSpec((tile_rows, _LANES), row_block_map),
            ],
            out_specs=pl.BlockSpec((1, 2, _LANES), lambda c, i: (c, 0, 0)),
            scratch_shapes=[
                pltpu.VMEM((1, _LANES), jnp.float32),   # per-lane sum(x^2)
                pltpu.VMEM((1, _LANES), jnp.float32),   # per-lane sum((xh-x)^2)
            ],
        ),
        compiler_params=pltpu.CompilerParams(
            # On v7x, verify with xprof that "parallel" shards across the two
            # TensorCores; if not, switch to pltpu.CORE_PARALLEL here.
            dimension_semantics=("parallel", "arbitrary"),
            vmem_limit_bytes=_VMEM_LIMIT_BYTES,
        ),
        cost_estimate=pl.CostEstimate(
            flops=5 * n_aligned,
            transcendentals=0,
            bytes_accessed=2 * n_aligned * itemsize + splits * 2 * _LANES * 4,
        ),
    )(slab_hat, slab_x)

    power = jnp.sum(partials[:, 0, :])
    mse = jnp.sum(partials[:, 1, :])

    if n_aligned != n:
        tail_x = flat_x[n_aligned:].astype(jnp.float32)
        tail_h = flat_hat[n_aligned:].astype(jnp.float32)
        power = power + jnp.sum(tail_x * tail_x)
        mse = mse + jnp.sum((tail_h - tail_x) ** 2)

    # Note: sum(x^2) == 0 yields inf/nan, matching the PyTorch reference.
    return mse / power


def _check(shape, key, rtol):
    k1, k2 = jax.random.split(key)
    x = jax.random.normal(k1, shape, dtype=jnp.float32)
    x_hat = x + 0.1 * jax.random.normal(k2, shape, dtype=jnp.float32)
    got = nmse_loss(x_hat, x)
    jax.block_until_ready(got)
    ref = jnp.sum((x_hat - x) ** 2) / jnp.sum(x ** 2)
    assert jnp.allclose(got, ref, rtol=rtol, atol=1e-6), (shape, got, ref)


if __name__ == "__main__":
    key = jax.random.PRNGKey(0)
    k0, k1, k2 = jax.random.split(key, 3)

    # Primary: NCHW feature-map-sized input, as NMSELoss would see (tiny ->
    # exercises the jnp fast path).
    _check((2, 4, 16, 16), k0, rtol=1e-5)
    # Kernel path, single full-height block + ragged <128-element tail
    # (exercises the wrapper-side tail sum, no pad).
    _check((3, 7, 113, 173), k1, rtol=1e-4)
    # Kernel path, multiple row tiles with a partial (masked) last tile;
    # exercises accumulation across grid steps and the 2-way split on v7x.
    _check((8, 16, 96, 128), k2, rtol=1e-4)

    print("KERNEL_OK")
</pallas_src>

<mosaic_0001>
module attributes {stable_mosaic.version = 11 : i64} {
  func.func @_nmse_kernel(%arg0: i32, %arg1: i32, %arg2: memref<3207x128xf32, #tpu.memory_space<vmem>>, %arg3: memref<3207x128xf32, #tpu.memory_space<vmem>>, %arg4: memref<1x2x128xf32, #tpu.memory_space<vmem>>, %arg5: memref<1x128xf32, #tpu.memory_space<vmem>>, %arg6: memref<1x128xf32, #tpu.memory_space<vmem>>) attributes {dimension_semantics = [#tpu.dimension_semantics<parallel>, #tpu.dimension_semantics<arbitrary>], iteration_bounds = array<i64: 1, 1>, scalar_prefetch = 0 : i64, scratch_operands = 2 : i64, tpu.core_type = #tpu.core_type<tc>, window_params = [{transform_indices = @transform_0, window_bounds = array<i64: 3207, 128>}, {transform_indices = @transform_1, window_bounds = array<i64: 3207, 128>}, {transform_indices = @transform_2, window_bounds = array<i64: 1, 2, 128>}]} {
    %c0_i32 = arith.constant 0 : i32
    %0 = arith.cmpi eq, %arg1, %c0_i32 : i32
    %1 = arith.extui %0 : i1 to i32
    %c0_i32_0 = arith.constant 0 : i32
    %2 = arith.cmpi ne, %1, %c0_i32_0 : i32
    scf.if %2 {
      %cst = arith.constant 0.000000e+00 : f32
      %20 = vector.broadcast %cst : f32 to vector<1x128xf32>
      %c0_12 = arith.constant 0 : index
      %c0_13 = arith.constant 0 : index
      %21 = vector.load %arg5[%c0_12, %c0_13] : memref<1x128xf32, #tpu.memory_space<vmem>>, vector<1x128xf32>
      tpu.vector_store %arg5[%c0_12, %c0_13], %20 {strides = array<i32>} : memref<1x128xf32, #tpu.memory_space<vmem>>, vector<1x128xf32>,
      %cst_14 = arith.constant 0.000000e+00 : f32
      %22 = vector.broadcast %cst_14 : f32 to vector<1x128xf32>
      %c0_15 = arith.constant 0 : index
      %c0_16 = arith.constant 0 : index
      %23 = vector.load %arg6[%c0_15, %c0_16] : memref<1x128xf32, #tpu.memory_space<vmem>>, vector<1x128xf32>
      tpu.vector_store %arg6[%c0_15, %c0_16], %22 {strides = array<i32>} : memref<1x128xf32, #tpu.memory_space<vmem>>, vector<1x128xf32>,
    } else {
    }
    %c1_i32 = arith.constant 1 : i32
    %3 = arith.muli %arg0, %c1_i32 : i32
    %4 = arith.addi %3, %arg1 : i32
    %c3207_i32 = arith.constant 3207 : i32
    %5 = arith.muli %4, %c3207_i32 : i32
    %c0 = arith.constant 0 : index
    %c0_1 = arith.constant 0 : index
    %6 = vector.load %arg3[%c0, %c0_1] : memref<3207x128xf32, #tpu.memory_space<vmem>>, vector<3207x128xf32>
    %c0_2 = arith.constant 0 : index
    %c0_3 = arith.constant 0 : index
    %7 = vector.load %arg2[%c0_2, %c0_3] : memref<3207x128xf32, #tpu.memory_space<vmem>>, vector<3207x128xf32>
    %8 = arith.subf %7, %6 : vector<3207x128xf32>
    %c3207_i32_4 = arith.constant 3207 : i32
    %9 = arith.addi %5, %c3207_i32_4 : i32
    %c3207_i32_5 = arith.constant 3207 : i32
    %10 = arith.cmpi sle, %9, %c3207_i32_5 : i32
    %11 = arith.extui %10 : i1 to i32
    %c0_i32_6 = arith.constant 0 : i32
    %12 = arith.cmpi ne, %11, %c0_i32_6 : i32
    scf.if %12 {
      %c0_12 = arith.constant 0 : index
      %c0_13 = arith.constant 0 : index
      %20 = vector.load %arg5[%c0_12, %c0_13] : memref<1x128xf32, #tpu.memory_space<vmem>>, vector<1x128xf32>
      %21 = arith.mulf %6, %6 : vector<3207x128xf32>
      %cst = arith.constant dense<0.000000e+00> : vector<128xf32>
      %22 = vector.multi_reduction <add>, %21, %cst [0] : vector<3207x128xf32> to vector<128xf32>
      %23 = vector.shape_cast %22 : vector<128xf32> to vector<1x128xf32>
      %24 = arith.addf %20, %23 : vector<1x128xf32>
      %c0_14 = arith.constant 0 : index
      %c0_15 = arith.constant 0 : index
      %25 = vector.load %arg5[%c0_14, %c0_15] : memref<1x128xf32, #tpu.memory_space<vmem>>, vector<1x128xf32>
      tpu.vector_store %arg5[%c0_14, %c0_15], %24 {strides = array<i32>} : memref<1x128xf32, #tpu.memory_space<vmem>>, vector<1x128xf32>,
      %c0_16 = arith.constant 0 : index
      %c0_17 = arith.constant 0 : index
      %26 = vector.load %arg6[%c0_16, %c0_17] : memref<1x128xf32, #tpu.memory_space<vmem>>, vector<1x128xf32>
      %27 = arith.mulf %8, %8 : vector<3207x128xf32>
      %cst_18 = arith.constant dense<0.000000e+00> : vector<128xf32>
      %28 = vector.multi_reduction <add>, %27, %cst_18 [0] : vector<3207x128xf32> to vector<128xf32>
      %29 = vector.shape_cast %28 : vector<128xf32> to vector<1x128xf32>
      %30 = arith.addf %26, %29 : vector<1x128xf32>
      %c0_19 = arith.constant 0 : index
      %c0_20 = arith.constant 0 : index
      %31 = vector.load %arg6[%c0_19, %c0_20] : memref<1x128xf32, #tpu.memory_space<vmem>>, vector<1x128xf32>
      tpu.vector_store %arg6[%c0_19, %c0_20], %30 {strides = array<i32>} : memref<1x128xf32, #tpu.memory_space<vmem>>, vector<1x128xf32>,
    } else {
    }
    %c3207_i32_7 = arith.constant 3207 : i32
    %13 = arith.addi %5, %c3207_i32_7 : i32
    %c3207_i32_8 = arith.constant 3207 : i32
    %14 = arith.cmpi sgt, %13, %c3207_i32_8 : i32
    %15 = arith.extui %14 : i1 to i32
    %c0_i32_9 = arith.constant 0 : i32
    %16 = arith.cmpi ne, %15, %c0_i32_9 : i32
    scf.if %16 {
      %20 = tpu.iota {dimensions = array<i32: 0>} : vector<3207x1xi32>
      %c3207_i32_12 = arith.constant 3207 : i32
      %21 = arith.subi %c3207_i32_12, %5 : i32
      %22 = vector.broadcast %21 : i32 to vector<3207x1xi32>
      %23 = arith.cmpi slt, %20, %22 : vector<3207x1xi32>
      %cst = arith.constant 0.000000e+00 : f32
      %24 = vector.shape_cast %23 : vector<3207x1xi1> to vector<3207x1xi1>
      %25 = vector.broadcast %24 : vector<3207x1xi1> to vector<3207x128xi1>
      %26 = vector.broadcast %cst : f32 to vector<3207x128xf32>
      %27 = arith.select %25, %6, %26 : vector<3207x128xi1>, vector<3207x128xf32>
      %cst_13 = arith.constant 0.000000e+00 : f32
      %28 = vector.shape_cast %23 : vector<3207x1xi1> to vector<3207x1xi1>
      %29 = vector.broadcast %28 : vector<3207x1xi1> to vector<3207x128xi1>
      %30 = vector.broadcast %cst_13 : f32 to vector<3207x128xf32>
      %31 = arith.select %29, %8, %30 : vector<3207x128xi1>, vector<3207x128xf32>
      %c0_14 = arith.constant 0 : index
      %c0_15 = arith.constant 0 : index
      %32 = vector.load %arg5[%c0_14, %c0_15] : memref<1x128xf32, #tpu.memory_space<vmem>>, vector<1x128xf32>
      %33 = arith.mulf %27, %27 : vector<3207x128xf32>
      %cst_16 = arith.constant dense<0.000000e+00> : vector<128xf32>
      %34 = vector.multi_reduction <add>, %33, %cst_16 [0] : vector<3207x128xf32> to vector<128xf32>
      %35 = vector.shape_cast %34 : vector<128xf32> to vector<1x128xf32>
      %36 = arith.addf %32, %35 : vector<1x128xf32>
      %c0_17 = arith.constant 0 : index
      %c0_18 = arith.constant 0 : index
      %37 = vector.load %arg5[%c0_17, %c0_18] : memref<1x128xf32, #tpu.memory_space<vmem>>, vector<1x128xf32>
      tpu.vector_store %arg5[%c0_17, %c0_18], %36 {strides = array<i32>} : memref<1x128xf32, #tpu.memory_space<vmem>>, vector<1x128xf32>,
      %c0_19 = arith.constant 0 : index
      %c0_20 = arith.constant 0 : index
      %38 = vector.load %arg6[%c0_19, %c0_20] : memref<1x128xf32, #tpu.memory_space<vmem>>, vector<1x128xf32>
      %39 = arith.mulf %31, %31 : vector<3207x128xf32>
      %cst_21 = arith.constant dense<0.000000e+00> : vector<128xf32>
      %40 = vector.multi_reduction <add>, %39, %cst_21 [0] : vector<3207x128xf32> to vector<128xf32>
      %41 = vector.shape_cast %40 : vector<128xf32> to vector<1x128xf32>
      %42 = arith.addf %38, %41 : vector<1x128xf32>
      %c0_22 = arith.constant 0 : index
      %c0_23 = arith.constant 0 : index
      %43 = vector.load %arg6[%c0_22, %c0_23] : memref<1x128xf32, #tpu.memory_space<vmem>>, vector<1x128xf32>
      tpu.vector_store %arg6[%c0_22, %c0_23], %42 {strides = array<i32>} : memref<1x128xf32, #tpu.memory_space<vmem>>, vector<1x128xf32>,
    } else {
    }
    %c0_i32_10 = arith.constant 0 : i32
    %17 = arith.cmpi eq, %arg1, %c0_i32_10 : i32
    %18 = arith.extui %17 : i1 to i32
    %c0_i32_11 = arith.constant 0 : i32
    %19 = arith.cmpi ne, %18, %c0_i32_11 : i32
    scf.if %19 {
      %c0_12 = arith.constant 0 : index
      %c0_13 = arith.constant 0 : index
      %20 = vector.load %arg5[%c0_12, %c0_13] : memref<1x128xf32, #tpu.memory_space<vmem>>, vector<1x128xf32>
      %c0_14 = arith.constant 0 : index
      %c0_15 = arith.constant 0 : index
      %c0_16 = arith.constant 0 : index
      %21 = vector.load %arg4[%c0_14, %c0_15, %c0_16] : memref<1x2x128xf32, #tpu.memory_space<vmem>>, vector<1x1x128xf32>
      %22 = vector.shape_cast %21 : vector<1x1x128xf32> to vector<1x128xf32>
      %23 = vector.shape_cast %20 : vector<1x128xf32> to vector<1x1x128xf32>
      tpu.vector_store %arg4[%c0_14, %c0_15, %c0_16], %23 {strides = array<i32>} : memref<1x2x128xf32, #tpu.memory_space<vmem>>, vector<1x1x128xf32>,
      %c0_17 = arith.constant 0 : index
      %c0_18 = arith.constant 0 : index
      %24 = vector.load %arg6[%c0_17, %c0_18] : memref<1x128xf32, #tpu.memory_space<vmem>>, vector<1x128xf32>
      %c0_19 = arith.constant 0 : index
      %c1 = arith.constant 1 : index
      %c0_20 = arith.constant 0 : index
      %25 = vector.load %arg4[%c0_19, %c1, %c0_20] : memref<1x2x128xf32, #tpu.memory_space<vmem>>, vector<1x1x128xf32>
      %26 = vector.shape_cast %25 : vector<1x1x128xf32> to vector<1x128xf32>
      %27 = vector.shape_cast %24 : vector<1x128xf32> to vector<1x1x128xf32>
      tpu.vector_store %arg4[%c0_19, %c1, %c0_20], %27 {strides = array<i32>} : memref<1x2x128xf32, #tpu.memory_space<vmem>>, vector<1x1x128xf32>,
    } else {
    }
    return
  }
  func.func @transform_0(%arg0: i32, %arg1: i32) -> (i32, i32) {
    %c1_i32 = arith.constant 1 : i32
    %0 = arith.muli %arg0, %c1_i32 : i32
    %1 = arith.addi %0, %arg1 : i32
    %c0_i32 = arith.constant 0 : i32
    %2 = arith.minsi %1, %c0_i32 : i32
    %c0_i32_0 = arith.constant 0 : i32
    %c0_i32_1 = arith.constant 0 : i32
    return %2, %c0_i32_0 : i32, i32
  }
  func.func @transform_1(%arg0: i32, %arg1: i32) -> (i32, i32) {
    %c1_i32 = arith.constant 1 : i32
    %0 = arith.muli %arg0, %c1_i32 : i32
    %1 = arith.addi %0, %arg1 : i32
    %c0_i32 = arith.constant 0 : i32
    %2 = arith.minsi %1, %c0_i32 : i32
    %c0_i32_0 = arith.constant 0 : i32
    %c0_i32_1 = arith.constant 0 : i32
    return %2, %c0_i32_0 : i32, i32
  }
  func.func @transform_2(%arg0: i32, %arg1: i32) -> (i32, i32, i32) {
    %c0_i32 = arith.constant 0 : i32
    %c0_i32_0 = arith.constant 0 : i32
    %c0_i32_1 = arith.constant 0 : i32
    return %arg0, %c0_i32, %c0_i32_0 : i32, i32, i32
  }
}

</mosaic_0001>

<bundles_post_ra>
// kernel: tpu_custom_call.1
= control target key start
LH: loop header
LB: loop body
LE: loop exit
PB: predicated region body
PF: predicated region fallthrough
CT: control target
= control target key end

     0   :  { %7 = vsyncpa [#allocation5], 0  ;;  %s8084_s0 = inlined_call_operand.hbm [shape: f32[3207,128], index: 0, kind: input, shape index: {}]   ;;  %s8085_s1 = inlined_call_operand.hbm [shape: f32[3207,128], index: 1, kind: input, shape index: {}]   ;;  %s8086_s2 = inlined_call_operand.hbm [shape: f32[1,2,128], index: 2, kind: output, shape index: {}]  }
   0x1   :  { %8 = vsyncpa [#allocation8], 0 }
   0x2   :  { %9 = vsyncpa [#allocation6], 0  ;;  %s7295_s9 = smov [#allocation4]   ;;  %s7223_s13 = scalar_lea.hbm %s8084_s0, 51328 }
   0x3   :  { %s21_s10 = sshll.u32 %s7295_s9, 4  ;;  %p7224_p0 = scmp.ne.s32.totalorder %s8084_s0, %s7223_s13  ;;  %s22_s10 = int_to_ptr.vmem [resolvable:$true] %s21_s10 }
   0x4   :  { %p7227_p1 = scmp.lt.u32.totalorder %s7223_s13, %s8084_s0 }
   0x6   :  { %p7229_p2 = pnand %p7227_p1, %p7224_p0 }
   0x8   :  { %7232 = shalt.err (!%p7229_p2)
}
   0x9   :  { %s7233_s18 = scalar_lea.vmem %s22_s10, 51328  ;;  %p7238_p4 = scmp.lt.s32.totalorder %s22_s10, %s22_s10 }
   0xa   :  { %p7234_p3 = scmp.ne.s32.totalorder %s22_s10, %s7233_s18  ;;  %p7239_p5 = scmp.lt.s32.totalorder %s7233_s18, %s7233_s18 }
   0xc   :  { %p7240_p6 = por %p7239_p5, %p7238_p4 }
   0xe   :  { %p7241_p7 = pnand %p7240_p6, %p7234_p3 }
  0x10   :  { %7244 = shalt.err (!%p7241_p7)
}
  0x11   :  { %s7296_s19 = smov 128   ;;  %s7297_s20 = smov 8  }
  0x12   :  { %27 = dma.hbm_to_vmem [thread:$0]  %s8084_s0, 51328, %s22_s10, [#allocation5], %s7296_s19, %s7296_s19, %s7297_s20  }
  0x13   :  { %s7298_s23 = smov [#allocation7]   ;;  %s7245_s27 = scalar_lea.hbm %s8085_s1, 51328 }
  0x14   :  { %s39_s24 = sshll.u32 %s7298_s23, 4  ;;  %p7246_p8 = scmp.ne.s32.totalorder %s8085_s1, %s7245_s27  ;;  %s40_s24 = int_to_ptr.vmem [resolvable:$true] %s39_s24 }
  0x15   :  { %p7249_p9 = scmp.lt.u32.totalorder %s7245_s27, %s8085_s1 }
  0x17   :  { %p7251_p10 = pnand %p7249_p9, %p7246_p8 }
  0x19   :  { %7254 = shalt.err (!%p7251_p10)
}
  0x1a   :  { %s7255_s4 = scalar_lea.vmem %s40_s24, 51328  ;;  %p7260_p12 = scmp.lt.s32.totalorder %s40_s24, %s40_s24 }
  0x1b   :  { %p7256_p11 = scmp.ne.s32.totalorder %s40_s24, %s7255_s4  ;;  %p7261_p13 = scmp.lt.s32.totalorder %s7255_s4, %s7255_s4 }
  0x1d   :  { %p7262_p0 = por %p7261_p13, %p7260_p12 }
  0x1f   :  { %p7263_p1 = pnand %p7262_p0, %p7256_p11 }
  0x21   :  { %7266 = shalt.err (!%p7263_p1)
}
  0x22   :  { %45 = dma.hbm_to_vmem [thread:$0]  %s8085_s1, 51328, %s40_s24, [#allocation8], %s7296_s19, %s7296_s19, %s7297_s20  }
  0x23   :  { %7289 = dma.done.wait [#allocation5], 51328  }
  0x24   :  { %7290 = vsyncadd [#allocation5], 4294915968 }
  0x25   :  { %7291 = dma.done.wait [#allocation8], 51328  }
  0x26   :  { %7292 = vsyncadd [#allocation8], 4294915968  ;;  %v7299_v0 = vmov 0.0   ;;  %v7340_v1 = vld [vmem:[#allocation7] sm:$0xff]  ;;  %v7342_v2 = vld [vmem:[#allocation7 + $0x8] sm:$0xff]  ;;  %vm2077_vm0 = vcmask 1046528  }
  0x27   :  { %64 = vst [vmem:[#allocation2] sm:$0x1] %v7299_v0  ;;  %65 = vst [vmem:[#allocation3] sm:$0x1] %v7299_v0  ;;  %v1277_v3 = vmul.f32 %v7340_v1, %v7340_v1  ;;  %v1278_v4 = vmul.f32 %v7342_v2, %v7342_v2  ;;  %v7348_v5 = vld [vmem:[#allocation7 + $0x10] sm:$0xff]  ;;  %v7352_v8 = vld [vmem:[#allocation7 + $0x18] sm:$0xff] }
  0x28   :  { %v1279_v6 = vmul.f32 %v7348_v5, %v7348_v5  ;;  %v1280_v9 = vmul.f32 %v7352_v8, %v7352_v8  ;;  %v7356_v11 = vld [vmem:[#allocation7 + $0x20] sm:$0xff]  ;;  %v7360_v14 = vld [vmem:[#allocation7 + $0x28] sm:$0xff]  ;;  %v7364_v17 = vld [vmem:[#allocation7 + $0x30] sm:$0xff]  ;;  %s7300_s1 = smov [#allocation9]  }
  0x29   :  { %v1678_v7 = vadd.f32 %v1278_v4, %v1277_v3  ;;  %v1281_v12 = vmul.f32 %v7356_v11, %v7356_v11  ;;  %v1282_v15 = vmul.f32 %v7360_v14, %v7360_v14  ;;  %v1283_v18 = vmul.f32 %v7364_v17, %v7364_v17  ;;  %v7368_v20 = vld [vmem:[#allocation7 + $0x38] sm:$0xff]  ;;  %v7372_v23 = vld [vmem:[#allocation7 + $0x40] sm:$0xff]  ;;  %v7376_v26 = vld [vmem:[#allocation7 + $0x48] sm:$0xff]  ;;  %s6948_s6 = sshll.u32 %s7300_s1, 4  ;;  %s6949_s6 = int_to_ptr.vmem [resolvable:$true] %s6948_s6 }
  0x2a   :  { %v1284_v21 = vmul.f32 %v7368_v20, %v7368_v20  ;;  %v1285_v24 = vmul.f32 %v7372_v23, %v7372_v23  ;;  %v1286_v27 = vmul.f32 %v7376_v26, %v7376_v26  ;;  %v7380_v29 = vld [vmem:[#allocation7 + $0x50] sm:$0xff]  ;;  %v7384_v32 = vld [vmem:[#allocation7 + $0x58] sm:$0xff]  ;;  %v7388_v35 = vld [vmem:[#allocation7 + $0x60] sm:$0xff]  ;;  %s7267_s7 = scalar_lea.vmem %s6949_s6, 32  ;;  %p7272_p3 = scmp.lt.s32.totalorder %s6949_s6, %s6949_s6 }
  0x2b   :  { %v1679_v10 = vadd.f32 %v1678_v7, %v1279_v6  ;;  %v1287_v30 = vmul.f32 %v7380_v29, %v7380_v29  ;;  %v1288_v33 = vmul.f32 %v7384_v32, %v7384_v32  ;;  %v1289_v36 = vmul.f32 %v7388_v35, %v7388_v35  ;;  %v7392_v38 = vld [vmem:[#allocation7 + $0x68] sm:$0xff]  ;;  %v7396_v41 = vld [vmem:[#allocation7 + $0x70] sm:$0xff]  ;;  %v7400_v44 = vld [vmem:[#allocation7 + $0x78] sm:$0xff]  ;;  %p7268_p2 = scmp.ne.s32.totalorder %s6949_s6, %s7267_s7  ;;  %p7273_p4 = scmp.lt.s32.totalorder %s7267_s7, %s7267_s7 }
  0x2c   :  { %v1290_v39 = vmul.f32 %v7392_v38, %v7392_v38  ;;  %v1291_v42 = vmul.f32 %v7396_v41, %v7396_v41  ;;  %v1292_v45 = vmul.f32 %v7400_v44, %v7400_v44  ;;  %v7404_v47 = vld [vmem:[#allocation7 + $0x80] sm:$0xff]  ;;  %v7408_v50 = vld [vmem:[#allocation7 + $0x88] sm:$0xff]  ;;  %v7412_v53 = vld [vmem:[#allocation7 + $0x90] sm:$0xff] }
  0x2d   :  { %v1680_v13 = vadd.f32 %v1679_v10, %v1280_v9  ;;  %v1293_v48 = vmul.f32 %v7404_v47, %v7404_v47  ;;  %v1294_v51 = vmul.f32 %v7408_v50, %v7408_v50  ;;  %v1295_v54 = vmul.f32 %v7412_v53, %v7412_v53  ;;  %v7416_v56 = vld [vmem:[#allocation7 + $0x98] sm:$0xff]  ;;  %v7420_v59 = vld [vmem:[#allocation7 + $0xa0] sm:$0xff]  ;;  %v7424_v62 = vld [vmem:[#allocation7 + $0xa8] sm:$0xff]  ;;  %p7274_p5 = por %p7273_p4, %p7272_p3 }
  0x2e   :  { %v1296_v57 = vmul.f32 %v7416_v56, %v7416_v56  ;;  %v1297_v60 = vmul.f32 %v7420_v59, %v7420_v59  ;;  %v1298_v63 = vmul.f32 %v7424_v62, %v7424_v62  ;;  %v7428_v3 = vld [vmem:[#allocation7 + $0xb0] sm:$0xff]  ;;  %v7432_v7 = vld [vmem:[#allocation7 + $0xb8] sm:$0xff] }
  0x2f   :  { %v1681_v16 = vadd.f32 %v1680_v13, %v1281_v12  ;;  %v1299_v4 = vmul.f32 %v7428_v3, %v7428_v3  ;;  %v1300_v9 = vmul.f32 %v7432_v7, %v7432_v7  ;;  %v7436_v12 = vld [vmem:[#allocation7 + $0xc0] sm:$0xff]  ;;  %p7275_p6 = pnand %p7274_p5, %p7268_p2 }
  0x30   :  { %v1301_v13 = vmul.f32 %v7436_v12, %v7436_v12 }
  0x31   :  { %v1682_v19 = vadd.f32 %v1681_v16, %v1282_v15  ;;  %v7440_v16 = vld [vmem:[#allocation7 + $0xc8] sm:$0xff] }
  0x33   :  { %v1683_v22 = vadd.f32 %v1682_v19, %v1283_v18  ;;  %v1302_v18 = vmul.f32 %v7440_v16, %v7440_v16 }
  0x35   :  { %v1684_v25 = vadd.f32 %v1683_v22, %v1284_v21  ;;  %v7444_v21 = vld [vmem:[#allocation7 + $0xd0] sm:$0xff] }
  0x36   :  { %v1303_v22 = vmul.f32 %v7444_v21, %v7444_v21 }
  0x37   :  { %v1685_v28 = vadd.f32 %v1684_v25, %v1285_v24  ;;  %v7448_v25 = vld [vmem:[#allocation7 + $0xd8] sm:$0xff] }
  0x39   :  { %v1686_v31 = vadd.f32 %v1685_v28, %v1286_v27  ;;  %v1304_v27 = vmul.f32 %v7448_v25, %v7448_v25 }
  0x3b   :  { %v1687_v34 = vadd.f32 %v1686_v31, %v1287_v30  ;;  %v7452_v30 = vld [vmem:[#allocation7 + $0xe0] sm:$0xff] }
  0x3c   :  { %v1305_v31 = vmul.f32 %v7452_v30, %v7452_v30 }
  0x3d   :  { %v1688_v37 = vadd.f32 %v1687_v34, %v1288_v33  ;;  %v7456_v34 = vld [vmem:[#allocation7 + $0xe8] sm:$0xff] }
  0x3f   :  { %v1689_v40 = vadd.f32 %v1688_v37, %v1289_v36  ;;  %v1306_v36 = vmul.f32 %v7456_v34, %v7456_v34 }
  0x41   :  { %v1690_v43 = vadd.f32 %v1689_v40, %v1290_v39  ;;  %v7460_v39 = vld [vmem:[#allocation7 + $0xf0] sm:$0xff] }
  0x42   :  { %v1307_v40 = vmul.f32 %v7460_v39, %v7460_v39 }
  0x43   :  { %v1691_v46 = vadd.f32 %v1690_v43, %v1291_v42  ;;  %v7464_v43 = vld [vmem:[#allocation7 + $0xf8] sm:$0xff] }
  0x45   :  { %v1692_v49 = vadd.f32 %v1691_v46, %v1292_v45  ;;  %v1308_v45 = vmul.f32 %v7464_v43, %v7464_v43 }
  0x47   :  { %v1693_v52 = vadd.f32 %v1692_v49, %v1293_v48  ;;  %v7468_v48 = vld [vmem:[#allocation7 + $0x100] sm:$0xff] }
  0x48   :  { %v1309_v49 = vmul.f32 %v7468_v48, %v7468_v48 }
  0x49   :  { %v1694_v55 = vadd.f32 %v1693_v52, %v1294_v51  ;;  %v7472_v52 = vld [vmem:[#allocation7 + $0x108] sm:$0xff] }
  0x4b   :  { %v1695_v58 = vadd.f32 %v1694_v55, %v1295_v54  ;;  %v1310_v54 = vmul.f32 %v7472_v52, %v7472_v52 }
  0x4d   :  { %v1696_v61 = vadd.f32 %v1695_v58, %v1296_v57  ;;  %v7476_v57 = vld [vmem:[#allocation7 + $0x110] sm:$0xff] }
  0x4e   :  { %v1311_v58 = vmul.f32 %v7476_v57, %v7476_v57 }
  0x4f   :  { %v1697_v0 = vadd.f32 %v1696_v61, %v1297_v60  ;;  %v7480_v61 = vld [vmem:[#allocation7 + $0x118] sm:$0xff] }
  0x51   :  { %v1698_v6 = vadd.f32 %v1697_v0, %v1298_v63  ;;  %v1312_v63 = vmul.f32 %v7480_v61, %v7480_v61 }
  0x53   :  { %v1699_v10 = vadd.f32 %v1698_v6, %v1299_v4  ;;  %v7484_v4 = vld [vmem:[#allocation7 + $0x120] sm:$0xff] }
  0x54   :  { %v1313_v6 = vmul.f32 %v7484_v4, %v7484_v4 }
  0x55   :  { %v1700_v15 = vadd.f32 %v1699_v10, %v1300_v9  ;;  %v7488_v10 = vld [vmem:[#allocation7 + $0x128] sm:$0xff] }
  0x57   :  { %v1701_v19 = vadd.f32 %v1700_v15, %v1301_v13  ;;  %v1314_v13 = vmul.f32 %v7488_v10, %v7488_v10 }
  0x59   :  { %v1702_v24 = vadd.f32 %v1701_v19, %v1302_v18  ;;  %v7492_v18 = vld [vmem:[#allocation7 + $0x130] sm:$0xff] }
  0x5a   :  { %v1315_v19 = vmul.f32 %v7492_v18, %v7492_v18 }
  0x5b   :  { %v1703_v28 = vadd.f32 %v1702_v24, %v1303_v22  ;;  %v7496_v24 = vld [vmem:[#allocation7 + $0x138] sm:$0xff] }
  0x5d   :  { %v1704_v33 = vadd.f32 %v1703_v28, %v1304_v27  ;;  %v1316_v27 = vmul.f32 %v7496_v24, %v7496_v24 }
  0x5f   :  { %v1705_v37 = vadd.f32 %v1704_v33, %v1305_v31  ;;  %v7500_v31 = vld [vmem:[#allocation7 + $0x140] sm:$0xff] }
  0x60   :  { %8159 = vst [vmem:[#allocation13_spill] sm:$0xff] %v7500_v31  ;;  %v1317_v33 = vmul.f32 %v7500_v31, %v7500_v31  ;;  %v148_v31 = vld [vmem:[#allocation7 + $0x280] sm:$0xff] }
  0x61   :  { %v1706_v42 = vadd.f32 %v1705_v37, %v1306_v36  ;;  %v7504_v37 = vld [vmem:[#allocation7 + $0x148] sm:$0xff] }
  0x62   :  { %8160 = vst [vmem:[#allocation14_spill] sm:$0xff] %v7504_v37 }
  0x63   :  { %v1707_v46 = vadd.f32 %v1706_v42, %v1307_v40  ;;  %v1318_v40 = vmul.f32 %v7504_v37, %v7504_v37 }
  0x65   :  { %v1708_v51 = vadd.f32 %v1707_v46, %v1308_v45  ;;  %v7508_v45 = vld [vmem:[#allocation7 + $0x150] sm:$0xff] }
  0x66   :  { %8161 = vst [vmem:[#allocation15_spill] sm:$0xff] %v7508_v45  ;;  %v1319_v46 = vmul.f32 %v7508_v45, %v7508_v45 }
  0x67   :  { %v1709_v55 = vadd.f32 %v1708_v51, %v1309_v49  ;;  %v7512_v51 = vld [vmem:[#allocation7 + $0x158] sm:$0xff] }
  0x68   :  { %8162 = vst [vmem:[#allocation16_spill] sm:$0xff] %v7512_v51 }
  0x69   :  { %v1710_v60 = vadd.f32 %v1709_v55, %v1310_v54  ;;  %v1320_v54 = vmul.f32 %v7512_v51, %v7512_v51  ;;  %v7648_v51 = vld [vmem:[#allocation7 + $0x268] sm:$0xff] }
  0x6a   :  { %8195 = vst [vmem:[#allocation49_spill] sm:$0xff] %v7648_v51 }
  0x6b   :  { %v1711_v0 = vadd.f32 %v1710_v60, %v1311_v58  ;;  %v7516_v58 = vld [vmem:[#allocation7 + $0x160] sm:$0xff] }
  0x6c   :  { %8163 = vst [vmem:[#allocation17_spill] sm:$0xff] %v7516_v58  ;;  %v1321_v60 = vmul.f32 %v7516_v58, %v7516_v58  ;;  %v474_v58 = vld [vmem:[#allocation4 + $0x28] sm:$0xff] }
  0x6d   :  { %v1712_v9 = vadd.f32 %v1711_v0, %v1312_v63  ;;  %v7520_v0 = vld [vmem:[#allocation7 + $0x168] sm:$0xff] }
  0x6e   :  { %8164 = vst [vmem:[#allocation18_spill] sm:$0xff] %v7520_v0 }
  0x6f   :  { %v1713_v15 = vadd.f32 %v1712_v9, %v1313_v6  ;;  %v1322_v6 = vmul.f32 %v7520_v0, %v7520_v0 }
  0x71   :  { %v1714_v22 = vadd.f32 %v1713_v15, %v1314_v13  ;;  %v7524_v13 = vld [vmem:[#allocation7 + $0x170] sm:$0xff] }
  0x72   :  { %8165 = vst [vmem:[#allocation19_spill] sm:$0xff] %v7524_v13  ;;  %v1323_v15 = vmul.f32 %v7524_v13, %v7524_v13  ;;  %v473_v13 = vld [vmem:[#allocation4 + $0x20] sm:$0xff] }
  0x73   :  { %v1715_v28 = vadd.f32 %v1714_v22, %v1315_v19  ;;  %v7528_v22 = vld [vmem:[#allocation7 + $0x178] sm:$0xff] }
  0x74   :  { %8166 = vst [vmem:[#allocation20_spill] sm:$0xff] %v7528_v22 }
  0x75   :  { %v1716_v36 = vadd.f32 %v1715_v28, %v1316_v27  ;;  %v1324_v27 = vmul.f32 %v7528_v22, %v7528_v22  ;;  %v472_v22 = vld [vmem:[#allocation4 + $0x18] sm:$0xff] }
  0x76   :  { %v873_v0 = vsub.f32 %v472_v22, %v7352_v8 }
  0x77   :  { %v1717_v42 = vadd.f32 %v1716_v36, %v1317_v33  ;;  %v7532_v33 = vld [vmem:[#allocation7 + $0x180] sm:$0xff] }
  0x78   :  { %8167 = vst [vmem:[#allocation21_spill] sm:$0xff] %v7532_v33  ;;  %v1325_v36 = vmul.f32 %v7532_v33, %v7532_v33  ;;  %v471_v33 = vld [vmem:[#allocation4 + $0x10] sm:$0xff] }
  0x79   :  { %v1718_v49 = vadd.f32 %v1717_v42, %v1318_v40  ;;  %v7536_v42 = vld [vmem:[#allocation7 + $0x188] sm:$0xff] }
  0x7a   :  { %8168 = vst [vmem:[#allocation22_spill] sm:$0xff] %v7536_v42 }
  0x7b   :  { %v1719_v55 = vadd.f32 %v1718_v49, %v1319_v46  ;;  %v1326_v46 = vmul.f32 %v7536_v42, %v7536_v42 }
  0x7d   :  { %v1720_v63 = vadd.f32 %v1719_v55, %v1320_v54  ;;  %v7540_v54 = vld [vmem:[#allocation7 + $0x190] sm:$0xff] }
  0x7e   :  { %8169 = vst [vmem:[#allocation23_spill] sm:$0xff] %v7540_v54  ;;  %v1327_v55 = vmul.f32 %v7540_v54, %v7540_v54  ;;  %v7556_v54 = vld [vmem:[#allocation7 + $0x1b0] sm:$0xff] }
  0x7f   :  { %v1721_v9 = vadd.f32 %v1720_v63, %v1321_v60  ;;  %v7544_v63 = vld [vmem:[#allocation7 + $0x198] sm:$0xff]  ;;  %8173 = vst [vmem:[#allocation27_spill] sm:$0xff] %v7556_v54 }
  0x80   :  { %8170 = vst [vmem:[#allocation24_spill] sm:$0xff] %v7544_v63 }
  0x81   :  { %v1722_v19 = vadd.f32 %v1721_v9, %v1322_v6  ;;  %v1328_v6 = vmul.f32 %v7544_v63, %v7544_v63  ;;  %v7560_v63 = vld [vmem:[#allocation7 + $0x1b8] sm:$0xff] }
  0x82   :  { %8174 = vst [vmem:[#allocation28_spill] sm:$0xff] %v7560_v63 }
  0x83   :  { %v1723_v28 = vadd.f32 %v1722_v19, %v1323_v15  ;;  %v7548_v15 = vld [vmem:[#allocation7 + $0x1a0] sm:$0xff] }
  0x84   :  { %8171 = vst [vmem:[#allocation25_spill] sm:$0xff] %v7548_v15  ;;  %v1329_v19 = vmul.f32 %v7548_v15, %v7548_v15  ;;  %v7564_v15 = vld [vmem:[#allocation7 + $0x1c0] sm:$0xff] }
  0x85   :  { %v1724_v40 = vadd.f32 %v1723_v28, %v1324_v27  ;;  %v7552_v28 = vld [vmem:[#allocation7 + $0x1a8] sm:$0xff]  ;;  %8175 = vst [vmem:[#allocation29_spill] sm:$0xff] %v7564_v15 }
  0x86   :  { %8172 = vst [vmem:[#allocation26_spill] sm:$0xff] %v7552_v28 }
  0x87   :  { %v1725_v49 = vadd.f32 %v1724_v40, %v1325_v36  ;;  %v1330_v36 = vmul.f32 %v7552_v28, %v7552_v28  ;;  %v7568_v28 = vld [vmem:[#allocation7 + $0x1c8] sm:$0xff] }
  0x88   :  { %8176 = vst [vmem:[#allocation30_spill] sm:$0xff] %v7568_v28 }
  0x89   :  { %v1726_v60 = vadd.f32 %v1725_v49, %v1326_v46  ;;  %v1331_v46 = vmul.f32 %v7556_v54, %v7556_v54  ;;  %v7572_v54 = vld [vmem:[#allocation7 + $0x1d0] sm:$0xff] }
  0x8a   :  { %8177 = vst [vmem:[#allocation31_spill] sm:$0xff] %v7572_v54 }
  0x8b   :  { %v1727_v9 = vadd.f32 %v1726_v60, %v1327_v55  ;;  %v1332_v55 = vmul.f32 %v7560_v63, %v7560_v63  ;;  %v7576_v63 = vld [vmem:[#allocation7 + $0x1d8] sm:$0xff] }
  0x8c   :  { %8178 = vst [vmem:[#allocation32_spill] sm:$0xff] %v7576_v63 }
  0x8d   :  { %v1728_v27 = vadd.f32 %v1727_v9, %v1328_v6  ;;  %v1333_v6 = vmul.f32 %v7564_v15, %v7564_v15  ;;  %v7580_v15 = vld [vmem:[#allocation7 + $0x1e0] sm:$0xff] }
  0x8e   :  { %8179 = vst [vmem:[#allocation33_spill] sm:$0xff] %v7580_v15 }
  0x8f   :  { %v1729_v40 = vadd.f32 %v1728_v27, %v1329_v19  ;;  %v1334_v19 = vmul.f32 %v7568_v28, %v7568_v28  ;;  %v7584_v28 = vld [vmem:[#allocation7 + $0x1e8] sm:$0xff] }
  0x90   :  { %8180 = vst [vmem:[#allocation34_spill] sm:$0xff] %v7584_v28 }
  0x91   :  { %v1730_v49 = vadd.f32 %v1729_v40, %v1330_v36  ;;  %v1335_v36 = vmul.f32 %v7572_v54, %v7572_v54  ;;  %v7588_v54 = vld [vmem:[#allocation7 + $0x1f0] sm:$0xff] }
  0x92   :  { %8181 = vst [vmem:[#allocation35_spill] sm:$0xff] %v7588_v54 }
  0x93   :  { %v1731_v60 = vadd.f32 %v1730_v49, %v1331_v46  ;;  %v1336_v46 = vmul.f32 %v7576_v63, %v7576_v63  ;;  %v7592_v63 = vld [vmem:[#allocation7 + $0x1f8] sm:$0xff] }
  0x94   :  { %8182 = vst [vmem:[#allocation36_spill] sm:$0xff] %v7592_v63 }
  0x95   :  { %v1732_v9 = vadd.f32 %v1731_v60, %v1332_v55  ;;  %v1337_v55 = vmul.f32 %v7580_v15, %v7580_v15  ;;  %v7596_v15 = vld [vmem:[#allocation7 + $0x200] sm:$0xff] }
  0x96   :  { %8183 = vst [vmem:[#allocation37_spill] sm:$0xff] %v7596_v15 }
  0x97   :  { %v1733_v27 = vadd.f32 %v1732_v9, %v1333_v6  ;;  %v1338_v6 = vmul.f32 %v7584_v28, %v7584_v28  ;;  %v7600_v28 = vld [vmem:[#allocation7 + $0x208] sm:$0xff] }
  0x98   :  { %8184 = vst [vmem:[#allocation38_spill] sm:$0xff] %v7600_v28 }
  0x99   :  { %v1734_v40 = vadd.f32 %v1733_v27, %v1334_v19  ;;  %v1339_v19 = vmul.f32 %v7588_v54, %v7588_v54  ;;  %v7604_v54 = vld [vmem:[#allocation7 + $0x210] sm:$0xff] }
  0x9a   :  { %8185 = vst [vmem:[#allocation39_spill] sm:$0xff] %v7604_v54 }
  0x9b   :  { %v1735_v49 = vadd.f32 %v1734_v40, %v1335_v36  ;;  %v1340_v36 = vmul.f32 %v7592_v63, %v7592_v63  ;;  %v7612_v63 = vld [vmem:[#allocation7 + $0x220] sm:$0xff] }
  0x9c   :  { %8187 = vst [vmem:[#allocation41_spill] sm:$0xff] %v7612_v63 }
  0x9d   :  { %v1736_v60 = vadd.f32 %v1735_v49, %v1336_v46  ;;  %v1341_v46 = vmul.f32 %v7596_v15, %v7596_v15  ;;  %v7616_v15 = vld [vmem:[#allocation7 + $0x228] sm:$0xff] }
  0x9e   :  { %8188 = vst [vmem:[#allocation42_spill] sm:$0xff] %v7616_v15 }
  0x9f   :  { %v1737_v9 = vadd.f32 %v1736_v60, %v1337_v55  ;;  %v1342_v55 = vmul.f32 %v7600_v28, %v7600_v28  ;;  %v7620_v28 = vld [vmem:[#allocation7 + $0x230] sm:$0xff] }
  0xa0   :  { %8189 = vst [vmem:[#allocation43_spill] sm:$0xff] %v7620_v28 }
  0xa1   :  { %v1738_v27 = vadd.f32 %v1737_v9, %v1338_v6  ;;  %v1343_v6 = vmul.f32 %v7604_v54, %v7604_v54  ;;  %v7608_v9 = vld [vmem:[#allocation7 + $0x218] sm:$0xff]  ;;  %v1347_v54 = vmul.f32 %v7620_v28, %v7620_v28 }
  0xa2   :  { %8186 = vst [vmem:[#allocation40_spill] sm:$0xff] %v7608_v9 }
  0xa3   :  { %v1739_v40 = vadd.f32 %v1738_v27, %v1339_v19  ;;  %v1344_v19 = vmul.f32 %v7608_v9, %v7608_v9  ;;  %v7624_v9 = vld [vmem:[#allocation7 + $0x238] sm:$0xff] }
  0xa4   :  { %8190 = vst [vmem:[#allocation44_spill] sm:$0xff] %v7624_v9 }
  0xa5   :  { %v1740_v49 = vadd.f32 %v1739_v40, %v1340_v36  ;;  %v1345_v36 = vmul.f32 %v7612_v63, %v7612_v63  ;;  %v7628_v63 = vld [vmem:[#allocation7 + $0x240] sm:$0xff] }
  0xa6   :  { %8191 = vst [vmem:[#allocation45_spill] sm:$0xff] %v7628_v63 }
  0xa7   :  { %v1741_v60 = vadd.f32 %v1740_v49, %v1341_v46  ;;  %v1346_v46 = vmul.f32 %v7616_v15, %v7616_v15  ;;  %v7632_v15 = vld [vmem:[#allocation7 + $0x248] sm:$0xff] }
  0xa8   :  { %8192 = vst [vmem:[#allocation46_spill] sm:$0xff] %v7632_v15  ;;  %v1350_v28 = vmul.f32 %v7632_v15, %v7632_v15 }
  0xa9   :  { %v1742_v27 = vadd.f32 %v1741_v60, %v1342_v55  ;;  %v1348_v55 = vmul.f32 %v7624_v9, %v7624_v9  ;;  %v872_v9 = vsub.f32 %v471_v33, %v7348_v5  ;;  %v1354_v5 = vmul.f32 %v7648_v51, %v7648_v51 }
  0xab   :  { %v1743_v40 = vadd.f32 %v1742_v27, %v1343_v6  ;;  %v1349_v6 = vmul.f32 %v7628_v63, %v7628_v63 }
  0xad   :  { %v1744_v49 = vadd.f32 %v1743_v40, %v1344_v19  ;;  %v469_v19 = vld [vmem:[#allocation4] sm:$0xff]  ;;  %v470_v40 = vld [vmem:[#allocation4 + $0x8] sm:$0xff] }
  0xaf   :  { %v1745_v42 = vadd.f32 %v1744_v49, %v1345_v36  ;;  %v7636_v49 = vld [vmem:[#allocation7 + $0x250] sm:$0xff] }
  0xb0   :  { %8193 = vst [vmem:[#allocation47_spill] sm:$0xff] %v7636_v49  ;;  %v1351_v63 = vmul.f32 %v7636_v49, %v7636_v49  ;;  %v476_v49 = vld [vmem:[#allocation4 + $0x38] sm:$0xff] }
  0xb1   :  { %v1746_v60 = vadd.f32 %v1745_v42, %v1346_v46  ;;  %v870_v42 = vsub.f32 %v469_v19, %v7340_v1  ;;  %v871_v46 = vsub.f32 %v470_v40, %v7342_v2 }
  0xb3   :  { %v1747_v27 = vadd.f32 %v1746_v60, %v1347_v54  ;;  %v7642_v60 = vld [vmem:[#allocation7 + $0x258] sm:$0xff]  ;;  %v2089_v2 = vmul.f32 %v870_v42, %v870_v42  ;;  %v2090_v40 = vmul.f32 %v871_v46, %v871_v46 }
  0xb4   :  { %8194 = vst [vmem:[#allocation48_spill] sm:$0xff] %v7642_v60  ;;  %v1352_v15 = vmul.f32 %v7642_v60, %v7642_v60  ;;  %v2091_v60 = vmul.f32 %v872_v9, %v872_v9  ;;  %v147_v42 = vld [vmem:[#allocation7 + $0x278] sm:$0xff]  ;;  %v478_v9 = vld [vmem:[#allocation4 + $0x48] sm:$0xff] }
  0xb5   :  { %v1748_v36 = vadd.f32 %v1747_v27, %v1348_v55  ;;  %v144_v27 = vld [vmem:[#allocation7 + $0x260] sm:$0xff]  ;;  %v1356_v45 = vmul.f32 %v147_v42, %v147_v42 }
  0xb6   :  { %v1353_v1 = vmul.f32 %v144_v27, %v144_v27  ;;  %v2092_v27 = vmul.f32 %v873_v0, %v873_v0  ;;  %v152_v42 = vld [vmem:[#allocation7 + $0x2a0] sm:$0xff] }
  0xb7   :  { %v1749_v54 = vadd.f32 %v1748_v36, %v1349_v6  ;;  %v475_v6 = vld [vmem:[#allocation4 + $0x30] sm:$0xff]  ;;  %v874_v36 = vsub.f32 %v473_v13, %v7356_v11 }
  0xb8   :  { %v876_v46 = vsub.f32 %v475_v6, %v7364_v17 }
  0xb9   :  { %v1750_v55 = vadd.f32 %v1749_v54, %v1350_v28  ;;  %v146_v28 = vld [vmem:[#allocation7 + $0x270] sm:$0xff]  ;;  %v875_v54 = vsub.f32 %v474_v58, %v7360_v14  ;;  %v2093_v11 = vmul.f32 %v874_v36, %v874_v36  ;;  %v879_v36 = vsub.f32 %v478_v9, %v7376_v26  ;;  %v483_v9 = vld [vmem:[#allocation4 + $0x70] sm:$0xff] }
  0xba   :  { %v1355_v8 = vmul.f32 %v146_v28, %v146_v28  ;;  %v149_v28 = vld [vmem:[#allocation7 + $0x288] sm:$0xff]  ;;  %v2095_v17 = vmul.f32 %v876_v46, %v876_v46  ;;  %v1361_v46 = vmul.f32 %v152_v42, %v152_v42 }
  0xbb   :  { %v1751_v19 = vadd.f32 %v1750_v55, %v1351_v63  ;;  %v2490_v63 = vadd.f32 %v2090_v40, %v2089_v2  ;;  %v477_v55 = vld [vmem:[#allocation4 + $0x40] sm:$0xff]  ;;  %v2094_v14 = vmul.f32 %v875_v54, %v875_v54  ;;  %v1358_v2 = vmul.f32 %v149_v28, %v149_v28  ;;  %v154_v28 = vld [vmem:[#allocation7 + $0x2b0] sm:$0xff] }
  0xbc   :  { %v878_v0 = vsub.f32 %v477_v55, %v7372_v23  ;;  %v481_v54 = vld [vmem:[#allocation4 + $0x60] sm:$0xff]  ;;  %v2098_v26 = vmul.f32 %v879_v36, %v879_v36 }
  0xbd   :  { %v1752_v33 = vadd.f32 %v1751_v19, %v1352_v15  ;;  %v2491_v13 = vadd.f32 %v2490_v63, %v2091_v60  ;;  %v877_v15 = vsub.f32 %v476_v49, %v7368_v20  ;;  %v1357_v19 = vmul.f32 %v148_v31, %v148_v31  ;;  %v480_v60 = vld [vmem:[#allocation4 + $0x58] sm:$0xff]  ;;  %v151_v31 = vld [vmem:[#allocation7 + $0x298] sm:$0xff] }
  0xbe   :  { %v2097_v23 = vmul.f32 %v878_v0, %v878_v0  ;;  %v485_v36 = vld [vmem:[#allocation4 + $0x80] sm:$0xff] }
  0xbf   :  { %v1753_v22 = vadd.f32 %v1752_v33, %v1353_v1  ;;  %v2492_v58 = vadd.f32 %v2491_v13, %v2092_v27  ;;  %v479_v1 = vld [vmem:[#allocation4 + $0x50] sm:$0xff]  ;;  %v150_v33 = vld [vmem:[#allocation7 + $0x290] sm:$0xff]  ;;  %v2096_v20 = vmul.f32 %v877_v15, %v877_v15  ;;  %v882_v15 = vsub.f32 %v481_v54, %v7388_v35 }
  0xc0   :  { %v153_v13 = vld [vmem:[#allocation7 + $0x2a8] sm:$0xff] }
  0xc1   :  { %v1754_v37 = vadd.f32 %v1753_v22, %v1354_v5  ;;  %v2493_v6 = vadd.f32 %v2492_v58, %v2093_v11  ;;  %v1359_v5 = vmul.f32 %v150_v33, %v150_v33  ;;  %v884_v33 = vsub.f32 %v483_v9, %v7396_v41  ;;  %v159_v9 = vld [vmem:[#allocation7 + $0x2d8] sm:$0xff] }
  0xc2   :  { %v2101_v35 = vmul.f32 %v882_v15, %v882_v15 }
  0xc3   :  { %v1755_v51 = vadd.f32 %v1754_v37, %v1355_v8  ;;  %v2494_v49 = vadd.f32 %v2493_v6, %v2094_v14  ;;  %v880_v37 = vsub.f32 %v479_v1, %v7380_v29  ;;  %v1360_v8 = vmul.f32 %v151_v31, %v151_v31  ;;  %v484_v1 = vld [vmem:[#allocation4 + $0x78] sm:$0xff]  ;;  %v155_v6 = vld [vmem:[#allocation7 + $0x2b8] sm:$0xff]  ;;  %v486_v31 = vld [vmem:[#allocation4 + $0x88] sm:$0xff] }
  0xc4   :  { %v2103_v41 = vmul.f32 %v884_v33, %v884_v33 }
  0xc5   :  { %v1756_v40 = vadd.f32 %v1755_v51, %v1356_v45  ;;  %v2495_v63 = vadd.f32 %v2494_v49, %v2095_v17  ;;  %v881_v45 = vsub.f32 %v480_v60, %v7384_v32  ;;  %v482_v51 = vld [vmem:[#allocation4 + $0x68] sm:$0xff]  ;;  %v2099_v29 = vmul.f32 %v880_v37, %v880_v37 }
  0xc6   :  { %v883_v0 = vsub.f32 %v482_v51, %v7392_v38  ;;  %v1364_v60 = vmul.f32 %v155_v6, %v155_v6  ;;  %v885_v49 = vsub.f32 %v484_v1, %v7400_v44  ;;  %v161_v6 = vld [vmem:[#allocation7 + $0x2e8] sm:$0xff] }
  0xc7   :  { %v1757_v22 = vadd.f32 %v1756_v40, %v1357_v19  ;;  %v2496_v11 = vadd.f32 %v2495_v63, %v2096_v20  ;;  %v1362_v19 = vmul.f32 %v153_v13, %v153_v13  ;;  %v2100_v32 = vmul.f32 %v881_v45, %v881_v45  ;;  %v156_v20 = vld [vmem:[#allocation7 + $0x2c0] sm:$0xff]  ;;  %v487_v63 = vld [vmem:[#allocation4 + $0x90] sm:$0xff] }
  0xc8   :  { %v1365_v37 = vmul.f32 %v156_v20, %v156_v20  ;;  %v2102_v38 = vmul.f32 %v883_v0, %v883_v0  ;;  %v2104_v44 = vmul.f32 %v885_v49, %v885_v49  ;;  %v160_v0 = vld [vmem:[#allocation7 + $0x2e0] sm:$0xff]  ;;  %v492_v49 = vld [vmem:[#allocation4 + $0xb8] sm:$0xff] }
  0xc9   :  { %v1758_v27 = vadd.f32 %v1757_v22, %v1358_v2  ;;  %v2497_v58 = vadd.f32 %v2496_v11, %v2097_v23  ;;  %v1363_v2 = vmul.f32 %v154_v28, %v154_v28  ;;  %v886_v23 = vsub.f32 %v485_v36, %v7404_v47  ;;  %v491_v36 = vld [vmem:[#allocation4 + $0xb0] sm:$0xff] }
  0xcb   :  { %v1759_v55 = vadd.f32 %v1758_v27, %v1359_v5  ;;  %v2498_v17 = vadd.f32 %v2497_v58, %v2098_v26  ;;  %v157_v27 = vld [vmem:[#allocation7 + $0x2c8] sm:$0xff]  ;;  %v488_v26 = vld [vmem:[#allocation4 + $0x98] sm:$0xff]  ;;  %v2105_v47 = vmul.f32 %v886_v23, %v886_v23 }
  0xcc   :  { %v1366_v42 = vmul.f32 %v157_v27, %v157_v27  ;;  %v889_v1 = vsub.f32 %v488_v26, %v7416_v56  ;;  %v493_v27 = vld [vmem:[#allocation4 + $0xc0] sm:$0xff] }
  0xcd   :  { %v1760_v14 = vadd.f32 %v1759_v55, %v1360_v8  ;;  %v2499_v22 = vadd.f32 %v2498_v17, %v2099_v29  ;;  %v887_v55 = vsub.f32 %v486_v31, %v7408_v50  ;;  %v1368_v29 = vmul.f32 %v159_v9, %v159_v9 }
  0xce   :  { %v2108_v56 = vmul.f32 %v889_v1, %v889_v1  ;;  %v167_v1 = vld [vmem:[#allocation7 + $0x318] sm:$0xff] }
  0xcf   :  { %v1761_v40 = vadd.f32 %v1760_v14, %v1361_v46  ;;  %v2500_v8 = vadd.f32 %v2499_v22, %v2100_v32  ;;  %v158_v46 = vld [vmem:[#allocation7 + $0x2d0] sm:$0xff]  ;;  %v489_v14 = vld [vmem:[#allocation4 + $0xa0] sm:$0xff]  ;;  %v2106_v50 = vmul.f32 %v887_v55, %v887_v55 }
  0xd0   :  { %v1367_v11 = vmul.f32 %v158_v46, %v158_v46  ;;  %v890_v33 = vsub.f32 %v489_v14, %v7420_v59  ;;  %v162_v22 = vld [vmem:[#allocation7 + $0x2f0] sm:$0xff] }
  0xd1   :  { %v1762_v5 = vadd.f32 %v1761_v40, %v1362_v19  ;;  %v2501_v51 = vadd.f32 %v2500_v8, %v2101_v35  ;;  %v888_v19 = vsub.f32 %v487_v63, %v7412_v53  ;;  %v1369_v40 = vmul.f32 %v160_v0, %v160_v0  ;;  %v166_v14 = vld [vmem:[#allocation7 + $0x310] sm:$0xff] }
  0xd2   :  { %v1371_v31 = vmul.f32 %v162_v22, %v162_v22  ;;  %v892_v8 = vsub.f32 %v491_v36, %v7428_v3  ;;  %v2109_v59 = vmul.f32 %v890_v33, %v890_v33  ;;  %v498_v36 = vld [vmem:[#allocation4 + $0xe8] sm:$0xff] }
  0xd3   :  { %v1763_v54 = vadd.f32 %v1762_v5, %v1363_v2  ;;  %v2502_v15 = vadd.f32 %v2501_v51, %v2102_v38  ;;  %v490_v2 = vld [vmem:[#allocation4 + $0xa8] sm:$0xff]  ;;  %v2107_v53 = vmul.f32 %v888_v19, %v888_v19  ;;  %v163_v38 = vld [vmem:[#allocation7 + $0x2f8] sm:$0xff] }
  0xd4   :  { %v891_v20 = vsub.f32 %v490_v2, %v7424_v62  ;;  %v1372_v23 = vmul.f32 %v163_v38, %v163_v38  ;;  %v494_v51 = vld [vmem:[#allocation4 + $0xc8] sm:$0xff]  ;;  %v2111_v3 = vmul.f32 %v892_v8, %v892_v8  ;;  %v500_v38 = vld [vmem:[#allocation4 + $0xf8] sm:$0xff] }
  0xd5   :  { %v1764_v45 = vadd.f32 %v1763_v54, %v1364_v60  ;;  %v2503_v28 = vadd.f32 %v2502_v15, %v2103_v41  ;;  %v1370_v60 = vmul.f32 %v161_v6, %v161_v6  ;;  %v893_v41 = vsub.f32 %v492_v49, %v7432_v7  ;;  %v168_v6 = vld [vmem:[#allocation7 + $0x320] sm:$0xff] }
  0xd6   :  { %v2110_v62 = vmul.f32 %v891_v20, %v891_v20  ;;  %v499_v20 = vld [vmem:[#allocation4 + $0xf0] sm:$0xff] }
  0xd7   :  { %v1765_v13 = vadd.f32 %v1764_v45, %v1365_v37  ;;  %v2504_v17 = vadd.f32 %v2503_v28, %v2104_v44  ;;  %v164_v45 = vld [vmem:[#allocation7 + $0x300] sm:$0xff]  ;;  %v495_v44 = vld [vmem:[#allocation4 + $0xd0] sm:$0xff]  ;;  %v2112_v7 = vmul.f32 %v893_v41, %v893_v41 }
  0xd8   :  { %v1373_v46 = vmul.f32 %v164_v45, %v164_v45  ;;  %v896_v2 = vsub.f32 %v495_v44, %v7444_v21  ;;  %v173_v44 = vld [vmem:[#allocation7 + $0x348] sm:$0xff] }
  0xd9   :  { %v1766_v58 = vadd.f32 %v1765_v13, %v1366_v42  ;;  %v2505_v35 = vadd.f32 %v2504_v17, %v2105_v47  ;;  %v894_v13 = vsub.f32 %v493_v27, %v7436_v12  ;;  %v1375_v47 = vmul.f32 %v166_v14, %v166_v14 }
  0xda   :  { %v2115_v21 = vmul.f32 %v896_v2, %v896_v2 }
  0xdb   :  { %v1767_v32 = vadd.f32 %v1766_v58, %v1367_v11  ;;  %v2506_v54 = vadd.f32 %v2505_v35, %v2106_v50  ;;  %v165_v11 = vld [vmem:[#allocation7 + $0x308] sm:$0xff]  ;;  %v496_v58 = vld [vmem:[#allocation4 + $0xd8] sm:$0xff]  ;;  %v2113_v12 = vmul.f32 %v894_v13, %v894_v13 }
  0xdc   :  { %v1374_v15 = vmul.f32 %v165_v11, %v165_v11  ;;  %v897_v33 = vsub.f32 %v496_v58, %v7448_v25  ;;  %v169_v35 = vld [vmem:[#allocation7 + $0x328] sm:$0xff] }
  0xdd   :  { %v1768_v5 = vadd.f32 %v1767_v32, %v1368_v29  ;;  %v2507_v42 = vadd.f32 %v2506_v54, %v2107_v53  ;;  %v895_v29 = vsub.f32 %v494_v51, %v7440_v16  ;;  %v1376_v32 = vmul.f32 %v167_v1, %v167_v1  ;;  %v175_v1 = vld [vmem:[#allocation7 + $0x358] sm:$0xff] }
  0xde   :  { %v1378_v49 = vmul.f32 %v169_v35, %v169_v35  ;;  %v899_v54 = vsub.f32 %v498_v36, %v7456_v34  ;;  %v2116_v25 = vmul.f32 %v897_v33, %v897_v33  ;;  %v506_v33 = vld [vmem:[#allocation4 + $0x128] sm:$0xff]  ;;  %v507_v35 = vld [vmem:[#allocation4 + $0x130] sm:$0xff] }
  0xdf   :  { %v1769_v37 = vadd.f32 %v1768_v5, %v1369_v40  ;;  %v2508_v26 = vadd.f32 %v2507_v42, %v2108_v56  ;;  %v497_v40 = vld [vmem:[#allocation4 + $0xe0] sm:$0xff]  ;;  %v2114_v16 = vmul.f32 %v895_v29, %v895_v29  ;;  %v170_v56 = vld [vmem:[#allocation7 + $0x330] sm:$0xff] }
  0xe0   :  { %v898_v22 = vsub.f32 %v497_v40, %v7452_v30  ;;  %v1379_v8 = vmul.f32 %v170_v56, %v170_v56  ;;  %v501_v42 = vld [vmem:[#allocation4 + $0x100] sm:$0xff]  ;;  %v2118_v34 = vmul.f32 %v899_v54, %v899_v54  ;;  %v174_v29 = vld [vmem:[#allocation7 + $0x350] sm:$0xff] }
  0xe1   :  { %v1770_v63 = vadd.f32 %v1769_v37, %v1370_v60  ;;  %v2509_v19 = vadd.f32 %v2508_v26, %v2109_v59  ;;  %v1377_v60 = vmul.f32 %v168_v6, %v168_v6  ;;  %v900_v59 = vsub.f32 %v499_v20, %v7460_v39  ;;  %v505_v40 = vld [vmem:[#allocation4 + $0x120] sm:$0xff] }
  0xe2   :  { %v2117_v30 = vmul.f32 %v898_v22, %v898_v22 }
  0xe3   :  { %v1771_v55 = vadd.f32 %v1770_v63, %v1371_v31  ;;  %v2510_v0 = vadd.f32 %v2509_v19, %v2110_v62  ;;  %v171_v63 = vld [vmem:[#allocation7 + $0x338] sm:$0xff]  ;;  %v502_v62 = vld [vmem:[#allocation4 + $0x108] sm:$0xff]  ;;  %v2119_v39 = vmul.f32 %v900_v59, %v900_v59 }
  0xe4   :  { %v1380_v45 = vmul.f32 %v171_v63, %v171_v63  ;;  %v903_v58 = vsub.f32 %v502_v62, %v7472_v52  ;;  %v8196_v62 = vld [vmem:[#allocation13_spill] sm:$0xff] }
  0xe5   :  { %v1772_v9 = vadd.f32 %v1771_v55, %v1372_v23  ;;  %v2511_v17 = vadd.f32 %v2510_v0, %v2111_v3  ;;  %v901_v55 = vsub.f32 %v500_v38, %v7464_v43  ;;  %v1382_v3 = vmul.f32 %v173_v44, %v173_v44 }
  0xe6   :  { %v2122_v52 = vmul.f32 %v903_v58, %v903_v58  ;;  %v183_v58 = vld [vmem:[#allocation7 + $0x398] sm:$0xff] }
  0xe7   :  { %v1773_v28 = vadd.f32 %v1772_v9, %v1373_v46  ;;  %v2512_v53 = vadd.f32 %v2511_v17, %v2112_v7  ;;  %v172_v46 = vld [vmem:[#allocation7 + $0x340] sm:$0xff]  ;;  %v503_v9 = vld [vmem:[#allocation4 + $0x110] sm:$0xff]  ;;  %v2120_v43 = vmul.f32 %v901_v55, %v901_v55 }
  0xe8   :  { %v1381_v26 = vmul.f32 %v172_v46, %v172_v46  ;;  %v904_v2 = vsub.f32 %v503_v9, %v7476_v57  ;;  %v176_v17 = vld [vmem:[#allocation7 + $0x360] sm:$0xff]  ;;  %v181_v55 = vld [vmem:[#allocation7 + $0x388] sm:$0xff]  ;;  %v8197_v9 = vld [vmem:[#allocation14_spill] sm:$0xff] }
  0xe9   :  { %v1774_v50 = vadd.f32 %v1773_v28, %v1374_v15  ;;  %v2513_v37 = vadd.f32 %v2512_v53, %v2113_v12  ;;  %v902_v15 = vsub.f32 %v501_v42, %v7468_v48  ;;  %v1383_v28 = vmul.f32 %v174_v29, %v174_v29  ;;  %v180_v42 = vld [vmem:[#allocation7 + $0x380] sm:$0xff] }
  0xea   :  { %v1385_v36 = vmul.f32 %v176_v17, %v176_v17  ;;  %v906_v53 = vsub.f32 %v505_v40, %v7484_v4  ;;  %v2123_v57 = vmul.f32 %v904_v2, %v904_v2  ;;  %v184_v40 = vld [vmem:[#allocation7 + $0x3a0] sm:$0xff] }
  0xeb   :  { %v1775_v5 = vadd.f32 %v1774_v50, %v1375_v47  ;;  %v2514_v23 = vadd.f32 %v2513_v37, %v2114_v16  ;;  %v504_v47 = vld [vmem:[#allocation4 + $0x118] sm:$0xff]  ;;  %v2121_v48 = vmul.f32 %v902_v15, %v902_v15  ;;  %v177_v16 = vld [vmem:[#allocation7 + $0x368] sm:$0xff] }
  0xec   :  { %v905_v6 = vsub.f32 %v504_v47, %v7480_v61  ;;  %v1386_v22 = vmul.f32 %v177_v16, %v177_v16  ;;  %v508_v37 = vld [vmem:[#allocation4 + $0x138] sm:$0xff]  ;;  %v2125_v4 = vmul.f32 %v906_v53, %v906_v53  ;;  %v8198_v47 = vld [vmem:[#allocation15_spill] sm:$0xff] }
  0xed   :  { %v1776_v31 = vadd.f32 %v1775_v5, %v1376_v32  ;;  %v2515_v51 = vadd.f32 %v2514_v23, %v2115_v21  ;;  %v1384_v32 = vmul.f32 %v175_v1, %v175_v1  ;;  %v907_v21 = vsub.f32 %v506_v33, %v7488_v10  ;;  %v182_v15 = vld [vmem:[#allocation7 + $0x390] sm:$0xff] }
  0xee   :  { %v2124_v61 = vmul.f32 %v905_v6, %v905_v6 }
  0xef   :  { %v1777_v27 = vadd.f32 %v1776_v31, %v1377_v60  ;;  %v2516_v13 = vadd.f32 %v2515_v51, %v2116_v25  ;;  %v178_v31 = vld [vmem:[#allocation7 + $0x370] sm:$0xff]  ;;  %v509_v25 = vld [vmem:[#allocation4 + $0x140] sm:$0xff]  ;;  %v2126_v10 = vmul.f32 %v907_v21, %v907_v21 }
  0xf0   :  { %v1387_v56 = vmul.f32 %v178_v31, %v178_v31  ;;  %v516_v31 = vld [vmem:[#allocation4 + $0x178] sm:$0xff] }
  0xf1   :  { %v1778_v41 = vadd.f32 %v1777_v27, %v1378_v49  ;;  %v2517_v14 = vadd.f32 %v2516_v13, %v2117_v30  ;;  %v908_v27 = vsub.f32 %v507_v35, %v7492_v18  ;;  %v1389_v30 = vmul.f32 %v180_v42, %v180_v42  ;;  %v8203_v42 = vld [vmem:[#allocation20_spill] sm:$0xff] }
  0xf3   :  { %v1779_v11 = vadd.f32 %v1778_v41, %v1379_v8  ;;  %v2518_v0 = vadd.f32 %v2517_v14, %v2118_v34  ;;  %v179_v8 = vld [vmem:[#allocation7 + $0x378] sm:$0xff]  ;;  %v510_v41 = vld [vmem:[#allocation4 + $0x148] sm:$0xff]  ;;  %v1390_v34 = vmul.f32 %v181_v55, %v181_v55  ;;  %v2127_v18 = vmul.f32 %v908_v27, %v908_v27  ;;  %v189_v55 = vld [vmem:[#allocation7 + $0x3c8] sm:$0xff] }
  0xf4   :  { %v1388_v23 = vmul.f32 %v179_v8, %v179_v8  ;;  %v517_v27 = vld [vmem:[#allocation4 + $0x180] sm:$0xff] }
  0xf5   :  { %v1780_v19 = vadd.f32 %v1779_v11, %v1380_v45  ;;  %v2519_v12 = vadd.f32 %v2518_v0, %v2119_v39  ;;  %v909_v45 = vsub.f32 %v508_v37, %v7496_v24  ;;  %v511_v11 = vld [vmem:[#allocation4 + $0x150] sm:$0xff]  ;;  %v1391_v39 = vmul.f32 %v182_v15, %v182_v15  ;;  %v190_v15 = vld [vmem:[#allocation7 + $0x3d0] sm:$0xff] }
  0xf7   :  { %v1781_v7 = vadd.f32 %v1780_v19, %v1381_v26  ;;  %v2520_v5 = vadd.f32 %v2519_v12, %v2120_v43  ;;  %v910_v26 = vsub.f32 %v509_v25, %v8196_v62  ;;  %v512_v19 = vld [vmem:[#allocation4 + $0x158] sm:$0xff]  ;;  %v2128_v24 = vmul.f32 %v909_v45, %v909_v45 }
  0xf8   :  { %v1392_v43 = vmul.f32 %v183_v58, %v183_v58  ;;  %v1393_v12 = vmul.f32 %v184_v40, %v184_v40  ;;  %v917_v45 = vsub.f32 %v516_v31, %v8203_v42  ;;  %v8204_v62 = vld [vmem:[#allocation21_spill] sm:$0xff]  ;;  %v191_v58 = vld [vmem:[#allocation7 + $0x3d8] sm:$0xff]  ;;  %v192_v40 = vld [vmem:[#allocation7 + $0x3e0] sm:$0xff] }
  0xf9   :  { %v1782_v50 = vadd.f32 %v1781_v7, %v1382_v3  ;;  %v2521_v49 = vadd.f32 %v2520_v5, %v2121_v48  ;;  %v911_v3 = vsub.f32 %v510_v41, %v8197_v9  ;;  %v513_v7 = vld [vmem:[#allocation4 + $0x160] sm:$0xff]  ;;  %v2129_v1 = vmul.f32 %v910_v26, %v910_v26  ;;  %v514_v48 = vld [vmem:[#allocation4 + $0x168] sm:$0xff]  ;;  %v515_v5 = vld [vmem:[#allocation4 + $0x170] sm:$0xff] }
  0xfa   :  { %v518_v41 = vld [vmem:[#allocation4 + $0x188] sm:$0xff]  ;;  %v918_v26 = vsub.f32 %v517_v27, %v8204_v62  ;;  %v8205_v9 = vld [vmem:[#allocation22_spill] sm:$0xff]  ;;  %v8212_v62 = vld [vmem:[#allocation29_spill] sm:$0xff] }
  0xfb   :  { %v1783_v60 = vadd.f32 %v1782_v50, %v1383_v28  ;;  %v2522_v38 = vadd.f32 %v2521_v49, %v2122_v52  ;;  %v912_v28 = vsub.f32 %v511_v11, %v8198_v47  ;;  %v2130_v6 = vmul.f32 %v911_v3, %v911_v3  ;;  %v519_v11 = vld [vmem:[#allocation4 + $0x190] sm:$0xff]  ;;  %v8206_v47 = vld [vmem:[#allocation23_spill] sm:$0xff]  ;;  %v524_v31 = vld [vmem:[#allocation4 + $0x1b8] sm:$0xff] }
  0xfc   :  { %v919_v3 = vsub.f32 %v518_v41, %v8205_v9  ;;  %v525_v27 = vld [vmem:[#allocation4 + $0x1c0] sm:$0xff]  ;;  %v8211_v42 = vld [vmem:[#allocation28_spill] sm:$0xff] }
  0xfd   :  { %v1784_v20 = vadd.f32 %v1783_v60, %v1384_v32  ;;  %v2523_v59 = vadd.f32 %v2522_v38, %v2123_v57  ;;  %v8199_v32 = vld [vmem:[#allocation16_spill] sm:$0xff]  ;;  %v8200_v60 = vld [vmem:[#allocation17_spill] sm:$0xff]  ;;  %v2131_v35 = vmul.f32 %v912_v28, %v912_v28  ;;  %v8201_v57 = vld [vmem:[#allocation18_spill] sm:$0xff]  ;;  %v920_v28 = vsub.f32 %v519_v11, %v8206_v47 }
  0xfe   :  { %v913_v50 = vsub.f32 %v512_v19, %v8199_v32  ;;  %v914_v52 = vsub.f32 %v513_v7, %v8200_v60  ;;  %v915_v49 = vsub.f32 %v514_v48, %v8201_v57  ;;  %v8202_v38 = vld [vmem:[#allocation19_spill] sm:$0xff]  ;;  %v520_v19 = vld [vmem:[#allocation4 + $0x198] sm:$0xff]  ;;  %v8207_v32 = vld [vmem:[#allocation24_spill] sm:$0xff] }
  0xff   :  { %v1785_v54 = vadd.f32 %v1784_v20, %v1385_v36  ;;  %v2524_v46 = vadd.f32 %v2523_v59, %v2124_v61  ;;  %v185_v36 = vld [vmem:[#allocation7 + $0x3a8] sm:$0xff]  ;;  %v186_v20 = vld [vmem:[#allocation7 + $0x3b0] sm:$0xff]  ;;  %v187_v61 = vld [vmem:[#allocation7 + $0x3b8] sm:$0xff]  ;;  %v916_v8 = vsub.f32 %v515_v5, %v8202_v38 }
 0x100   :  { %v1394_v16 = vmul.f32 %v185_v36, %v185_v36  ;;  %v1395_v21 = vmul.f32 %v186_v20, %v186_v20  ;;  %v1396_v25 = vmul.f32 %v187_v61, %v187_v61  ;;  %v188_v59 = vld [vmem:[#allocation7 + $0x3c0] sm:$0xff]  ;;  %v521_v7 = vld [vmem:[#allocation4 + $0x1a0] sm:$0xff]  ;;  %v193_v36 = vld [vmem:[#allocation7 + $0x3e8] sm:$0xff] }
 0x101   :  { %v1786_v63 = vadd.f32 %v1785_v54, %v1386_v22  ;;  %v2525_v44 = vadd.f32 %v2524_v46, %v2125_v4  ;;  %v522_v48 = vld [vmem:[#allocation4 + $0x1a8] sm:$0xff]  ;;  %v8208_v60 = vld [vmem:[#allocation25_spill] sm:$0xff]  ;;  %v8209_v57 = vld [vmem:[#allocation26_spill] sm:$0xff] }
 0x102   :  { %v523_v5 = vld [vmem:[#allocation4 + $0x1b0] sm:$0xff]  ;;  %v194_v20 = vld [vmem:[#allocation7 + $0x3f0] sm:$0xff]  ;;  %v195_v61 = vld [vmem:[#allocation7 + $0x3f8] sm:$0xff] }
 0x103   :  { %v1787_v51 = vadd.f32 %v1786_v63, %v1387_v56  ;;  %v2526_v29 = vadd.f32 %v2525_v44, %v2126_v10  ;;  %v2132_v56 = vmul.f32 %v913_v50, %v913_v50  ;;  %v2133_v63 = vmul.f32 %v914_v52, %v914_v52  ;;  %v8210_v38 = vld [vmem:[#allocation27_spill] sm:$0xff]  ;;  %v527_v11 = vld [vmem:[#allocation4 + $0x1d0] sm:$0xff]  ;;  %v8213_v9 = vld [vmem:[#allocation30_spill] sm:$0xff] }
 0x104   :  { %v2134_v10 = vmul.f32 %v915_v49, %v915_v49  ;;  %v921_v50 = vsub.f32 %v520_v19, %v8207_v32  ;;  %v922_v52 = vsub.f32 %v521_v7, %v8208_v60  ;;  %v923_v49 = vsub.f32 %v522_v48, %v8209_v57  ;;  %v526_v41 = vld [vmem:[#allocation4 + $0x1c8] sm:$0xff]  ;;  %v528_v19 = vld [vmem:[#allocation4 + $0x1d8] sm:$0xff]  ;;  %v529_v7 = vld [vmem:[#allocation4 + $0x1e0] sm:$0xff] }
 0x105   :  { %v1788_v13 = vadd.f32 %v1787_v51, %v1388_v23  ;;  %v2527_v2 = vadd.f32 %v2526_v29, %v2127_v18  ;;  %v2135_v18 = vmul.f32 %v916_v8, %v916_v8  ;;  %v924_v8 = vsub.f32 %v523_v5, %v8210_v38  ;;  %v8214_v47 = vld [vmem:[#allocation31_spill] sm:$0xff]  ;;  %v8215_v32 = vld [vmem:[#allocation32_spill] sm:$0xff]  ;;  %v8216_v60 = vld [vmem:[#allocation33_spill] sm:$0xff] }
 0x106   :  { %v530_v48 = vld [vmem:[#allocation4 + $0x1e8] sm:$0xff]  ;;  %v531_v5 = vld [vmem:[#allocation4 + $0x1f0] sm:$0xff]  ;;  %v8217_v57 = vld [vmem:[#allocation34_spill] sm:$0xff] }
 0x107   :  { %v1789_v14 = vadd.f32 %v1788_v13, %v1389_v30  ;;  %v2528_v33 = vadd.f32 %v2527_v2, %v2128_v24  ;;  %v1397_v30 = vmul.f32 %v188_v59, %v188_v59  ;;  %v2136_v24 = vmul.f32 %v917_v45, %v917_v45  ;;  %v196_v59 = vld [vmem:[#allocation7 + $0x400] sm:$0xff] }
 0x108   :  { %v925_v45 = vsub.f32 %v524_v31, %v8211_v42  ;;  %v532_v31 = vld [vmem:[#allocation4 + $0x1f8] sm:$0xff]  ;;  %v8218_v38 = vld [vmem:[#allocation35_spill] sm:$0xff]  ;;  %v8219_v42 = vld [vmem:[#allocation36_spill] sm:$0xff] }
 0x109   :  { %v1790_v0 = vadd.f32 %v1789_v14, %v1390_v34  ;;  %v2529_v22 = vadd.f32 %v2528_v33, %v2129_v1  ;;  %v1398_v34 = vmul.f32 %v189_v55, %v189_v55  ;;  %v2137_v1 = vmul.f32 %v918_v26, %v918_v26  ;;  %v197_v55 = vld [vmem:[#allocation7 + $0x408] sm:$0xff] }
 0x10a   :  { %v926_v26 = vsub.f32 %v525_v27, %v8212_v62  ;;  %v533_v27 = vld [vmem:[#allocation4 + $0x200] sm:$0xff]  ;;  %v8220_v62 = vld [vmem:[#allocation37_spill] sm:$0xff] }
 0x10b   :  { %v1791_v17 = vadd.f32 %v1790_v0, %v1391_v39  ;;  %v2530_v54 = vadd.f32 %v2529_v22, %v2130_v6  ;;  %v1399_v39 = vmul.f32 %v190_v15, %v190_v15  ;;  %v2138_v6 = vmul.f32 %v919_v3, %v919_v3  ;;  %v198_v15 = vld [vmem:[#allocation7 + $0x410] sm:$0xff] }
 0x10c   :  { %v927_v3 = vsub.f32 %v526_v41, %v8213_v9  ;;  %v534_v41 = vld [vmem:[#allocation4 + $0x208] sm:$0xff]  ;;  %v8221_v9 = vld [vmem:[#allocation38_spill] sm:$0xff] }
 0x10d   :  { %v1792_v53 = vadd.f32 %v1791_v17, %v1392_v43  ;;  %v2531_v4 = vadd.f32 %v2530_v54, %v2131_v35  ;;  %v1400_v43 = vmul.f32 %v191_v58, %v191_v58  ;;  %v2139_v35 = vmul.f32 %v920_v28, %v920_v28  ;;  %v199_v58 = vld [vmem:[#allocation7 + $0x418] sm:$0xff] }
 0x10e   :  { %v928_v28 = vsub.f32 %v527_v11, %v8214_v47  ;;  %v535_v11 = vld [vmem:[#allocation4 + $0x210] sm:$0xff]  ;;  %v8222_v47 = vld [vmem:[#allocation39_spill] sm:$0xff] }
 0x10f   :  { %v1793_v37 = vadd.f32 %v1792_v53, %v1393_v12  ;;  %v2532_v46 = vadd.f32 %v2531_v4, %v2132_v56  ;;  %v1401_v12 = vmul.f32 %v192_v40, %v192_v40  ;;  %v2140_v56 = vmul.f32 %v921_v50, %v921_v50  ;;  %v200_v40 = vld [vmem:[#allocation7 + $0x420] sm:$0xff] }
 0x110   :  { %v929_v50 = vsub.f32 %v528_v19, %v8215_v32  ;;  %v536_v19 = vld [vmem:[#allocation4 + $0x218] sm:$0xff]  ;;  %v8223_v32 = vld [vmem:[#allocation40_spill] sm:$0xff] }
 0x111   :  { %v1794_v23 = vadd.f32 %v1793_v37, %v1394_v16  ;;  %v2533_v44 = vadd.f32 %v2532_v46, %v2133_v63  ;;  %v1402_v16 = vmul.f32 %v193_v36, %v193_v36  ;;  %v2141_v63 = vmul.f32 %v922_v52, %v922_v52  ;;  %v201_v36 = vld [vmem:[#allocation7 + $0x428] sm:$0xff] }
 0x112   :  { %v930_v52 = vsub.f32 %v529_v7, %v8216_v60  ;;  %v537_v7 = vld [vmem:[#allocation4 + $0x220] sm:$0xff]  ;;  %v8224_v60 = vld [vmem:[#allocation41_spill] sm:$0xff] }
 0x113   :  { %v1795_v51 = vadd.f32 %v1794_v23, %v1395_v21  ;;  %v2534_v29 = vadd.f32 %v2533_v44, %v2134_v10  ;;  %v1403_v21 = vmul.f32 %v194_v20, %v194_v20  ;;  %v2142_v10 = vmul.f32 %v923_v49, %v923_v49  ;;  %v202_v20 = vld [vmem:[#allocation7 + $0x430] sm:$0xff] }
 0x114   :  { %v931_v49 = vsub.f32 %v530_v48, %v8217_v57  ;;  %v538_v48 = vld [vmem:[#allocation4 + $0x228] sm:$0xff]  ;;  %v8225_v57 = vld [vmem:[#allocation42_spill] sm:$0xff] }
 0x115   :  { %v1796_v13 = vadd.f32 %v1795_v51, %v1396_v25  ;;  %v2535_v2 = vadd.f32 %v2534_v29, %v2135_v18  ;;  %v1404_v25 = vmul.f32 %v195_v61, %v195_v61  ;;  %v2143_v18 = vmul.f32 %v924_v8, %v924_v8  ;;  %v203_v61 = vld [vmem:[#allocation7 + $0x438] sm:$0xff] }
 0x116   :  { %v932_v8 = vsub.f32 %v531_v5, %v8218_v38  ;;  %v539_v5 = vld [vmem:[#allocation4 + $0x230] sm:$0xff]  ;;  %v8226_v38 = vld [vmem:[#allocation43_spill] sm:$0xff] }
 0x117   :  { %v1797_v14 = vadd.f32 %v1796_v13, %v1397_v30  ;;  %v2536_v33 = vadd.f32 %v2535_v2, %v2136_v24  ;;  %v1405_v30 = vmul.f32 %v196_v59, %v196_v59  ;;  %v2144_v24 = vmul.f32 %v925_v45, %v925_v45  ;;  %v204_v59 = vld [vmem:[#allocation7 + $0x440] sm:$0xff] }
 0x118   :  { %v933_v45 = vsub.f32 %v532_v31, %v8219_v42  ;;  %v540_v31 = vld [vmem:[#allocation4 + $0x238] sm:$0xff]  ;;  %v8227_v42 = vld [vmem:[#allocation44_spill] sm:$0xff] }
 0x119   :  { %v1798_v0 = vadd.f32 %v1797_v14, %v1398_v34  ;;  %v2537_v22 = vadd.f32 %v2536_v33, %v2137_v1  ;;  %v1406_v34 = vmul.f32 %v197_v55, %v197_v55  ;;  %v2145_v1 = vmul.f32 %v926_v26, %v926_v26  ;;  %v205_v55 = vld [vmem:[#allocation7 + $0x448] sm:$0xff] }
 0x11a   :  { %v934_v26 = vsub.f32 %v533_v27, %v8220_v62  ;;  %v541_v27 = vld [vmem:[#allocation4 + $0x240] sm:$0xff]  ;;  %v8228_v62 = vld [vmem:[#allocation45_spill] sm:$0xff] }
 0x11b   :  { %v1799_v17 = vadd.f32 %v1798_v0, %v1399_v39  ;;  %v2538_v54 = vadd.f32 %v2537_v22, %v2138_v6  ;;  %v1407_v39 = vmul.f32 %v198_v15, %v198_v15  ;;  %v2146_v6 = vmul.f32 %v927_v3, %v927_v3  ;;  %v206_v15 = vld [vmem:[#allocation7 + $0x450] sm:$0xff] }
 0x11c   :  { %v935_v3 = vsub.f32 %v534_v41, %v8221_v9  ;;  %v542_v41 = vld [vmem:[#allocation4 + $0x248] sm:$0xff]  ;;  %v8229_v9 = vld [vmem:[#allocation46_spill] sm:$0xff] }
 0x11d   :  { %v1800_v53 = vadd.f32 %v1799_v17, %v1400_v43  ;;  %v2539_v4 = vadd.f32 %v2538_v54, %v2139_v35  ;;  %v1408_v43 = vmul.f32 %v199_v58, %v199_v58  ;;  %v2147_v35 = vmul.f32 %v928_v28, %v928_v28  ;;  %v207_v58 = vld [vmem:[#allocation7 + $0x458] sm:$0xff] }
 0x11e   :  { %v936_v28 = vsub.f32 %v535_v11, %v8222_v47  ;;  %v543_v11 = vld [vmem:[#allocation4 + $0x250] sm:$0xff]  ;;  %v8230_v47 = vld [vmem:[#allocation47_spill] sm:$0xff] }
 0x11f   :  { %v1801_v37 = vadd.f32 %v1800_v53, %v1401_v12  ;;  %v2540_v46 = vadd.f32 %v2539_v4, %v2140_v56  ;;  %v1409_v12 = vmul.f32 %v200_v40, %v200_v40  ;;  %v2148_v56 = vmul.f32 %v929_v50, %v929_v50  ;;  %v208_v40 = vld [vmem:[#allocation7 + $0x460] sm:$0xff] }
 0x120   :  { %v937_v50 = vsub.f32 %v536_v19, %v8223_v32  ;;  %v544_v19 = vld [vmem:[#allocation4 + $0x258] sm:$0xff]  ;;  %v8231_v32 = vld [vmem:[#allocation48_spill] sm:$0xff] }
 0x121   :  { %v1802_v23 = vadd.f32 %v1801_v37, %v1402_v16  ;;  %v2541_v44 = vadd.f32 %v2540_v46, %v2141_v63  ;;  %v1410_v16 = vmul.f32 %v201_v36, %v201_v36  ;;  %v2149_v63 = vmul.f32 %v930_v52, %v930_v52  ;;  %v209_v36 = vld [vmem:[#allocation7 + $0x468] sm:$0xff] }
 0x122   :  { %v938_v52 = vsub.f32 %v537_v7, %v8224_v60  ;;  %v545_v7 = vld [vmem:[#allocation4 + $0x260] sm:$0xff]  ;;  %v6968_v60 = vld [vmem:[#allocation7 + $0x260] sm:$0xff] }
 0x123   :  { %v1803_v51 = vadd.f32 %v1802_v23, %v1403_v21  ;;  %v2542_v29 = vadd.f32 %v2541_v44, %v2142_v10  ;;  %v1411_v21 = vmul.f32 %v202_v20, %v202_v20  ;;  %v2150_v10 = vmul.f32 %v931_v49, %v931_v49  ;;  %v210_v20 = vld [vmem:[#allocation7 + $0x470] sm:$0xff] }
 0x124   :  { %v939_v49 = vsub.f32 %v538_v48, %v8225_v57  ;;  %v546_v48 = vld [vmem:[#allocation4 + $0x268] sm:$0xff]  ;;  %v8232_v57 = vld [vmem:[#allocation49_spill] sm:$0xff] }
 0x125   :  { %v1804_v13 = vadd.f32 %v1803_v51, %v1404_v25  ;;  %v2543_v2 = vadd.f32 %v2542_v29, %v2143_v18  ;;  %v1412_v25 = vmul.f32 %v203_v61, %v203_v61  ;;  %v2151_v18 = vmul.f32 %v932_v8, %v932_v8  ;;  %v211_v61 = vld [vmem:[#allocation7 + $0x478] sm:$0xff] }
 0x126   :  { %v940_v8 = vsub.f32 %v539_v5, %v8226_v38  ;;  %v547_v5 = vld [vmem:[#allocation4 + $0x270] sm:$0xff]  ;;  %v6969_v38 = vld [vmem:[#allocation7 + $0x270] sm:$0xff] }
 0x127   :  { %v1805_v14 = vadd.f32 %v1804_v13, %v1405_v30  ;;  %v2544_v33 = vadd.f32 %v2543_v2, %v2144_v24  ;;  %v1413_v30 = vmul.f32 %v204_v59, %v204_v59  ;;  %v2152_v24 = vmul.f32 %v933_v45, %v933_v45  ;;  %v212_v59 = vld [vmem:[#allocation7 + $0x480] sm:$0xff] }
 0x128   :  { %v941_v45 = vsub.f32 %v540_v31, %v8227_v42  ;;  %v548_v31 = vld [vmem:[#allocation4 + $0x278] sm:$0xff]  ;;  %v6970_v42 = vld [vmem:[#allocation7 + $0x278] sm:$0xff] }
 0x129   :  { %v1806_v0 = vadd.f32 %v1805_v14, %v1406_v34  ;;  %v2545_v22 = vadd.f32 %v2544_v33, %v2145_v1  ;;  %v1414_v34 = vmul.f32 %v205_v55, %v205_v55  ;;  %v2153_v1 = vmul.f32 %v934_v26, %v934_v26  ;;  %v213_v55 = vld [vmem:[#allocation7 + $0x488] sm:$0xff] }
 0x12a   :  { %v942_v26 = vsub.f32 %v541_v27, %v8228_v62  ;;  %v549_v27 = vld [vmem:[#allocation4 + $0x280] sm:$0xff]  ;;  %v6971_v62 = vld [vmem:[#allocation7 + $0x280] sm:$0xff] }
 0x12b   :  { %v1807_v17 = vadd.f32 %v1806_v0, %v1407_v39  ;;  %v2546_v54 = vadd.f32 %v2545_v22, %v2146_v6  ;;  %v1415_v39 = vmul.f32 %v206_v15, %v206_v15  ;;  %v2154_v6 = vmul.f32 %v935_v3, %v935_v3  ;;  %v214_v15 = vld [vmem:[#allocation7 + $0x490] sm:$0xff] }
 0x12c   :  { %v943_v3 = vsub.f32 %v542_v41, %v8229_v9  ;;  %v550_v41 = vld [vmem:[#allocation4 + $0x288] sm:$0xff]  ;;  %v6972_v9 = vld [vmem:[#allocation7 + $0x288] sm:$0xff] }
 0x12d   :  { %v1808_v53 = vadd.f32 %v1807_v17, %v1408_v43  ;;  %v2547_v4 = vadd.f32 %v2546_v54, %v2147_v35  ;;  %v1416_v43 = vmul.f32 %v207_v58, %v207_v58  ;;  %v2155_v35 = vmul.f32 %v936_v28, %v936_v28  ;;  %v215_v58 = vld [vmem:[#allocation7 + $0x498] sm:$0xff] }
 0x12e   :  { %v944_v28 = vsub.f32 %v543_v11, %v8230_v47  ;;  %v551_v11 = vld [vmem:[#allocation4 + $0x290] sm:$0xff]  ;;  %v6973_v47 = vld [vmem:[#allocation7 + $0x290] sm:$0xff] }
 0x12f   :  { %v1809_v37 = vadd.f32 %v1808_v53, %v1409_v12  ;;  %v2548_v46 = vadd.f32 %v2547_v4, %v2148_v56  ;;  %v1417_v12 = vmul.f32 %v208_v40, %v208_v40  ;;  %v2156_v56 = vmul.f32 %v937_v50, %v937_v50  ;;  %v216_v40 = vld [vmem:[#allocation7 + $0x4a0] sm:$0xff] }
 0x130   :  { %v945_v50 = vsub.f32 %v544_v19, %v8231_v32  ;;  %v552_v19 = vld [vmem:[#allocation4 + $0x298] sm:$0xff]  ;;  %v6974_v32 = vld [vmem:[#allocation7 + $0x298] sm:$0xff] }
 0x131   :  { %v1810_v23 = vadd.f32 %v1809_v37, %v1410_v16  ;;  %v2549_v44 = vadd.f32 %v2548_v46, %v2149_v63  ;;  %v1418_v16 = vmul.f32 %v209_v36, %v209_v36  ;;  %v2157_v63 = vmul.f32 %v938_v52, %v938_v52  ;;  %v217_v36 = vld [vmem:[#allocation7 + $0x4a8] sm:$0xff] }
 0x132   :  { %v946_v52 = vsub.f32 %v545_v7, %v6968_v60  ;;  %v553_v7 = vld [vmem:[#allocation4 + $0x2a0] sm:$0xff]  ;;  %v6975_v60 = vld [vmem:[#allocation7 + $0x2a0] sm:$0xff] }
 0x133   :  { %v1811_v51 = vadd.f32 %v1810_v23, %v1411_v21  ;;  %v2550_v29 = vadd.f32 %v2549_v44, %v2150_v10  ;;  %v1419_v21 = vmul.f32 %v210_v20, %v210_v20  ;;  %v2158_v10 = vmul.f32 %v939_v49, %v939_v49  ;;  %v218_v20 = vld [vmem:[#allocation7 + $0x4b0] sm:$0xff] }
 0x134   :  { %v947_v49 = vsub.f32 %v546_v48, %v8232_v57  ;;  %v554_v48 = vld [vmem:[#allocation4 + $0x2a8] sm:$0xff]  ;;  %v6976_v57 = vld [vmem:[#allocation7 + $0x2a8] sm:$0xff] }
 0x135   :  { %v1812_v13 = vadd.f32 %v1811_v51, %v1412_v25  ;;  %v2551_v2 = vadd.f32 %v2550_v29, %v2151_v18  ;;  %v1420_v25 = vmul.f32 %v211_v61, %v211_v61  ;;  %v2159_v18 = vmul.f32 %v940_v8, %v940_v8  ;;  %v219_v61 = vld [vmem:[#allocation7 + $0x4b8] sm:$0xff] }
 0x136   :  { %v948_v8 = vsub.f32 %v547_v5, %v6969_v38  ;;  %v555_v5 = vld [vmem:[#allocation4 + $0x2b0] sm:$0xff]  ;;  %v6977_v38 = vld [vmem:[#allocation7 + $0x2b0] sm:$0xff] }
 0x137   :  { %v1813_v14 = vadd.f32 %v1812_v13, %v1413_v30  ;;  %v2552_v33 = vadd.f32 %v2551_v2, %v2152_v24  ;;  %v1421_v30 = vmul.f32 %v212_v59, %v212_v59  ;;  %v2160_v24 = vmul.f32 %v941_v45, %v941_v45  ;;  %v220_v59 = vld [vmem:[#allocation7 + $0x4c0] sm:$0xff] }
 0x138   :  { %v949_v45 = vsub.f32 %v548_v31, %v6970_v42  ;;  %v556_v31 = vld [vmem:[#allocation4 + $0x2b8] sm:$0xff]  ;;  %v6978_v42 = vld [vmem:[#allocation7 + $0x2b8] sm:$0xff] }
 0x139   :  { %v1814_v0 = vadd.f32 %v1813_v14, %v1414_v34  ;;  %v2553_v22 = vadd.f32 %v2552_v33, %v2153_v1  ;;  %v1422_v34 = vmul.f32 %v213_v55, %v213_v55  ;;  %v2161_v1 = vmul.f32 %v942_v26, %v942_v26  ;;  %v221_v55 = vld [vmem:[#allocation7 + $0x4c8] sm:$0xff] }
 0x13a   :  { %v950_v26 = vsub.f32 %v549_v27, %v6971_v62  ;;  %v557_v27 = vld [vmem:[#allocation4 + $0x2c0] sm:$0xff]  ;;  %v6979_v62 = vld [vmem:[#allocation7 + $0x2c0] sm:$0xff] }
 0x13b   :  { %v1815_v17 = vadd.f32 %v1814_v0, %v1415_v39  ;;  %v2554_v54 = vadd.f32 %v2553_v22, %v2154_v6  ;;  %v1423_v39 = vmul.f32 %v214_v15, %v214_v15  ;;  %v2162_v6 = vmul.f32 %v943_v3, %v943_v3  ;;  %v222_v15 = vld [vmem:[#allocation7 + $0x4d0] sm:$0xff] }
 0x13c   :  { %v951_v3 = vsub.f32 %v550_v41, %v6972_v9  ;;  %v558_v41 = vld [vmem:[#allocation4 + $0x2c8] sm:$0xff]  ;;  %v6980_v9 = vld [vmem:[#allocation7 + $0x2c8] sm:$0xff] }
 0x13d   :  { %v1816_v53 = vadd.f32 %v1815_v17, %v1416_v43  ;;  %v2555_v4 = vadd.f32 %v2554_v54, %v2155_v35  ;;  %v1424_v43 = vmul.f32 %v215_v58, %v215_v58  ;;  %v2163_v35 = vmul.f32 %v944_v28, %v944_v28  ;;  %v223_v58 = vld [vmem:[#allocation7 + $0x4d8] sm:$0xff] }
 0x13e   :  { %v952_v28 = vsub.f32 %v551_v11, %v6973_v47  ;;  %v559_v11 = vld [vmem:[#allocation4 + $0x2d0] sm:$0xff]  ;;  %v6981_v47 = vld [vmem:[#allocation7 + $0x2d0] sm:$0xff] }
 0x13f   :  { %v1817_v37 = vadd.f32 %v1816_v53, %v1417_v12  ;;  %v2556_v46 = vadd.f32 %v2555_v4, %v2156_v56  ;;  %v1425_v12 = vmul.f32 %v216_v40, %v216_v40  ;;  %v2164_v56 = vmul.f32 %v945_v50, %v945_v50  ;;  %v224_v40 = vld [vmem:[#allocation7 + $0x4e0] sm:$0xff] }
 0x140   :  { %v953_v50 = vsub.f32 %v552_v19, %v6974_v32  ;;  %v560_v19 = vld [vmem:[#allocation4 + $0x2d8] sm:$0xff]  ;;  %v6982_v32 = vld [vmem:[#allocation7 + $0x2d8] sm:$0xff] }
 0x141   :  { %v1818_v23 = vadd.f32 %v1817_v37, %v1418_v16  ;;  %v2557_v44 = vadd.f32 %v2556_v46, %v2157_v63  ;;  %v1426_v16 = vmul.f32 %v217_v36, %v217_v36  ;;  %v2165_v63 = vmul.f32 %v946_v52, %v946_v52  ;;  %v225_v36 = vld [vmem:[#allocation7 + $0x4e8] sm:$0xff] }
 0x142   :  { %v954_v52 = vsub.f32 %v553_v7, %v6975_v60  ;;  %v561_v7 = vld [vmem:[#allocation4 + $0x2e0] sm:$0xff]  ;;  %v6983_v60 = vld [vmem:[#allocation7 + $0x2e0] sm:$0xff] }
 0x143   :  { %v1819_v51 = vadd.f32 %v1818_v23, %v1419_v21  ;;  %v2558_v29 = vadd.f32 %v2557_v44, %v2158_v10  ;;  %v1427_v21 = vmul.f32 %v218_v20, %v218_v20  ;;  %v2166_v10 = vmul.f32 %v947_v49, %v947_v49  ;;  %v226_v20 = vld [vmem:[#allocation7 + $0x4f0] sm:$0xff] }
 0x144   :  { %v955_v49 = vsub.f32 %v554_v48, %v6976_v57  ;;  %v562_v48 = vld [vmem:[#allocation4 + $0x2e8] sm:$0xff]  ;;  %v6984_v57 = vld [vmem:[#allocation7 + $0x2e8] sm:$0xff] }
 0x145   :  { %v1820_v13 = vadd.f32 %v1819_v51, %v1420_v25  ;;  %v2559_v2 = vadd.f32 %v2558_v29, %v2159_v18  ;;  %v1428_v25 = vmul.f32 %v219_v61, %v219_v61  ;;  %v2167_v18 = vmul.f32 %v948_v8, %v948_v8  ;;  %v227_v61 = vld [vmem:[#allocation7 + $0x4f8] sm:$0xff] }
 0x146   :  { %v956_v8 = vsub.f32 %v555_v5, %v6977_v38  ;;  %v563_v5 = vld [vmem:[#allocation4 + $0x2f0] sm:$0xff]  ;;  %v6985_v38 = vld [vmem:[#allocation7 + $0x2f0] sm:$0xff] }
 0x147   :  { %v1821_v14 = vadd.f32 %v1820_v13, %v1421_v30  ;;  %v2560_v33 = vadd.f32 %v2559_v2, %v2160_v24  ;;  %v1429_v30 = vmul.f32 %v220_v59, %v220_v59  ;;  %v2168_v24 = vmul.f32 %v949_v45, %v949_v45  ;;  %v228_v59 = vld [vmem:[#allocation7 + $0x500] sm:$0xff] }
 0x148   :  { %v957_v45 = vsub.f32 %v556_v31, %v6978_v42  ;;  %v564_v31 = vld [vmem:[#allocation4 + $0x2f8] sm:$0xff]  ;;  %v6986_v42 = vld [vmem:[#allocation7 + $0x2f8] sm:$0xff] }
 0x149   :  { %v1822_v0 = vadd.f32 %v1821_v14, %v1422_v34  ;;  %v2561_v22 = vadd.f32 %v2560_v33, %v2161_v1  ;;  %v1430_v34 = vmul.f32 %v221_v55, %v221_v55  ;;  %v2169_v1 = vmul.f32 %v950_v26, %v950_v26  ;;  %v229_v55 = vld [vmem:[#allocation7 + $0x508] sm:$0xff] }
 0x14a   :  { %v958_v26 = vsub.f32 %v557_v27, %v6979_v62  ;;  %v565_v27 = vld [vmem:[#allocation4 + $0x300] sm:$0xff]  ;;  %v6987_v62 = vld [vmem:[#allocation7 + $0x300] sm:$0xff] }
 0x14b   :  { %v1823_v17 = vadd.f32 %v1822_v0, %v1423_v39  ;;  %v2562_v54 = vadd.f32 %v2561_v22, %v2162_v6  ;;  %v1431_v39 = vmul.f32 %v222_v15, %v222_v15  ;;  %v2170_v6 = vmul.f32 %v951_v3, %v951_v3  ;;  %v230_v15 = vld [vmem:[#allocation7 + $0x510] sm:$0xff] }
 0x14c   :  { %v959_v3 = vsub.f32 %v558_v41, %v6980_v9  ;;  %v566_v41 = vld [vmem:[#allocation4 + $0x308] sm:$0xff]  ;;  %v6988_v9 = vld [vmem:[#allocation7 + $0x308] sm:$0xff] }
 0x14d   :  { %v1824_v53 = vadd.f32 %v1823_v17, %v1424_v43  ;;  %v2563_v4 = vadd.f32 %v2562_v54, %v2163_v35  ;;  %v1432_v43 = vmul.f32 %v223_v58, %v223_v58  ;;  %v2171_v35 = vmul.f32 %v952_v28, %v952_v28  ;;  %v231_v58 = vld [vmem:[#allocation7 + $0x518] sm:$0xff] }
 0x14e   :  { %v960_v28 = vsub.f32 %v559_v11, %v6981_v47  ;;  %v567_v11 = vld [vmem:[#allocation4 + $0x310] sm:$0xff]  ;;  %v6989_v47 = vld [vmem:[#allocation7 + $0x310] sm:$0xff] }
 0x14f   :  { %v1825_v37 = vadd.f32 %v1824_v53, %v1425_v12  ;;  %v2564_v46 = vadd.f32 %v2563_v4, %v2164_v56  ;;  %v1433_v12 = vmul.f32 %v224_v40, %v224_v40  ;;  %v2172_v56 = vmul.f32 %v953_v50, %v953_v50  ;;  %v232_v40 = vld [vmem:[#allocation7 + $0x520] sm:$0xff] }
 0x150   :  { %v961_v50 = vsub.f32 %v560_v19, %v6982_v32  ;;  %v568_v19 = vld [vmem:[#allocation4 + $0x318] sm:$0xff]  ;;  %v6990_v32 = vld [vmem:[#allocation7 + $0x318] sm:$0xff] }
 0x151   :  { %v1826_v23 = vadd.f32 %v1825_v37, %v1426_v16  ;;  %v2565_v44 = vadd.f32 %v2564_v46, %v2165_v63  ;;  %v1434_v16 = vmul.f32 %v225_v36, %v225_v36  ;;  %v2173_v63 = vmul.f32 %v954_v52, %v954_v52  ;;  %v233_v36 = vld [vmem:[#allocation7 + $0x528] sm:$0xff] }
 0x152   :  { %v962_v52 = vsub.f32 %v561_v7, %v6983_v60  ;;  %v569_v7 = vld [vmem:[#allocation4 + $0x320] sm:$0xff]  ;;  %v6991_v60 = vld [vmem:[#allocation7 + $0x320] sm:$0xff] }
 0x153   :  { %v1827_v51 = vadd.f32 %v1826_v23, %v1427_v21  ;;  %v2566_v29 = vadd.f32 %v2565_v44, %v2166_v10  ;;  %v1435_v21 = vmul.f32 %v226_v20, %v226_v20  ;;  %v2174_v10 = vmul.f32 %v955_v49, %v955_v49  ;;  %v234_v20 = vld [vmem:[#allocation7 + $0x530] sm:$0xff] }
 0x154   :  { %v963_v49 = vsub.f32 %v562_v48, %v6984_v57  ;;  %v570_v48 = vld [vmem:[#allocation4 + $0x328] sm:$0xff]  ;;  %v6992_v57 = vld [vmem:[#allocation7 + $0x328] sm:$0xff] }
 0x155   :  { %v1828_v13 = vadd.f32 %v1827_v51, %v1428_v25  ;;  %v2567_v2 = vadd.f32 %v2566_v29, %v2167_v18  ;;  %v1436_v25 = vmul.f32 %v227_v61, %v227_v61  ;;  %v2175_v18 = vmul.f32 %v956_v8, %v956_v8  ;;  %v235_v61 = vld [vmem:[#allocation7 + $0x538] sm:$0xff] }
 0x156   :  { %v964_v8 = vsub.f32 %v563_v5, %v6985_v38  ;;  %v571_v5 = vld [vmem:[#allocation4 + $0x330] sm:$0xff]  ;;  %v6993_v38 = vld [vmem:[#allocation7 + $0x330] sm:$0xff] }
 0x157   :  { %v1829_v14 = vadd.f32 %v1828_v13, %v1429_v30  ;;  %v2568_v33 = vadd.f32 %v2567_v2, %v2168_v24  ;;  %v1437_v30 = vmul.f32 %v228_v59, %v228_v59  ;;  %v2176_v24 = vmul.f32 %v957_v45, %v957_v45  ;;  %v236_v59 = vld [vmem:[#allocation7 + $0x540] sm:$0xff] }
 0x158   :  { %v965_v45 = vsub.f32 %v564_v31, %v6986_v42  ;;  %v572_v31 = vld [vmem:[#allocation4 + $0x338] sm:$0xff]  ;;  %v6994_v42 = vld [vmem:[#allocation7 + $0x338] sm:$0xff] }
 0x159   :  { %v1830_v0 = vadd.f32 %v1829_v14, %v1430_v34  ;;  %v2569_v22 = vadd.f32 %v2568_v33, %v2169_v1  ;;  %v1438_v34 = vmul.f32 %v229_v55, %v229_v55  ;;  %v2177_v1 = vmul.f32 %v958_v26, %v958_v26  ;;  %v237_v55 = vld [vmem:[#allocation7 + $0x548] sm:$0xff] }
 0x15a   :  { %v966_v26 = vsub.f32 %v565_v27, %v6987_v62  ;;  %v573_v27 = vld [vmem:[#allocation4 + $0x340] sm:$0xff]  ;;  %v6995_v62 = vld [vmem:[#allocation7 + $0x340] sm:$0xff] }
 0x15b   :  { %v1831_v17 = vadd.f32 %v1830_v0, %v1431_v39  ;;  %v2570_v54 = vadd.f32 %v2569_v22, %v2170_v6  ;;  %v1439_v39 = vmul.f32 %v230_v15, %v230_v15  ;;  %v2178_v6 = vmul.f32 %v959_v3, %v959_v3  ;;  %v238_v15 = vld [vmem:[#allocation7 + $0x550] sm:$0xff] }
 0x15c   :  { %v967_v3 = vsub.f32 %v566_v41, %v6988_v9  ;;  %v574_v41 = vld [vmem:[#allocation4 + $0x348] sm:$0xff]  ;;  %v6996_v9 = vld [vmem:[#allocation7 + $0x348] sm:$0xff] }
 0x15d   :  { %v1832_v53 = vadd.f32 %v1831_v17, %v1432_v43  ;;  %v2571_v4 = vadd.f32 %v2570_v54, %v2171_v35  ;;  %v1440_v43 = vmul.f32 %v231_v58, %v231_v58  ;;  %v2179_v35 = vmul.f32 %v960_v28, %v960_v28  ;;  %v239_v58 = vld [vmem:[#allocation7 + $0x558] sm:$0xff] }
 0x15e   :  { %v968_v28 = vsub.f32 %v567_v11, %v6989_v47  ;;  %v575_v11 = vld [vmem:[#allocation4 + $0x350] sm:$0xff]  ;;  %v6997_v47 = vld [vmem:[#allocation7 + $0x350] sm:$0xff] }
 0x15f   :  { %v1833_v37 = vadd.f32 %v1832_v53, %v1433_v12  ;;  %v2572_v46 = vadd.f32 %v2571_v4, %v2172_v56  ;;  %v1441_v12 = vmul.f32 %v232_v40, %v232_v40  ;;  %v2180_v56 = vmul.f32 %v961_v50, %v961_v50  ;;  %v240_v40 = vld [vmem:[#allocation7 + $0x560] sm:$0xff] }
 0x160   :  { %v969_v50 = vsub.f32 %v568_v19, %v6990_v32  ;;  %v576_v19 = vld [vmem:[#allocation4 + $0x358] sm:$0xff]  ;;  %v6998_v32 = vld [vmem:[#allocation7 + $0x358] sm:$0xff] }
 0x161   :  { %v1834_v23 = vadd.f32 %v1833_v37, %v1434_v16  ;;  %v2573_v44 = vadd.f32 %v2572_v46, %v2173_v63  ;;  %v1442_v16 = vmul.f32 %v233_v36, %v233_v36  ;;  %v2181_v63 = vmul.f32 %v962_v52, %v962_v52  ;;  %v241_v36 = vld [vmem:[#allocation7 + $0x568] sm:$0xff] }
 0x162   :  { %v970_v52 = vsub.f32 %v569_v7, %v6991_v60  ;;  %v577_v7 = vld [vmem:[#allocation4 + $0x360] sm:$0xff]  ;;  %v6999_v60 = vld [vmem:[#allocation7 + $0x360] sm:$0xff] }
 0x163   :  { %v1835_v51 = vadd.f32 %v1834_v23, %v1435_v21  ;;  %v2574_v29 = vadd.f32 %v2573_v44, %v2174_v10  ;;  %v1443_v21 = vmul.f32 %v234_v20, %v234_v20  ;;  %v2182_v10 = vmul.f32 %v963_v49, %v963_v49  ;;  %v242_v20 = vld [vmem:[#allocation7 + $0x570] sm:$0xff] }
 0x164   :  { %v971_v49 = vsub.f32 %v570_v48, %v6992_v57  ;;  %v578_v48 = vld [vmem:[#allocation4 + $0x368] sm:$0xff]  ;;  %v7000_v57 = vld [vmem:[#allocation7 + $0x368] sm:$0xff] }
 0x165   :  { %v1836_v13 = vadd.f32 %v1835_v51, %v1436_v25  ;;  %v2575_v2 = vadd.f32 %v2574_v29, %v2175_v18  ;;  %v1444_v25 = vmul.f32 %v235_v61, %v235_v61  ;;  %v2183_v18 = vmul.f32 %v964_v8, %v964_v8  ;;  %v243_v61 = vld [vmem:[#allocation7 + $0x578] sm:$0xff] }
 0x166   :  { %v972_v8 = vsub.f32 %v571_v5, %v6993_v38  ;;  %v579_v5 = vld [vmem:[#allocation4 + $0x370] sm:$0xff]  ;;  %v7001_v38 = vld [vmem:[#allocation7 + $0x370] sm:$0xff] }
 0x167   :  { %v1837_v14 = vadd.f32 %v1836_v13, %v1437_v30  ;;  %v2576_v33 = vadd.f32 %v2575_v2, %v2176_v24  ;;  %v1445_v30 = vmul.f32 %v236_v59, %v236_v59  ;;  %v2184_v24 = vmul.f32 %v965_v45, %v965_v45  ;;  %v244_v59 = vld [vmem:[#allocation7 + $0x580] sm:$0xff] }
 0x168   :  { %v973_v45 = vsub.f32 %v572_v31, %v6994_v42  ;;  %v580_v31 = vld [vmem:[#allocation4 + $0x378] sm:$0xff]  ;;  %v7002_v42 = vld [vmem:[#allocation7 + $0x378] sm:$0xff] }
 0x169   :  { %v1838_v0 = vadd.f32 %v1837_v14, %v1438_v34  ;;  %v2577_v22 = vadd.f32 %v2576_v33, %v2177_v1  ;;  %v1446_v34 = vmul.f32 %v237_v55, %v237_v55  ;;  %v2185_v1 = vmul.f32 %v966_v26, %v966_v26  ;;  %v245_v55 = vld [vmem:[#allocation7 + $0x588] sm:$0xff] }
 0x16a   :  { %v974_v26 = vsub.f32 %v573_v27, %v6995_v62  ;;  %v581_v27 = vld [vmem:[#allocation4 + $0x380] sm:$0xff]  ;;  %v7003_v62 = vld [vmem:[#allocation7 + $0x380] sm:$0xff] }
 0x16b   :  { %v1839_v17 = vadd.f32 %v1838_v0, %v1439_v39  ;;  %v2578_v54 = vadd.f32 %v2577_v22, %v2178_v6  ;;  %v1447_v39 = vmul.f32 %v238_v15, %v238_v15  ;;  %v2186_v6 = vmul.f32 %v967_v3, %v967_v3  ;;  %v246_v15 = vld [vmem:[#allocation7 + $0x590] sm:$0xff] }
 0x16c   :  { %v975_v3 = vsub.f32 %v574_v41, %v6996_v9  ;;  %v582_v41 = vld [vmem:[#allocation4 + $0x388] sm:$0xff]  ;;  %v7004_v9 = vld [vmem:[#allocation7 + $0x388] sm:$0xff] }
 0x16d   :  { %v1840_v53 = vadd.f32 %v1839_v17, %v1440_v43  ;;  %v2579_v4 = vadd.f32 %v2578_v54, %v2179_v35  ;;  %v1448_v43 = vmul.f32 %v239_v58, %v239_v58  ;;  %v2187_v35 = vmul.f32 %v968_v28, %v968_v28  ;;  %v247_v58 = vld [vmem:[#allocation7 + $0x598] sm:$0xff] }
 0x16e   :  { %v976_v28 = vsub.f32 %v575_v11, %v6997_v47  ;;  %v583_v11 = vld [vmem:[#allocation4 + $0x390] sm:$0xff]  ;;  %v7005_v47 = vld [vmem:[#allocation7 + $0x390] sm:$0xff] }
 0x16f   :  { %v1841_v37 = vadd.f32 %v1840_v53, %v1441_v12  ;;  %v2580_v46 = vadd.f32 %v2579_v4, %v2180_v56  ;;  %v1449_v12 = vmul.f32 %v240_v40, %v240_v40  ;;  %v2188_v56 = vmul.f32 %v969_v50, %v969_v50  ;;  %v248_v40 = vld [vmem:[#allocation7 + $0x5a0] sm:$0xff] }
 0x170   :  { %v977_v50 = vsub.f32 %v576_v19, %v6998_v32  ;;  %v584_v19 = vld [vmem:[#allocation4 + $0x398] sm:$0xff]  ;;  %v7006_v32 = vld [vmem:[#allocation7 + $0x398] sm:$0xff] }
 0x171   :  { %v1842_v23 = vadd.f32 %v1841_v37, %v1442_v16  ;;  %v2581_v44 = vadd.f32 %v2580_v46, %v2181_v63  ;;  %v1450_v16 = vmul.f32 %v241_v36, %v241_v36  ;;  %v2189_v63 = vmul.f32 %v970_v52, %v970_v52  ;;  %v249_v36 = vld [vmem:[#allocation7 + $0x5a8] sm:$0xff] }
 0x172   :  { %v978_v52 = vsub.f32 %v577_v7, %v6999_v60  ;;  %v585_v7 = vld [vmem:[#allocation4 + $0x3a0] sm:$0xff]  ;;  %v7007_v60 = vld [vmem:[#allocation7 + $0x3a0] sm:$0xff] }
 0x173   :  { %v1843_v51 = vadd.f32 %v1842_v23, %v1443_v21  ;;  %v2582_v29 = vadd.f32 %v2581_v44, %v2182_v10  ;;  %v1451_v21 = vmul.f32 %v242_v20, %v242_v20  ;;  %v2190_v10 = vmul.f32 %v971_v49, %v971_v49  ;;  %v250_v20 = vld [vmem:[#allocation7 + $0x5b0] sm:$0xff] }
 0x174   :  { %v979_v49 = vsub.f32 %v578_v48, %v7000_v57  ;;  %v586_v48 = vld [vmem:[#allocation4 + $0x3a8] sm:$0xff]  ;;  %v7008_v57 = vld [vmem:[#allocation7 + $0x3a8] sm:$0xff] }
 0x175   :  { %v1844_v13 = vadd.f32 %v1843_v51, %v1444_v25  ;;  %v2583_v2 = vadd.f32 %v2582_v29, %v2183_v18  ;;  %v1452_v25 = vmul.f32 %v243_v61, %v243_v61  ;;  %v2191_v18 = vmul.f32 %v972_v8, %v972_v8  ;;  %v251_v61 = vld [vmem:[#allocation7 + $0x5b8] sm:$0xff] }
 0x176   :  { %v980_v8 = vsub.f32 %v579_v5, %v7001_v38  ;;  %v587_v5 = vld [vmem:[#allocation4 + $0x3b0] sm:$0xff]  ;;  %v7009_v38 = vld [vmem:[#allocation7 + $0x3b0] sm:$0xff] }
 0x177   :  { %v1845_v14 = vadd.f32 %v1844_v13, %v1445_v30  ;;  %v2584_v33 = vadd.f32 %v2583_v2, %v2184_v24  ;;  %v1453_v30 = vmul.f32 %v244_v59, %v244_v59  ;;  %v2192_v24 = vmul.f32 %v973_v45, %v973_v45  ;;  %v252_v59 = vld [vmem:[#allocation7 + $0x5c0] sm:$0xff] }
 0x178   :  { %v981_v45 = vsub.f32 %v580_v31, %v7002_v42  ;;  %v588_v31 = vld [vmem:[#allocation4 + $0x3b8] sm:$0xff]  ;;  %v7010_v42 = vld [vmem:[#allocation7 + $0x3b8] sm:$0xff] }
 0x179   :  { %v1846_v0 = vadd.f32 %v1845_v14, %v1446_v34  ;;  %v2585_v22 = vadd.f32 %v2584_v33, %v2185_v1  ;;  %v1454_v34 = vmul.f32 %v245_v55, %v245_v55  ;;  %v2193_v1 = vmul.f32 %v974_v26, %v974_v26  ;;  %v253_v55 = vld [vmem:[#allocation7 + $0x5c8] sm:$0xff] }
 0x17a   :  { %v982_v26 = vsub.f32 %v581_v27, %v7003_v62  ;;  %v589_v27 = vld [vmem:[#allocation4 + $0x3c0] sm:$0xff]  ;;  %v7011_v62 = vld [vmem:[#allocation7 + $0x3c0] sm:$0xff] }
 0x17b   :  { %v1847_v17 = vadd.f32 %v1846_v0, %v1447_v39  ;;  %v2586_v54 = vadd.f32 %v2585_v22, %v2186_v6  ;;  %v1455_v39 = vmul.f32 %v246_v15, %v246_v15  ;;  %v2194_v6 = vmul.f32 %v975_v3, %v975_v3  ;;  %v254_v15 = vld [vmem:[#allocation7 + $0x5d0] sm:$0xff] }
 0x17c   :  { %v983_v3 = vsub.f32 %v582_v41, %v7004_v9  ;;  %v590_v41 = vld [vmem:[#allocation4 + $0x3c8] sm:$0xff]  ;;  %v7012_v9 = vld [vmem:[#allocation7 + $0x3c8] sm:$0xff] }
 0x17d   :  { %v1848_v53 = vadd.f32 %v1847_v17, %v1448_v43  ;;  %v2587_v4 = vadd.f32 %v2586_v54, %v2187_v35  ;;  %v1456_v43 = vmul.f32 %v247_v58, %v247_v58  ;;  %v2195_v35 = vmul.f32 %v976_v28, %v976_v28  ;;  %v255_v58 = vld [vmem:[#allocation7 + $0x5d8] sm:$0xff] }
 0x17e   :  { %v984_v28 = vsub.f32 %v583_v11, %v7005_v47  ;;  %v591_v11 = vld [vmem:[#allocation4 + $0x3d0] sm:$0xff]  ;;  %v7013_v47 = vld [vmem:[#allocation7 + $0x3d0] sm:$0xff] }
 0x17f   :  { %v1849_v37 = vadd.f32 %v1848_v53, %v1449_v12  ;;  %v2588_v46 = vadd.f32 %v2587_v4, %v2188_v56  ;;  %v1457_v12 = vmul.f32 %v248_v40, %v248_v40  ;;  %v2196_v56 = vmul.f32 %v977_v50, %v977_v50  ;;  %v256_v40 = vld [vmem:[#allocation7 + $0x5e0] sm:$0xff] }
 0x180   :  { %v985_v50 = vsub.f32 %v584_v19, %v7006_v32  ;;  %v592_v19 = vld [vmem:[#allocation4 + $0x3d8] sm:$0xff]  ;;  %v7014_v32 = vld [vmem:[#allocation7 + $0x3d8] sm:$0xff] }
 0x181   :  { %v1850_v23 = vadd.f32 %v1849_v37, %v1450_v16  ;;  %v2589_v44 = vadd.f32 %v2588_v46, %v2189_v63  ;;  %v1458_v16 = vmul.f32 %v249_v36, %v249_v36  ;;  %v2197_v63 = vmul.f32 %v978_v52, %v978_v52  ;;  %v257_v36 = vld [vmem:[#allocation7 + $0x5e8] sm:$0xff] }
 0x182   :  { %v986_v52 = vsub.f32 %v585_v7, %v7007_v60  ;;  %v593_v7 = vld [vmem:[#allocation4 + $0x3e0] sm:$0xff]  ;;  %v7015_v60 = vld [vmem:[#allocation7 + $0x3e0] sm:$0xff] }
 0x183   :  { %v1851_v51 = vadd.f32 %v1850_v23, %v1451_v21  ;;  %v2590_v29 = vadd.f32 %v2589_v44, %v2190_v10  ;;  %v1459_v21 = vmul.f32 %v250_v20, %v250_v20  ;;  %v2198_v10 = vmul.f32 %v979_v49, %v979_v49  ;;  %v258_v20 = vld [vmem:[#allocation7 + $0x5f0] sm:$0xff] }
 0x184   :  { %v987_v49 = vsub.f32 %v586_v48, %v7008_v57  ;;  %v594_v48 = vld [vmem:[#allocation4 + $0x3e8] sm:$0xff]  ;;  %v7016_v57 = vld [vmem:[#allocation7 + $0x3e8] sm:$0xff] }
 0x185   :  { %v1852_v13 = vadd.f32 %v1851_v51, %v1452_v25  ;;  %v2591_v2 = vadd.f32 %v2590_v29, %v2191_v18  ;;  %v1460_v25 = vmul.f32 %v251_v61, %v251_v61  ;;  %v2199_v18 = vmul.f32 %v980_v8, %v980_v8  ;;  %v259_v61 = vld [vmem:[#allocation7 + $0x5f8] sm:$0xff] }
 0x186   :  { %v988_v8 = vsub.f32 %v587_v5, %v7009_v38  ;;  %v595_v5 = vld [vmem:[#allocation4 + $0x3f0] sm:$0xff]  ;;  %v7017_v38 = vld [vmem:[#allocation7 + $0x3f0] sm:$0xff] }
 0x187   :  { %v1853_v14 = vadd.f32 %v1852_v13, %v1453_v30  ;;  %v2592_v33 = vadd.f32 %v2591_v2, %v2192_v24  ;;  %v1461_v30 = vmul.f32 %v252_v59, %v252_v59  ;;  %v2200_v24 = vmul.f32 %v981_v45, %v981_v45  ;;  %v260_v59 = vld [vmem:[#allocation7 + $0x600] sm:$0xff] }
 0x188   :  { %v989_v45 = vsub.f32 %v588_v31, %v7010_v42  ;;  %v596_v31 = vld [vmem:[#allocation4 + $0x3f8] sm:$0xff]  ;;  %v7018_v42 = vld [vmem:[#allocation7 + $0x3f8] sm:$0xff] }
 0x189   :  { %v1854_v0 = vadd.f32 %v1853_v14, %v1454_v34  ;;  %v2593_v22 = vadd.f32 %v2592_v33, %v2193_v1  ;;  %v1462_v34 = vmul.f32 %v253_v55, %v253_v55  ;;  %v2201_v1 = vmul.f32 %v982_v26, %v982_v26  ;;  %v261_v55 = vld [vmem:[#allocation7 + $0x608] sm:$0xff] }
 0x18a   :  { %v990_v26 = vsub.f32 %v589_v27, %v7011_v62  ;;  %v597_v27 = vld [vmem:[#allocation4 + $0x400] sm:$0xff]  ;;  %v7019_v62 = vld [vmem:[#allocation7 + $0x400] sm:$0xff] }
 0x18b   :  { %v1855_v17 = vadd.f32 %v1854_v0, %v1455_v39  ;;  %v2594_v54 = vadd.f32 %v2593_v22, %v2194_v6  ;;  %v1463_v39 = vmul.f32 %v254_v15, %v254_v15  ;;  %v2202_v6 = vmul.f32 %v983_v3, %v983_v3  ;;  %v262_v15 = vld [vmem:[#allocation7 + $0x610] sm:$0xff] }
 0x18c   :  { %v991_v3 = vsub.f32 %v590_v41, %v7012_v9  ;;  %v598_v41 = vld [vmem:[#allocation4 + $0x408] sm:$0xff]  ;;  %v7020_v9 = vld [vmem:[#allocation7 + $0x408] sm:$0xff] }
 0x18d   :  { %v1856_v53 = vadd.f32 %v1855_v17, %v1456_v43  ;;  %v2595_v4 = vadd.f32 %v2594_v54, %v2195_v35  ;;  %v1464_v43 = vmul.f32 %v255_v58, %v255_v58  ;;  %v2203_v35 = vmul.f32 %v984_v28, %v984_v28  ;;  %v263_v58 = vld [vmem:[#allocation7 + $0x618] sm:$0xff] }
 0x18e   :  { %v992_v28 = vsub.f32 %v591_v11, %v7013_v47  ;;  %v599_v11 = vld [vmem:[#allocation4 + $0x410] sm:$0xff]  ;;  %v7021_v47 = vld [vmem:[#allocation7 + $0x410] sm:$0xff] }
 0x18f   :  { %v1857_v37 = vadd.f32 %v1856_v53, %v1457_v12  ;;  %v2596_v46 = vadd.f32 %v2595_v4, %v2196_v56  ;;  %v1465_v12 = vmul.f32 %v256_v40, %v256_v40  ;;  %v2204_v56 = vmul.f32 %v985_v50, %v985_v50  ;;  %v264_v40 = vld [vmem:[#allocation7 + $0x620] sm:$0xff] }
 0x190   :  { %v993_v50 = vsub.f32 %v592_v19, %v7014_v32  ;;  %v600_v19 = vld [vmem:[#allocation4 + $0x418] sm:$0xff]  ;;  %v7022_v32 = vld [vmem:[#allocation7 + $0x418] sm:$0xff] }
 0x191   :  { %v1858_v23 = vadd.f32 %v1857_v37, %v1458_v16  ;;  %v2597_v44 = vadd.f32 %v2596_v46, %v2197_v63  ;;  %v1466_v16 = vmul.f32 %v257_v36, %v257_v36  ;;  %v2205_v63 = vmul.f32 %v986_v52, %v986_v52  ;;  %v265_v36 = vld [vmem:[#allocation7 + $0x628] sm:$0xff] }
 0x192   :  { %v994_v52 = vsub.f32 %v593_v7, %v7015_v60  ;;  %v601_v7 = vld [vmem:[#allocation4 + $0x420] sm:$0xff]  ;;  %v7023_v60 = vld [vmem:[#allocation7 + $0x420] sm:$0xff] }
 0x193   :  { %v1859_v51 = vadd.f32 %v1858_v23, %v1459_v21  ;;  %v2598_v29 = vadd.f32 %v2597_v44, %v2198_v10  ;;  %v1467_v21 = vmul.f32 %v258_v20, %v258_v20  ;;  %v2206_v10 = vmul.f32 %v987_v49, %v987_v49  ;;  %v266_v20 = vld [vmem:[#allocation7 + $0x630] sm:$0xff] }
 0x194   :  { %v995_v49 = vsub.f32 %v594_v48, %v7016_v57  ;;  %v602_v48 = vld [vmem:[#allocation4 + $0x428] sm:$0xff]  ;;  %v7024_v57 = vld [vmem:[#allocation7 + $0x428] sm:$0xff] }
 0x195   :  { %v1860_v13 = vadd.f32 %v1859_v51, %v1460_v25  ;;  %v2599_v2 = vadd.f32 %v2598_v29, %v2199_v18  ;;  %v1468_v25 = vmul.f32 %v259_v61, %v259_v61  ;;  %v2207_v18 = vmul.f32 %v988_v8, %v988_v8  ;;  %v267_v61 = vld [vmem:[#allocation7 + $0x638] sm:$0xff] }
 0x196   :  { %v996_v8 = vsub.f32 %v595_v5, %v7017_v38  ;;  %v603_v5 = vld [vmem:[#allocation4 + $0x430] sm:$0xff]  ;;  %v7025_v38 = vld [vmem:[#allocation7 + $0x430] sm:$0xff] }
 0x197   :  { %v1861_v14 = vadd.f32 %v1860_v13, %v1461_v30  ;;  %v2600_v33 = vadd.f32 %v2599_v2, %v2200_v24  ;;  %v1469_v30 = vmul.f32 %v260_v59, %v260_v59  ;;  %v2208_v24 = vmul.f32 %v989_v45, %v989_v45  ;;  %v268_v59 = vld [vmem:[#allocation7 + $0x640] sm:$0xff] }
 0x198   :  { %v997_v45 = vsub.f32 %v596_v31, %v7018_v42  ;;  %v604_v31 = vld [vmem:[#allocation4 + $0x438] sm:$0xff]  ;;  %v7026_v42 = vld [vmem:[#allocation7 + $0x438] sm:$0xff] }
 0x199   :  { %v1862_v0 = vadd.f32 %v1861_v14, %v1462_v34  ;;  %v2601_v22 = vadd.f32 %v2600_v33, %v2201_v1  ;;  %v1470_v34 = vmul.f32 %v261_v55, %v261_v55  ;;  %v2209_v1 = vmul.f32 %v990_v26, %v990_v26  ;;  %v269_v55 = vld [vmem:[#allocation7 + $0x648] sm:$0xff] }
 0x19a   :  { %v998_v26 = vsub.f32 %v597_v27, %v7019_v62  ;;  %v605_v27 = vld [vmem:[#allocation4 + $0x440] sm:$0xff]  ;;  %v7027_v62 = vld [vmem:[#allocation7 + $0x440] sm:$0xff] }
 0x19b   :  { %v1863_v17 = vadd.f32 %v1862_v0, %v1463_v39  ;;  %v2602_v54 = vadd.f32 %v2601_v22, %v2202_v6  ;;  %v1471_v39 = vmul.f32 %v262_v15, %v262_v15  ;;  %v2210_v6 = vmul.f32 %v991_v3, %v991_v3  ;;  %v270_v15 = vld [vmem:[#allocation7 + $0x650] sm:$0xff] }
 0x19c   :  { %v999_v3 = vsub.f32 %v598_v41, %v7020_v9  ;;  %v606_v41 = vld [vmem:[#allocation4 + $0x448] sm:$0xff]  ;;  %v7028_v9 = vld [vmem:[#allocation7 + $0x448] sm:$0xff] }
 0x19d   :  { %v1864_v53 = vadd.f32 %v1863_v17, %v1464_v43  ;;  %v2603_v4 = vadd.f32 %v2602_v54, %v2203_v35  ;;  %v1472_v43 = vmul.f32 %v263_v58, %v263_v58  ;;  %v2211_v35 = vmul.f32 %v992_v28, %v992_v28  ;;  %v271_v58 = vld [vmem:[#allocation7 + $0x658] sm:$0xff] }
 0x19e   :  { %v1000_v28 = vsub.f32 %v599_v11, %v7021_v47  ;;  %v607_v11 = vld [vmem:[#allocation4 + $0x450] sm:$0xff]  ;;  %v7029_v47 = vld [vmem:[#allocation7 + $0x450] sm:$0xff] }
 0x19f   :  { %v1865_v37 = vadd.f32 %v1864_v53, %v1465_v12  ;;  %v2604_v46 = vadd.f32 %v2603_v4, %v2204_v56  ;;  %v1473_v12 = vmul.f32 %v264_v40, %v264_v40  ;;  %v2212_v56 = vmul.f32 %v993_v50, %v993_v50  ;;  %v272_v40 = vld [vmem:[#allocation7 + $0x660] sm:$0xff] }
 0x1a0   :  { %v1001_v50 = vsub.f32 %v600_v19, %v7022_v32  ;;  %v608_v19 = vld [vmem:[#allocation4 + $0x458] sm:$0xff]  ;;  %v7030_v32 = vld [vmem:[#allocation7 + $0x458] sm:$0xff] }
 0x1a1   :  { %v1866_v23 = vadd.f32 %v1865_v37, %v1466_v16  ;;  %v2605_v44 = vadd.f32 %v2604_v46, %v2205_v63  ;;  %v1474_v16 = vmul.f32 %v265_v36, %v265_v36  ;;  %v2213_v63 = vmul.f32 %v994_v52, %v994_v52  ;;  %v273_v36 = vld [vmem:[#allocation7 + $0x668] sm:$0xff] }
 0x1a2   :  { %v1002_v52 = vsub.f32 %v601_v7, %v7023_v60  ;;  %v609_v7 = vld [vmem:[#allocation4 + $0x460] sm:$0xff]  ;;  %v7031_v60 = vld [vmem:[#allocation7 + $0x460] sm:$0xff] }
 0x1a3   :  { %v1867_v51 = vadd.f32 %v1866_v23, %v1467_v21  ;;  %v2606_v29 = vadd.f32 %v2605_v44, %v2206_v10  ;;  %v1475_v21 = vmul.f32 %v266_v20, %v266_v20  ;;  %v2214_v10 = vmul.f32 %v995_v49, %v995_v49  ;;  %v274_v20 = vld [vmem:[#allocation7 + $0x670] sm:$0xff] }
 0x1a4   :  { %v1003_v49 = vsub.f32 %v602_v48, %v7024_v57  ;;  %v610_v48 = vld [vmem:[#allocation4 + $0x468] sm:$0xff]  ;;  %v7032_v57 = vld [vmem:[#allocation7 + $0x468] sm:$0xff] }
 0x1a5   :  { %v1868_v13 = vadd.f32 %v1867_v51, %v1468_v25  ;;  %v2607_v2 = vadd.f32 %v2606_v29, %v2207_v18  ;;  %v1476_v25 = vmul.f32 %v267_v61, %v267_v61  ;;  %v2215_v18 = vmul.f32 %v996_v8, %v996_v8  ;;  %v275_v61 = vld [vmem:[#allocation7 + $0x678] sm:$0xff] }
 0x1a6   :  { %v1004_v8 = vsub.f32 %v603_v5, %v7025_v38  ;;  %v611_v5 = vld [vmem:[#allocation4 + $0x470] sm:$0xff]  ;;  %v7033_v38 = vld [vmem:[#allocation7 + $0x470] sm:$0xff] }
 0x1a7   :  { %v1869_v14 = vadd.f32 %v1868_v13, %v1469_v30  ;;  %v2608_v33 = vadd.f32 %v2607_v2, %v2208_v24  ;;  %v1477_v30 = vmul.f32 %v268_v59, %v268_v59  ;;  %v2216_v24 = vmul.f32 %v997_v45, %v997_v45  ;;  %v276_v59 = vld [vmem:[#allocation7 + $0x680] sm:$0xff] }
 0x1a8   :  { %v1005_v45 = vsub.f32 %v604_v31, %v7026_v42  ;;  %v612_v31 = vld [vmem:[#allocation4 + $0x478] sm:$0xff]  ;;  %v7034_v42 = vld [vmem:[#allocation7 + $0x478] sm:$0xff] }
 0x1a9   :  { %v1870_v0 = vadd.f32 %v1869_v14, %v1470_v34  ;;  %v2609_v22 = vadd.f32 %v2608_v33, %v2209_v1  ;;  %v1478_v34 = vmul.f32 %v269_v55, %v269_v55  ;;  %v2217_v1 = vmul.f32 %v998_v26, %v998_v26  ;;  %v277_v55 = vld [vmem:[#allocation7 + $0x688] sm:$0xff] }
 0x1aa   :  { %v1006_v26 = vsub.f32 %v605_v27, %v7027_v62  ;;  %v613_v27 = vld [vmem:[#allocation4 + $0x480] sm:$0xff]  ;;  %v7035_v62 = vld [vmem:[#allocation7 + $0x480] sm:$0xff] }
 0x1ab   :  { %v1871_v17 = vadd.f32 %v1870_v0, %v1471_v39  ;;  %v2610_v54 = vadd.f32 %v2609_v22, %v2210_v6  ;;  %v1479_v39 = vmul.f32 %v270_v15, %v270_v15  ;;  %v2218_v6 = vmul.f32 %v999_v3, %v999_v3  ;;  %v278_v15 = vld [vmem:[#allocation7 + $0x690] sm:$0xff] }
 0x1ac   :  { %v1007_v3 = vsub.f32 %v606_v41, %v7028_v9  ;;  %v614_v41 = vld [vmem:[#allocation4 + $0x488] sm:$0xff]  ;;  %v7036_v9 = vld [vmem:[#allocation7 + $0x488] sm:$0xff] }
 0x1ad   :  { %v1872_v53 = vadd.f32 %v1871_v17, %v1472_v43  ;;  %v2611_v4 = vadd.f32 %v2610_v54, %v2211_v35  ;;  %v1480_v43 = vmul.f32 %v271_v58, %v271_v58  ;;  %v2219_v35 = vmul.f32 %v1000_v28, %v1000_v28  ;;  %v279_v58 = vld [vmem:[#allocation7 + $0x698] sm:$0xff] }
 0x1ae   :  { %v1008_v28 = vsub.f32 %v607_v11, %v7029_v47  ;;  %v615_v11 = vld [vmem:[#allocation4 + $0x490] sm:$0xff]  ;;  %v7037_v47 = vld [vmem:[#allocation7 + $0x490] sm:$0xff] }
 0x1af   :  { %v1873_v37 = vadd.f32 %v1872_v53, %v1473_v12  ;;  %v2612_v46 = vadd.f32 %v2611_v4, %v2212_v56  ;;  %v1481_v12 = vmul.f32 %v272_v40, %v272_v40  ;;  %v2220_v56 = vmul.f32 %v1001_v50, %v1001_v50  ;;  %v280_v40 = vld [vmem:[#allocation7 + $0x6a0] sm:$0xff] }
 0x1b0   :  { %v1009_v50 = vsub.f32 %v608_v19, %v7030_v32  ;;  %v616_v19 = vld [vmem:[#allocation4 + $0x498] sm:$0xff]  ;;  %v7038_v32 = vld [vmem:[#allocation7 + $0x498] sm:$0xff] }
 0x1b1   :  { %v1874_v23 = vadd.f32 %v1873_v37, %v1474_v16  ;;  %v2613_v44 = vadd.f32 %v2612_v46, %v2213_v63  ;;  %v1482_v16 = vmul.f32 %v273_v36, %v273_v36  ;;  %v2221_v63 = vmul.f32 %v1002_v52, %v1002_v52  ;;  %v281_v36 = vld [vmem:[#allocation7 + $0x6a8] sm:$0xff] }
 0x1b2   :  { %v1010_v52 = vsub.f32 %v609_v7, %v7031_v60  ;;  %v617_v7 = vld [vmem:[#allocation4 + $0x4a0] sm:$0xff]  ;;  %v7039_v60 = vld [vmem:[#allocation7 + $0x4a0] sm:$0xff] }
 0x1b3   :  { %v1875_v51 = vadd.f32 %v1874_v23, %v1475_v21  ;;  %v2614_v29 = vadd.f32 %v2613_v44, %v2214_v10  ;;  %v1483_v21 = vmul.f32 %v274_v20, %v274_v20  ;;  %v2222_v10 = vmul.f32 %v1003_v49, %v1003_v49  ;;  %v282_v20 = vld [vmem:[#allocation7 + $0x6b0] sm:$0xff] }
 0x1b4   :  { %v1011_v49 = vsub.f32 %v610_v48, %v7032_v57  ;;  %v618_v48 = vld [vmem:[#allocation4 + $0x4a8] sm:$0xff]  ;;  %v7040_v57 = vld [vmem:[#allocation7 + $0x4a8] sm:$0xff] }
 0x1b5   :  { %v1876_v13 = vadd.f32 %v1875_v51, %v1476_v25  ;;  %v2615_v2 = vadd.f32 %v2614_v29, %v2215_v18  ;;  %v1484_v25 = vmul.f32 %v275_v61, %v275_v61  ;;  %v2223_v18 = vmul.f32 %v1004_v8, %v1004_v8  ;;  %v283_v61 = vld [vmem:[#allocation7 + $0x6b8] sm:$0xff] }
 0x1b6   :  { %v1012_v8 = vsub.f32 %v611_v5, %v7033_v38  ;;  %v619_v5 = vld [vmem:[#allocation4 + $0x4b0] sm:$0xff]  ;;  %v7041_v38 = vld [vmem:[#allocation7 + $0x4b0] sm:$0xff] }
 0x1b7   :  { %v1877_v14 = vadd.f32 %v1876_v13, %v1477_v30  ;;  %v2616_v33 = vadd.f32 %v2615_v2, %v2216_v24  ;;  %v1485_v30 = vmul.f32 %v276_v59, %v276_v59  ;;  %v2224_v24 = vmul.f32 %v1005_v45, %v1005_v45  ;;  %v284_v59 = vld [vmem:[#allocation7 + $0x6c0] sm:$0xff] }
 0x1b8   :  { %v1013_v45 = vsub.f32 %v612_v31, %v7034_v42  ;;  %v620_v31 = vld [vmem:[#allocation4 + $0x4b8] sm:$0xff]  ;;  %v7042_v42 = vld [vmem:[#allocation7 + $0x4b8] sm:$0xff] }
 0x1b9   :  { %v1878_v0 = vadd.f32 %v1877_v14, %v1478_v34  ;;  %v2617_v22 = vadd.f32 %v2616_v33, %v2217_v1  ;;  %v1486_v34 = vmul.f32 %v277_v55, %v277_v55  ;;  %v2225_v1 = vmul.f32 %v1006_v26, %v1006_v26  ;;  %v285_v55 = vld [vmem:[#allocation7 + $0x6c8] sm:$0xff] }
 0x1ba   :  { %v1014_v26 = vsub.f32 %v613_v27, %v7035_v62  ;;  %v621_v27 = vld [vmem:[#allocation4 + $0x4c0] sm:$0xff]  ;;  %v7043_v62 = vld [vmem:[#allocation7 + $0x4c0] sm:$0xff] }
 0x1bb   :  { %v1879_v17 = vadd.f32 %v1878_v0, %v1479_v39  ;;  %v2618_v54 = vadd.f32 %v2617_v22, %v2218_v6  ;;  %v1487_v39 = vmul.f32 %v278_v15, %v278_v15  ;;  %v2226_v6 = vmul.f32 %v1007_v3, %v1007_v3  ;;  %v286_v15 = vld [vmem:[#allocation7 + $0x6d0] sm:$0xff] }
 0x1bc   :  { %v1015_v3 = vsub.f32 %v614_v41, %v7036_v9  ;;  %v622_v41 = vld [vmem:[#allocation4 + $0x4c8] sm:$0xff]  ;;  %v7044_v9 = vld [vmem:[#allocation7 + $0x4c8] sm:$0xff] }
 0x1bd   :  { %v1880_v53 = vadd.f32 %v1879_v17, %v1480_v43  ;;  %v2619_v4 = vadd.f32 %v2618_v54, %v2219_v35  ;;  %v1488_v43 = vmul.f32 %v279_v58, %v279_v58  ;;  %v2227_v35 = vmul.f32 %v1008_v28, %v1008_v28  ;;  %v287_v58 = vld [vmem:[#allocation7 + $0x6d8] sm:$0xff] }
 0x1be   :  { %v1016_v28 = vsub.f32 %v615_v11, %v7037_v47  ;;  %v623_v11 = vld [vmem:[#allocation4 + $0x4d0] sm:$0xff]  ;;  %v7045_v47 = vld [vmem:[#allocation7 + $0x4d0] sm:$0xff] }
 0x1bf   :  { %v1881_v37 = vadd.f32 %v1880_v53, %v1481_v12  ;;  %v2620_v46 = vadd.f32 %v2619_v4, %v2220_v56  ;;  %v1489_v12 = vmul.f32 %v280_v40, %v280_v40  ;;  %v2228_v56 = vmul.f32 %v1009_v50, %v1009_v50  ;;  %v288_v40 = vld [vmem:[#allocation7 + $0x6e0] sm:$0xff] }
 0x1c0   :  { %v1017_v50 = vsub.f32 %v616_v19, %v7038_v32  ;;  %v624_v19 = vld [vmem:[#allocation4 + $0x4d8] sm:$0xff]  ;;  %v7046_v32 = vld [vmem:[#allocation7 + $0x4d8] sm:$0xff] }
 0x1c1   :  { %v1882_v23 = vadd.f32 %v1881_v37, %v1482_v16  ;;  %v2621_v44 = vadd.f32 %v2620_v46, %v2221_v63  ;;  %v1490_v16 = vmul.f32 %v281_v36, %v281_v36  ;;  %v2229_v63 = vmul.f32 %v1010_v52, %v1010_v52  ;;  %v289_v36 = vld [vmem:[#allocation7 + $0x6e8] sm:$0xff] }
 0x1c2   :  { %v1018_v52 = vsub.f32 %v617_v7, %v7039_v60  ;;  %v625_v7 = vld [vmem:[#allocation4 + $0x4e0] sm:$0xff]  ;;  %v7047_v60 = vld [vmem:[#allocation7 + $0x4e0] sm:$0xff] }
 0x1c3   :  { %v1883_v51 = vadd.f32 %v1882_v23, %v1483_v21  ;;  %v2622_v29 = vadd.f32 %v2621_v44, %v2222_v10  ;;  %v1491_v21 = vmul.f32 %v282_v20, %v282_v20  ;;  %v2230_v10 = vmul.f32 %v1011_v49, %v1011_v49  ;;  %v290_v20 = vld [vmem:[#allocation7 + $0x6f0] sm:$0xff] }
 0x1c4   :  { %v1019_v49 = vsub.f32 %v618_v48, %v7040_v57  ;;  %v626_v48 = vld [vmem:[#allocation4 + $0x4e8] sm:$0xff]  ;;  %v7048_v57 = vld [vmem:[#allocation7 + $0x4e8] sm:$0xff] }
 0x1c5   :  { %v1884_v13 = vadd.f32 %v1883_v51, %v1484_v25  ;;  %v2623_v2 = vadd.f32 %v2622_v29, %v2223_v18  ;;  %v1492_v25 = vmul.f32 %v283_v61, %v283_v61  ;;  %v2231_v18 = vmul.f32 %v1012_v8, %v1012_v8  ;;  %v291_v61 = vld [vmem:[#allocation7 + $0x6f8] sm:$0xff] }
 0x1c6   :  { %v1020_v8 = vsub.f32 %v619_v5, %v7041_v38  ;;  %v627_v5 = vld [vmem:[#allocation4 + $0x4f0] sm:$0xff]  ;;  %v7049_v38 = vld [vmem:[#allocation7 + $0x4f0] sm:$0xff] }
 0x1c7   :  { %v1885_v14 = vadd.f32 %v1884_v13, %v1485_v30  ;;  %v2624_v33 = vadd.f32 %v2623_v2, %v2224_v24  ;;  %v1493_v30 = vmul.f32 %v284_v59, %v284_v59  ;;  %v2232_v24 = vmul.f32 %v1013_v45, %v1013_v45  ;;  %v292_v59 = vld [vmem:[#allocation7 + $0x700] sm:$0xff] }
 0x1c8   :  { %v1021_v45 = vsub.f32 %v620_v31, %v7042_v42  ;;  %v628_v31 = vld [vmem:[#allocation4 + $0x4f8] sm:$0xff]  ;;  %v7050_v42 = vld [vmem:[#allocation7 + $0x4f8] sm:$0xff] }
 0x1c9   :  { %v1886_v0 = vadd.f32 %v1885_v14, %v1486_v34  ;;  %v2625_v22 = vadd.f32 %v2624_v33, %v2225_v1  ;;  %v1494_v34 = vmul.f32 %v285_v55, %v285_v55  ;;  %v2233_v1 = vmul.f32 %v1014_v26, %v1014_v26  ;;  %v293_v55 = vld [vmem:[#allocation7 + $0x708] sm:$0xff] }
 0x1ca   :  { %v1022_v26 = vsub.f32 %v621_v27, %v7043_v62  ;;  %v629_v27 = vld [vmem:[#allocation4 + $0x500] sm:$0xff]  ;;  %v7051_v62 = vld [vmem:[#allocation7 + $0x500] sm:$0xff] }
 0x1cb   :  { %v1887_v17 = vadd.f32 %v1886_v0, %v1487_v39  ;;  %v2626_v54 = vadd.f32 %v2625_v22, %v2226_v6  ;;  %v1495_v39 = vmul.f32 %v286_v15, %v286_v15  ;;  %v2234_v6 = vmul.f32 %v1015_v3, %v1015_v3  ;;  %v294_v15 = vld [vmem:[#allocation7 + $0x710] sm:$0xff] }
 0x1cc   :  { %v1023_v3 = vsub.f32 %v622_v41, %v7044_v9  ;;  %v630_v41 = vld [vmem:[#allocation4 + $0x508] sm:$0xff]  ;;  %v7052_v9 = vld [vmem:[#allocation7 + $0x508] sm:$0xff] }
 0x1cd   :  { %v1888_v53 = vadd.f32 %v1887_v17, %v1488_v43  ;;  %v2627_v4 = vadd.f32 %v2626_v54, %v2227_v35  ;;  %v1496_v43 = vmul.f32 %v287_v58, %v287_v58  ;;  %v2235_v35 = vmul.f32 %v1016_v28, %v1016_v28  ;;  %v295_v58 = vld [vmem:[#allocation7 + $0x718] sm:$0xff] }
 0x1ce   :  { %v1024_v28 = vsub.f32 %v623_v11, %v7045_v47  ;;  %v631_v11 = vld [vmem:[#allocation4 + $0x510] sm:$0xff]  ;;  %v7053_v47 = vld [vmem:[#allocation7 + $0x510] sm:$0xff] }
 0x1cf   :  { %v1889_v37 = vadd.f32 %v1888_v53, %v1489_v12  ;;  %v2628_v46 = vadd.f32 %v2627_v4, %v2228_v56  ;;  %v1497_v12 = vmul.f32 %v288_v40, %v288_v40  ;;  %v2236_v56 = vmul.f32 %v1017_v50, %v1017_v50  ;;  %v296_v40 = vld [vmem:[#allocation7 + $0x720] sm:$0xff] }
 0x1d0   :  { %v1025_v50 = vsub.f32 %v624_v19, %v7046_v32  ;;  %v632_v19 = vld [vmem:[#allocation4 + $0x518] sm:$0xff]  ;;  %v7054_v32 = vld [vmem:[#allocation7 + $0x518] sm:$0xff] }
 0x1d1   :  { %v1890_v23 = vadd.f32 %v1889_v37, %v1490_v16  ;;  %v2629_v44 = vadd.f32 %v2628_v46, %v2229_v63  ;;  %v1498_v16 = vmul.f32 %v289_v36, %v289_v36  ;;  %v2237_v63 = vmul.f32 %v1018_v52, %v1018_v52  ;;  %v297_v36 = vld [vmem:[#allocation7 + $0x728] sm:$0xff] }
 0x1d2   :  { %v1026_v52 = vsub.f32 %v625_v7, %v7047_v60  ;;  %v633_v7 = vld [vmem:[#allocation4 + $0x520] sm:$0xff]  ;;  %v7055_v60 = vld [vmem:[#allocation7 + $0x520] sm:$0xff] }
 0x1d3   :  { %v1891_v51 = vadd.f32 %v1890_v23, %v1491_v21  ;;  %v2630_v29 = vadd.f32 %v2629_v44, %v2230_v10  ;;  %v1499_v21 = vmul.f32 %v290_v20, %v290_v20  ;;  %v2238_v10 = vmul.f32 %v1019_v49, %v1019_v49  ;;  %v298_v20 = vld [vmem:[#allocation7 + $0x730] sm:$0xff] }
 0x1d4   :  { %v1027_v49 = vsub.f32 %v626_v48, %v7048_v57  ;;  %v634_v48 = vld [vmem:[#allocation4 + $0x528] sm:$0xff]  ;;  %v7056_v57 = vld [vmem:[#allocation7 + $0x528] sm:$0xff] }
 0x1d5   :  { %v1892_v13 = vadd.f32 %v1891_v51, %v1492_v25  ;;  %v2631_v2 = vadd.f32 %v2630_v29, %v2231_v18  ;;  %v1500_v25 = vmul.f32 %v291_v61, %v291_v61  ;;  %v2239_v18 = vmul.f32 %v1020_v8, %v1020_v8  ;;  %v299_v61 = vld [vmem:[#allocation7 + $0x738] sm:$0xff] }
 0x1d6   :  { %v1028_v8 = vsub.f32 %v627_v5, %v7049_v38  ;;  %v635_v5 = vld [vmem:[#allocation4 + $0x530] sm:$0xff]  ;;  %v7057_v38 = vld [vmem:[#allocation7 + $0x530] sm:$0xff] }
 0x1d7   :  { %v1893_v14 = vadd.f32 %v1892_v13, %v1493_v30  ;;  %v2632_v33 = vadd.f32 %v2631_v2, %v2232_v24  ;;  %v1501_v30 = vmul.f32 %v292_v59, %v292_v59  ;;  %v2240_v24 = vmul.f32 %v1021_v45, %v1021_v45  ;;  %v300_v59 = vld [vmem:[#allocation7 + $0x740] sm:$0xff] }
 0x1d8   :  { %v1029_v45 = vsub.f32 %v628_v31, %v7050_v42  ;;  %v636_v31 = vld [vmem:[#allocation4 + $0x538] sm:$0xff]  ;;  %v7058_v42 = vld [vmem:[#allocation7 + $0x538] sm:$0xff] }
 0x1d9   :  { %v1894_v0 = vadd.f32 %v1893_v14, %v1494_v34  ;;  %v2633_v22 = vadd.f32 %v2632_v33, %v2233_v1  ;;  %v1502_v34 = vmul.f32 %v293_v55, %v293_v55  ;;  %v2241_v1 = vmul.f32 %v1022_v26, %v1022_v26  ;;  %v301_v55 = vld [vmem:[#allocation7 + $0x748] sm:$0xff] }
 0x1da   :  { %v1030_v26 = vsub.f32 %v629_v27, %v7051_v62  ;;  %v637_v27 = vld [vmem:[#allocation4 + $0x540] sm:$0xff]  ;;  %v7059_v62 = vld [vmem:[#allocation7 + $0x540] sm:$0xff] }
 0x1db   :  { %v1895_v17 = vadd.f32 %v1894_v0, %v1495_v39  ;;  %v2634_v54 = vadd.f32 %v2633_v22, %v2234_v6  ;;  %v1503_v39 = vmul.f32 %v294_v15, %v294_v15  ;;  %v2242_v6 = vmul.f32 %v1023_v3, %v1023_v3  ;;  %v302_v15 = vld [vmem:[#allocation7 + $0x750] sm:$0xff] }
 0x1dc   :  { %v1031_v3 = vsub.f32 %v630_v41, %v7052_v9  ;;  %v638_v41 = vld [vmem:[#allocation4 + $0x548] sm:$0xff]  ;;  %v7060_v9 = vld [vmem:[#allocation7 + $0x548] sm:$0xff] }
 0x1dd   :  { %v1896_v53 = vadd.f32 %v1895_v17, %v1496_v43  ;;  %v2635_v4 = vadd.f32 %v2634_v54, %v2235_v35  ;;  %v1504_v43 = vmul.f32 %v295_v58, %v295_v58  ;;  %v2243_v35 = vmul.f32 %v1024_v28, %v1024_v28  ;;  %v303_v58 = vld [vmem:[#allocation7 + $0x758] sm:$0xff] }
 0x1de   :  { %v1032_v28 = vsub.f32 %v631_v11, %v7053_v47  ;;  %v639_v11 = vld [vmem:[#allocation4 + $0x550] sm:$0xff]  ;;  %v7061_v47 = vld [vmem:[#allocation7 + $0x550] sm:$0xff] }
 0x1df   :  { %v1897_v37 = vadd.f32 %v1896_v53, %v1497_v12  ;;  %v2636_v46 = vadd.f32 %v2635_v4, %v2236_v56  ;;  %v1505_v12 = vmul.f32 %v296_v40, %v296_v40  ;;  %v2244_v56 = vmul.f32 %v1025_v50, %v1025_v50  ;;  %v304_v40 = vld [vmem:[#allocation7 + $0x760] sm:$0xff] }
 0x1e0   :  { %v1033_v50 = vsub.f32 %v632_v19, %v7054_v32  ;;  %v640_v19 = vld [vmem:[#allocation4 + $0x558] sm:$0xff]  ;;  %v7062_v32 = vld [vmem:[#allocation7 + $0x558] sm:$0xff] }
 0x1e1   :  { %v1898_v23 = vadd.f32 %v1897_v37, %v1498_v16  ;;  %v2637_v44 = vadd.f32 %v2636_v46, %v2237_v63  ;;  %v1506_v16 = vmul.f32 %v297_v36, %v297_v36  ;;  %v2245_v63 = vmul.f32 %v1026_v52, %v1026_v52  ;;  %v305_v36 = vld [vmem:[#allocation7 + $0x768] sm:$0xff] }
 0x1e2   :  { %v1034_v52 = vsub.f32 %v633_v7, %v7055_v60  ;;  %v641_v7 = vld [vmem:[#allocation4 + $0x560] sm:$0xff]  ;;  %v7063_v60 = vld [vmem:[#allocation7 + $0x560] sm:$0xff] }
 0x1e3   :  { %v1899_v51 = vadd.f32 %v1898_v23, %v1499_v21  ;;  %v2638_v29 = vadd.f32 %v2637_v44, %v2238_v10  ;;  %v1507_v21 = vmul.f32 %v298_v20, %v298_v20  ;;  %v2246_v10 = vmul.f32 %v1027_v49, %v1027_v49  ;;  %v306_v20 = vld [vmem:[#allocation7 + $0x770] sm:$0xff] }
 0x1e4   :  { %v1035_v49 = vsub.f32 %v634_v48, %v7056_v57  ;;  %v642_v48 = vld [vmem:[#allocation4 + $0x568] sm:$0xff]  ;;  %v7064_v57 = vld [vmem:[#allocation7 + $0x568] sm:$0xff] }
 0x1e5   :  { %v1900_v13 = vadd.f32 %v1899_v51, %v1500_v25  ;;  %v2639_v2 = vadd.f32 %v2638_v29, %v2239_v18  ;;  %v1508_v25 = vmul.f32 %v299_v61, %v299_v61  ;;  %v2247_v18 = vmul.f32 %v1028_v8, %v1028_v8  ;;  %v307_v61 = vld [vmem:[#allocation7 + $0x778] sm:$0xff] }
 0x1e6   :  { %v1036_v8 = vsub.f32 %v635_v5, %v7057_v38  ;;  %v643_v5 = vld [vmem:[#allocation4 + $0x570] sm:$0xff]  ;;  %v7065_v38 = vld [vmem:[#allocation7 + $0x570] sm:$0xff] }
 0x1e7   :  { %v1901_v14 = vadd.f32 %v1900_v13, %v1501_v30  ;;  %v2640_v33 = vadd.f32 %v2639_v2, %v2240_v24  ;;  %v1509_v30 = vmul.f32 %v300_v59, %v300_v59  ;;  %v2248_v24 = vmul.f32 %v1029_v45, %v1029_v45  ;;  %v308_v59 = vld [vmem:[#allocation7 + $0x780] sm:$0xff] }
 0x1e8   :  { %v1037_v45 = vsub.f32 %v636_v31, %v7058_v42  ;;  %v644_v31 = vld [vmem:[#allocation4 + $0x578] sm:$0xff]  ;;  %v7066_v42 = vld [vmem:[#allocation7 + $0x578] sm:$0xff] }
 0x1e9   :  { %v1902_v0 = vadd.f32 %v1901_v14, %v1502_v34  ;;  %v2641_v22 = vadd.f32 %v2640_v33, %v2241_v1  ;;  %v1510_v34 = vmul.f32 %v301_v55, %v301_v55  ;;  %v2249_v1 = vmul.f32 %v1030_v26, %v1030_v26  ;;  %v309_v55 = vld [vmem:[#allocation7 + $0x788] sm:$0xff] }
 0x1ea   :  { %v1038_v26 = vsub.f32 %v637_v27, %v7059_v62  ;;  %v645_v27 = vld [vmem:[#allocation4 + $0x580] sm:$0xff]  ;;  %v7067_v62 = vld [vmem:[#allocation7 + $0x580] sm:$0xff] }
 0x1eb   :  { %v1903_v17 = vadd.f32 %v1902_v0, %v1503_v39  ;;  %v2642_v54 = vadd.f32 %v2641_v22, %v2242_v6  ;;  %v1511_v39 = vmul.f32 %v302_v15, %v302_v15  ;;  %v2250_v6 = vmul.f32 %v1031_v3, %v1031_v3  ;;  %v310_v15 = vld [vmem:[#allocation7 + $0x790] sm:$0xff] }
 0x1ec   :  { %v1039_v3 = vsub.f32 %v638_v41, %v7060_v9  ;;  %v646_v41 = vld [vmem:[#allocation4 + $0x588] sm:$0xff]  ;;  %v7068_v9 = vld [vmem:[#allocation7 + $0x588] sm:$0xff] }
 0x1ed   :  { %v1904_v53 = vadd.f32 %v1903_v17, %v1504_v43  ;;  %v2643_v4 = vadd.f32 %v2642_v54, %v2243_v35  ;;  %v1512_v43 = vmul.f32 %v303_v58, %v303_v58  ;;  %v2251_v35 = vmul.f32 %v1032_v28, %v1032_v28  ;;  %v311_v58 = vld [vmem:[#allocation7 + $0x798] sm:$0xff] }
 0x1ee   :  { %v1040_v28 = vsub.f32 %v639_v11, %v7061_v47  ;;  %v647_v11 = vld [vmem:[#allocation4 + $0x590] sm:$0xff]  ;;  %v7069_v47 = vld [vmem:[#allocation7 + $0x590] sm:$0xff] }
 0x1ef   :  { %v1905_v37 = vadd.f32 %v1904_v53, %v1505_v12  ;;  %v2644_v46 = vadd.f32 %v2643_v4, %v2244_v56  ;;  %v1513_v12 = vmul.f32 %v304_v40, %v304_v40  ;;  %v2252_v56 = vmul.f32 %v1033_v50, %v1033_v50  ;;  %v312_v40 = vld [vmem:[#allocation7 + $0x7a0] sm:$0xff] }
 0x1f0   :  { %v1041_v50 = vsub.f32 %v640_v19, %v7062_v32  ;;  %v648_v19 = vld [vmem:[#allocation4 + $0x598] sm:$0xff]  ;;  %v7070_v32 = vld [vmem:[#allocation7 + $0x598] sm:$0xff] }
 0x1f1   :  { %v1906_v23 = vadd.f32 %v1905_v37, %v1506_v16  ;;  %v2645_v44 = vadd.f32 %v2644_v46, %v2245_v63  ;;  %v1514_v16 = vmul.f32 %v305_v36, %v305_v36  ;;  %v2253_v63 = vmul.f32 %v1034_v52, %v1034_v52  ;;  %v313_v36 = vld [vmem:[#allocation7 + $0x7a8] sm:$0xff] }
 0x1f2   :  { %v1042_v52 = vsub.f32 %v641_v7, %v7063_v60  ;;  %v649_v7 = vld [vmem:[#allocation4 + $0x5a0] sm:$0xff]  ;;  %v7071_v60 = vld [vmem:[#allocation7 + $0x5a0] sm:$0xff] }
 0x1f3   :  { %v1907_v51 = vadd.f32 %v1906_v23, %v1507_v21  ;;  %v2646_v29 = vadd.f32 %v2645_v44, %v2246_v10  ;;  %v1515_v21 = vmul.f32 %v306_v20, %v306_v20  ;;  %v2254_v10 = vmul.f32 %v1035_v49, %v1035_v49  ;;  %v314_v20 = vld [vmem:[#allocation7 + $0x7b0] sm:$0xff] }
 0x1f4   :  { %v1043_v49 = vsub.f32 %v642_v48, %v7064_v57  ;;  %v650_v48 = vld [vmem:[#allocation4 + $0x5a8] sm:$0xff]  ;;  %v7072_v57 = vld [vmem:[#allocation7 + $0x5a8] sm:$0xff] }
 0x1f5   :  { %v1908_v13 = vadd.f32 %v1907_v51, %v1508_v25  ;;  %v2647_v2 = vadd.f32 %v2646_v29, %v2247_v18  ;;  %v1516_v25 = vmul.f32 %v307_v61, %v307_v61  ;;  %v2255_v18 = vmul.f32 %v1036_v8, %v1036_v8  ;;  %v315_v61 = vld [vmem:[#allocation7 + $0x7b8] sm:$0xff] }
 0x1f6   :  { %v1044_v8 = vsub.f32 %v643_v5, %v7065_v38  ;;  %v651_v5 = vld [vmem:[#allocation4 + $0x5b0] sm:$0xff]  ;;  %v7073_v38 = vld [vmem:[#allocation7 + $0x5b0] sm:$0xff] }
 0x1f7   :  { %v1909_v14 = vadd.f32 %v1908_v13, %v1509_v30  ;;  %v2648_v33 = vadd.f32 %v2647_v2, %v2248_v24  ;;  %v1517_v30 = vmul.f32 %v308_v59, %v308_v59  ;;  %v2256_v24 = vmul.f32 %v1037_v45, %v1037_v45  ;;  %v316_v59 = vld [vmem:[#allocation7 + $0x7c0] sm:$0xff] }
 0x1f8   :  { %v1045_v45 = vsub.f32 %v644_v31, %v7066_v42  ;;  %v652_v31 = vld [vmem:[#allocation4 + $0x5b8] sm:$0xff]  ;;  %v7074_v42 = vld [vmem:[#allocation7 + $0x5b8] sm:$0xff] }
 0x1f9   :  { %v1910_v0 = vadd.f32 %v1909_v14, %v1510_v34  ;;  %v2649_v22 = vadd.f32 %v2648_v33, %v2249_v1  ;;  %v1518_v34 = vmul.f32 %v309_v55, %v309_v55  ;;  %v2257_v1 = vmul.f32 %v1038_v26, %v1038_v26  ;;  %v317_v55 = vld [vmem:[#allocation7 + $0x7c8] sm:$0xff] }
 0x1fa   :  { %v1046_v26 = vsub.f32 %v645_v27, %v7067_v62  ;;  %v653_v27 = vld [vmem:[#allocation4 + $0x5c0] sm:$0xff]  ;;  %v7075_v62 = vld [vmem:[#allocation7 + $0x5c0] sm:$0xff] }
 0x1fb   :  { %v1911_v17 = vadd.f32 %v1910_v0, %v1511_v39  ;;  %v2650_v54 = vadd.f32 %v2649_v22, %v2250_v6  ;;  %v1519_v39 = vmul.f32 %v310_v15, %v310_v15  ;;  %v2258_v6 = vmul.f32 %v1039_v3, %v1039_v3  ;;  %v318_v15 = vld [vmem:[#allocation7 + $0x7d0] sm:$0xff] }
 0x1fc   :  { %v1047_v3 = vsub.f32 %v646_v41, %v7068_v9  ;;  %v654_v41 = vld [vmem:[#allocation4 + $0x5c8] sm:$0xff]  ;;  %v7076_v9 = vld [vmem:[#allocation7 + $0x5c8] sm:$0xff] }
 0x1fd   :  { %v1912_v53 = vadd.f32 %v1911_v17, %v1512_v43  ;;  %v2651_v4 = vadd.f32 %v2650_v54, %v2251_v35  ;;  %v1520_v43 = vmul.f32 %v311_v58, %v311_v58  ;;  %v2259_v35 = vmul.f32 %v1040_v28, %v1040_v28  ;;  %v319_v58 = vld [vmem:[#allocation7 + $0x7d8] sm:$0xff] }
 0x1fe   :  { %v1048_v28 = vsub.f32 %v647_v11, %v7069_v47  ;;  %v655_v11 = vld [vmem:[#allocation4 + $0x5d0] sm:$0xff]  ;;  %v7077_v47 = vld [vmem:[#allocation7 + $0x5d0] sm:$0xff] }
 0x1ff   :  { %v1913_v37 = vadd.f32 %v1912_v53, %v1513_v12  ;;  %v2652_v46 = vadd.f32 %v2651_v4, %v2252_v56  ;;  %v1521_v12 = vmul.f32 %v312_v40, %v312_v40  ;;  %v2260_v56 = vmul.f32 %v1041_v50, %v1041_v50  ;;  %v320_v40 = vld [vmem:[#allocation7 + $0x7e0] sm:$0xff] }
 0x200   :  { %v1049_v50 = vsub.f32 %v648_v19, %v7070_v32  ;;  %v656_v19 = vld [vmem:[#allocation4 + $0x5d8] sm:$0xff]  ;;  %v7078_v32 = vld [vmem:[#allocation7 + $0x5d8] sm:$0xff] }
 0x201   :  { %v1914_v23 = vadd.f32 %v1913_v37, %v1514_v16  ;;  %v2653_v44 = vadd.f32 %v2652_v46, %v2253_v63  ;;  %v1522_v16 = vmul.f32 %v313_v36, %v313_v36  ;;  %v2261_v63 = vmul.f32 %v1042_v52, %v1042_v52  ;;  %v321_v36 = vld [vmem:[#allocation7 + $0x7e8] sm:$0xff] }
 0x202   :  { %v1050_v52 = vsub.f32 %v649_v7, %v7071_v60  ;;  %v657_v7 = vld [vmem:[#allocation4 + $0x5e0] sm:$0xff]  ;;  %v7079_v60 = vld [vmem:[#allocation7 + $0x5e0] sm:$0xff] }
 0x203   :  { %v1915_v51 = vadd.f32 %v1914_v23, %v1515_v21  ;;  %v2654_v29 = vadd.f32 %v2653_v44, %v2254_v10  ;;  %v1523_v21 = vmul.f32 %v314_v20, %v314_v20  ;;  %v2262_v10 = vmul.f32 %v1043_v49, %v1043_v49  ;;  %v322_v20 = vld [vmem:[#allocation7 + $0x7f0] sm:$0xff] }
 0x204   :  { %v1051_v49 = vsub.f32 %v650_v48, %v7072_v57  ;;  %v658_v48 = vld [vmem:[#allocation4 + $0x5e8] sm:$0xff]  ;;  %v7080_v57 = vld [vmem:[#allocation7 + $0x5e8] sm:$0xff] }
 0x205   :  { %v1916_v13 = vadd.f32 %v1915_v51, %v1516_v25  ;;  %v2655_v2 = vadd.f32 %v2654_v29, %v2255_v18  ;;  %v1524_v25 = vmul.f32 %v315_v61, %v315_v61  ;;  %v2263_v18 = vmul.f32 %v1044_v8, %v1044_v8  ;;  %v323_v61 = vld [vmem:[#allocation7 + $0x7f8] sm:$0xff] }
 0x206   :  { %v1052_v8 = vsub.f32 %v651_v5, %v7073_v38  ;;  %v659_v5 = vld [vmem:[#allocation4 + $0x5f0] sm:$0xff]  ;;  %v7081_v38 = vld [vmem:[#allocation7 + $0x5f0] sm:$0xff] }
 0x207   :  { %v1917_v14 = vadd.f32 %v1916_v13, %v1517_v30  ;;  %v2656_v33 = vadd.f32 %v2655_v2, %v2256_v24  ;;  %v1525_v30 = vmul.f32 %v316_v59, %v316_v59  ;;  %v2264_v24 = vmul.f32 %v1045_v45, %v1045_v45  ;;  %v324_v59 = vld [vmem:[#allocation7 + $0x800] sm:$0xff] }
 0x208   :  { %v1053_v45 = vsub.f32 %v652_v31, %v7074_v42  ;;  %v660_v31 = vld [vmem:[#allocation4 + $0x5f8] sm:$0xff]  ;;  %v7082_v42 = vld [vmem:[#allocation7 + $0x5f8] sm:$0xff] }
 0x209   :  { %v1918_v0 = vadd.f32 %v1917_v14, %v1518_v34  ;;  %v2657_v22 = vadd.f32 %v2656_v33, %v2257_v1  ;;  %v1526_v34 = vmul.f32 %v317_v55, %v317_v55  ;;  %v2265_v1 = vmul.f32 %v1046_v26, %v1046_v26  ;;  %v325_v55 = vld [vmem:[#allocation7 + $0x808] sm:$0xff] }
 0x20a   :  { %v1054_v26 = vsub.f32 %v653_v27, %v7075_v62  ;;  %v661_v27 = vld [vmem:[#allocation4 + $0x600] sm:$0xff]  ;;  %v7083_v62 = vld [vmem:[#allocation7 + $0x600] sm:$0xff] }
 0x20b   :  { %v1919_v17 = vadd.f32 %v1918_v0, %v1519_v39  ;;  %v2658_v54 = vadd.f32 %v2657_v22, %v2258_v6  ;;  %v1527_v39 = vmul.f32 %v318_v15, %v318_v15  ;;  %v2266_v6 = vmul.f32 %v1047_v3, %v1047_v3  ;;  %v326_v15 = vld [vmem:[#allocation7 + $0x810] sm:$0xff] }
 0x20c   :  { %v1055_v3 = vsub.f32 %v654_v41, %v7076_v9  ;;  %v662_v41 = vld [vmem:[#allocation4 + $0x608] sm:$0xff]  ;;  %v7084_v9 = vld [vmem:[#allocation7 + $0x608] sm:$0xff] }
 0x20d   :  { %v1920_v53 = vadd.f32 %v1919_v17, %v1520_v43  ;;  %v2659_v4 = vadd.f32 %v2658_v54, %v2259_v35  ;;  %v1528_v43 = vmul.f32 %v319_v58, %v319_v58  ;;  %v2267_v35 = vmul.f32 %v1048_v28, %v1048_v28  ;;  %v327_v58 = vld [vmem:[#allocation7 + $0x818] sm:$0xff] }
 0x20e   :  { %v1056_v28 = vsub.f32 %v655_v11, %v7077_v47  ;;  %v663_v11 = vld [vmem:[#allocation4 + $0x610] sm:$0xff]  ;;  %v7085_v47 = vld [vmem:[#allocation7 + $0x610] sm:$0xff] }
 0x20f   :  { %v1921_v37 = vadd.f32 %v1920_v53, %v1521_v12  ;;  %v2660_v46 = vadd.f32 %v2659_v4, %v2260_v56  ;;  %v1529_v12 = vmul.f32 %v320_v40, %v320_v40  ;;  %v2268_v56 = vmul.f32 %v1049_v50, %v1049_v50  ;;  %v328_v40 = vld [vmem:[#allocation7 + $0x820] sm:$0xff] }
 0x210   :  { %v1057_v50 = vsub.f32 %v656_v19, %v7078_v32  ;;  %v664_v19 = vld [vmem:[#allocation4 + $0x618] sm:$0xff]  ;;  %v7086_v32 = vld [vmem:[#allocation7 + $0x618] sm:$0xff] }
 0x211   :  { %v1922_v23 = vadd.f32 %v1921_v37, %v1522_v16  ;;  %v2661_v44 = vadd.f32 %v2660_v46, %v2261_v63  ;;  %v1530_v16 = vmul.f32 %v321_v36, %v321_v36  ;;  %v2269_v63 = vmul.f32 %v1050_v52, %v1050_v52  ;;  %v329_v36 = vld [vmem:[#allocation7 + $0x828] sm:$0xff] }
 0x212   :  { %v1058_v52 = vsub.f32 %v657_v7, %v7079_v60  ;;  %v665_v7 = vld [vmem:[#allocation4 + $0x620] sm:$0xff]  ;;  %v7087_v60 = vld [vmem:[#allocation7 + $0x620] sm:$0xff] }
 0x213   :  { %v1923_v51 = vadd.f32 %v1922_v23, %v1523_v21  ;;  %v2662_v29 = vadd.f32 %v2661_v44, %v2262_v10  ;;  %v1531_v21 = vmul.f32 %v322_v20, %v322_v20  ;;  %v2270_v10 = vmul.f32 %v1051_v49, %v1051_v49  ;;  %v330_v20 = vld [vmem:[#allocation7 + $0x830] sm:$0xff] }
 0x214   :  { %v1059_v49 = vsub.f32 %v658_v48, %v7080_v57  ;;  %v666_v48 = vld [vmem:[#allocation4 + $0x628] sm:$0xff]  ;;  %v7088_v57 = vld [vmem:[#allocation7 + $0x628] sm:$0xff] }
 0x215   :  { %v1924_v13 = vadd.f32 %v1923_v51, %v1524_v25  ;;  %v2663_v2 = vadd.f32 %v2662_v29, %v2263_v18  ;;  %v1532_v25 = vmul.f32 %v323_v61, %v323_v61  ;;  %v2271_v18 = vmul.f32 %v1052_v8, %v1052_v8  ;;  %v331_v61 = vld [vmem:[#allocation7 + $0x838] sm:$0xff] }
 0x216   :  { %v1060_v8 = vsub.f32 %v659_v5, %v7081_v38  ;;  %v667_v5 = vld [vmem:[#allocation4 + $0x630] sm:$0xff]  ;;  %v7089_v38 = vld [vmem:[#allocation7 + $0x630] sm:$0xff] }
 0x217   :  { %v1925_v14 = vadd.f32 %v1924_v13, %v1525_v30  ;;  %v2664_v33 = vadd.f32 %v2663_v2, %v2264_v24  ;;  %v1533_v30 = vmul.f32 %v324_v59, %v324_v59  ;;  %v2272_v24 = vmul.f32 %v1053_v45, %v1053_v45  ;;  %v332_v59 = vld [vmem:[#allocation7 + $0x840] sm:$0xff] }
 0x218   :  { %v1061_v45 = vsub.f32 %v660_v31, %v7082_v42  ;;  %v668_v31 = vld [vmem:[#allocation4 + $0x638] sm:$0xff]  ;;  %v7090_v42 = vld [vmem:[#allocation7 + $0x638] sm:$0xff] }
 0x219   :  { %v1926_v0 = vadd.f32 %v1925_v14, %v1526_v34  ;;  %v2665_v22 = vadd.f32 %v2664_v33, %v2265_v1  ;;  %v1534_v34 = vmul.f32 %v325_v55, %v325_v55  ;;  %v2273_v1 = vmul.f32 %v1054_v26, %v1054_v26  ;;  %v333_v55 = vld [vmem:[#allocation7 + $0x848] sm:$0xff] }
 0x21a   :  { %v1062_v26 = vsub.f32 %v661_v27, %v7083_v62  ;;  %v669_v27 = vld [vmem:[#allocation4 + $0x640] sm:$0xff]  ;;  %v7091_v62 = vld [vmem:[#allocation7 + $0x640] sm:$0xff] }
 0x21b   :  { %v1927_v17 = vadd.f32 %v1926_v0, %v1527_v39  ;;  %v2666_v54 = vadd.f32 %v2665_v22, %v2266_v6  ;;  %v1535_v39 = vmul.f32 %v326_v15, %v326_v15  ;;  %v2274_v6 = vmul.f32 %v1055_v3, %v1055_v3  ;;  %v334_v15 = vld [vmem:[#allocation7 + $0x850] sm:$0xff] }
 0x21c   :  { %v1063_v3 = vsub.f32 %v662_v41, %v7084_v9  ;;  %v670_v41 = vld [vmem:[#allocation4 + $0x648] sm:$0xff]  ;;  %v7092_v9 = vld [vmem:[#allocation7 + $0x648] sm:$0xff] }
 0x21d   :  { %v1928_v53 = vadd.f32 %v1927_v17, %v1528_v43  ;;  %v2667_v4 = vadd.f32 %v2666_v54, %v2267_v35  ;;  %v1536_v43 = vmul.f32 %v327_v58, %v327_v58  ;;  %v2275_v35 = vmul.f32 %v1056_v28, %v1056_v28  ;;  %v335_v58 = vld [vmem:[#allocation7 + $0x858] sm:$0xff] }
 0x21e   :  { %v1064_v28 = vsub.f32 %v663_v11, %v7085_v47  ;;  %v671_v11 = vld [vmem:[#allocation4 + $0x650] sm:$0xff]  ;;  %v7093_v47 = vld [vmem:[#allocation7 + $0x650] sm:$0xff] }
 0x21f   :  { %v1929_v37 = vadd.f32 %v1928_v53, %v1529_v12  ;;  %v2668_v46 = vadd.f32 %v2667_v4, %v2268_v56  ;;  %v1537_v12 = vmul.f32 %v328_v40, %v328_v40  ;;  %v2276_v56 = vmul.f32 %v1057_v50, %v1057_v50  ;;  %v7725_v40 = vld [vmem:[#allocation7 + $0x860] sm:$0xff] }
 0x220   :  { %v1065_v50 = vsub.f32 %v664_v19, %v7086_v32  ;;  %v672_v19 = vld [vmem:[#allocation4 + $0x658] sm:$0xff]  ;;  %v344_v32 = vld [vmem:[#allocation7 + $0x8a0] sm:$0xff] }
 0x221   :  { %v1930_v23 = vadd.f32 %v1929_v37, %v1530_v16  ;;  %v2669_v44 = vadd.f32 %v2668_v46, %v2269_v63  ;;  %v1538_v16 = vmul.f32 %v329_v36, %v329_v36  ;;  %v2277_v63 = vmul.f32 %v1058_v52, %v1058_v52  ;;  %v337_v36 = vld [vmem:[#allocation7 + $0x868] sm:$0xff] }
 0x222   :  { %v1066_v52 = vsub.f32 %v665_v7, %v7087_v60  ;;  %v673_v7 = vld [vmem:[#allocation4 + $0x660] sm:$0xff]  ;;  %v345_v60 = vld [vmem:[#allocation7 + $0x8a8] sm:$0xff] }
 0x223   :  { %v1931_v51 = vadd.f32 %v1930_v23, %v1531_v21  ;;  %v2670_v29 = vadd.f32 %v2669_v44, %v2270_v10  ;;  %v1539_v21 = vmul.f32 %v330_v20, %v330_v20  ;;  %v2278_v10 = vmul.f32 %v1059_v49, %v1059_v49  ;;  %v338_v20 = vld [vmem:[#allocation7 + $0x870] sm:$0xff] }
 0x224   :  { %v1067_v49 = vsub.f32 %v666_v48, %v7088_v57  ;;  %v346_v57 = vld [vmem:[#allocation7 + $0x8b0] sm:$0xff] }
 0x225   :  { %v1932_v13 = vadd.f32 %v1931_v51, %v1532_v25  ;;  %v2671_v2 = vadd.f32 %v2670_v29, %v2271_v18  ;;  %v1540_v25 = vmul.f32 %v331_v61, %v331_v61  ;;  %v2279_v18 = vmul.f32 %v1060_v8, %v1060_v8  ;;  %v339_v61 = vld [vmem:[#allocation7 + $0x878] sm:$0xff] }
 0x226   :  { %v1068_v8 = vsub.f32 %v667_v5, %v7089_v38  ;;  %v347_v38 = vld [vmem:[#allocation7 + $0x8b8] sm:$0xff] }
 0x227   :  { %v1933_v14 = vadd.f32 %v1932_v13, %v1533_v30  ;;  %v2672_v33 = vadd.f32 %v2671_v2, %v2272_v24  ;;  %v1541_v30 = vmul.f32 %v332_v59, %v332_v59  ;;  %v2280_v24 = vmul.f32 %v1061_v45, %v1061_v45  ;;  %v340_v59 = vld [vmem:[#allocation7 + $0x880] sm:$0xff] }
 0x228   :  { %v1069_v45 = vsub.f32 %v668_v31, %v7090_v42  ;;  %v348_v42 = vld [vmem:[#allocation7 + $0x8c0] sm:$0xff] }
 0x229   :  { %v1934_v0 = vadd.f32 %v1933_v14, %v1534_v34  ;;  %v2673_v22 = vadd.f32 %v2672_v33, %v2273_v1  ;;  %v1542_v34 = vmul.f32 %v333_v55, %v333_v55  ;;  %v2281_v1 = vmul.f32 %v1062_v26, %v1062_v26  ;;  %v341_v55 = vld [vmem:[#allocation7 + $0x888] sm:$0xff] }
 0x22a   :  { %v1070_v26 = vsub.f32 %v669_v27, %v7091_v62  ;;  %v349_v62 = vld [vmem:[#allocation7 + $0x8c8] sm:$0xff] }
 0x22b   :  { %v1935_v17 = vadd.f32 %v1934_v0, %v1535_v39  ;;  %v2674_v54 = vadd.f32 %v2673_v22, %v2274_v6  ;;  %v1543_v39 = vmul.f32 %v334_v15, %v334_v15  ;;  %v2282_v6 = vmul.f32 %v1063_v3, %v1063_v3  ;;  %v342_v15 = vld [vmem:[#allocation7 + $0x890] sm:$0xff] }
 0x22c   :  { %v1071_v3 = vsub.f32 %v670_v41, %v7092_v9  ;;  %v350_v9 = vld [vmem:[#allocation7 + $0x8d0] sm:$0xff] }
 0x22d   :  { %v1936_v53 = vadd.f32 %v1935_v17, %v1536_v43  ;;  %v2675_v4 = vadd.f32 %v2674_v54, %v2275_v35  ;;  %v1544_v43 = vmul.f32 %v335_v58, %v335_v58  ;;  %v2283_v35 = vmul.f32 %v1064_v28, %v1064_v28  ;;  %v343_v58 = vld [vmem:[#allocation7 + $0x898] sm:$0xff] }
 0x22e   :  { %v1072_v28 = vsub.f32 %v671_v11, %v7093_v47  ;;  %v351_v47 = vld [vmem:[#allocation7 + $0x8d8] sm:$0xff] }
 0x22f   :  { %v1937_v37 = vadd.f32 %v1936_v53, %v1537_v12  ;;  %v2676_v46 = vadd.f32 %v2675_v4, %v2276_v56  ;;  %v1545_v12 = vmul.f32 %v7725_v40, %v7725_v40  ;;  %v2284_v56 = vmul.f32 %v1065_v50, %v1065_v50  ;;  %v7094_v50 = vld [vmem:[#allocation7 + $0x658] sm:$0xff] }
 0x230   :  { %v1073_v48 = vsub.f32 %v672_v19, %v7094_v50  ;;  %v352_v50 = vld [vmem:[#allocation7 + $0x8e0] sm:$0xff] }
 0x231   :  { %v1938_v23 = vadd.f32 %v1937_v37, %v1538_v16  ;;  %v2677_v44 = vadd.f32 %v2676_v46, %v2277_v63  ;;  %v1546_v16 = vmul.f32 %v337_v36, %v337_v36  ;;  %v2285_v63 = vmul.f32 %v1066_v52, %v1066_v52  ;;  %v7095_v52 = vld [vmem:[#allocation7 + $0x660] sm:$0xff] }
 0x232   :  { %v1074_v5 = vsub.f32 %v673_v7, %v7095_v52  ;;  %v353_v52 = vld [vmem:[#allocation7 + $0x8e8] sm:$0xff] }
 0x233   :  { %v1939_v51 = vadd.f32 %v1938_v23, %v1539_v21  ;;  %v2678_v29 = vadd.f32 %v2677_v44, %v2278_v10  ;;  %v1547_v21 = vmul.f32 %v338_v20, %v338_v20  ;;  %v2286_v10 = vmul.f32 %v1067_v49, %v1067_v49  ;;  %v7096_v49 = vld [vmem:[#allocation7 + $0x668] sm:$0xff] }
 0x235   :  { %v1940_v13 = vadd.f32 %v1939_v51, %v1540_v25  ;;  %v2679_v2 = vadd.f32 %v2678_v29, %v2279_v18  ;;  %v1548_v25 = vmul.f32 %v339_v61, %v339_v61  ;;  %v2287_v18 = vmul.f32 %v1068_v8, %v1068_v8  ;;  %v7097_v8 = vld [vmem:[#allocation7 + $0x670] sm:$0xff] }
 0x237   :  { %v1941_v14 = vadd.f32 %v1940_v13, %v1541_v30  ;;  %v2680_v33 = vadd.f32 %v2679_v2, %v2280_v24  ;;  %v1549_v30 = vmul.f32 %v340_v59, %v340_v59  ;;  %v2288_v24 = vmul.f32 %v1069_v45, %v1069_v45  ;;  %v7098_v45 = vld [vmem:[#allocation7 + $0x678] sm:$0xff] }
 0x239   :  { %v1942_v0 = vadd.f32 %v1941_v14, %v1542_v34  ;;  %v2681_v22 = vadd.f32 %v2680_v33, %v2281_v1  ;;  %v1550_v34 = vmul.f32 %v341_v55, %v341_v55  ;;  %v2289_v1 = vmul.f32 %v1070_v26, %v1070_v26  ;;  %v7099_v26 = vld [vmem:[#allocation7 + $0x680] sm:$0xff] }
 0x23a   :  { %v2290_v33 = vmul.f32 %v1071_v3, %v1071_v3  ;;  %v7100_v3 = vld [vmem:[#allocation7 + $0x688] sm:$0xff] }
 0x23b   :  { %v1943_v17 = vadd.f32 %v1942_v0, %v1543_v39  ;;  %v2682_v54 = vadd.f32 %v2681_v22, %v2282_v6  ;;  %v1551_v39 = vmul.f32 %v342_v15, %v342_v15  ;;  %v2291_v22 = vmul.f32 %v1072_v28, %v1072_v28  ;;  %v7101_v28 = vld [vmem:[#allocation7 + $0x690] sm:$0xff] }
 0x23d   :  { %v1944_v53 = vadd.f32 %v1943_v17, %v1544_v43  ;;  %v2683_v4 = vadd.f32 %v2682_v54, %v2283_v35  ;;  %v1552_v43 = vmul.f32 %v343_v58, %v343_v58  ;;  %v1553_v17 = vmul.f32 %v344_v32, %v344_v32 }
 0x23e   :  { %v2292_v54 = vmul.f32 %v1073_v48, %v1073_v48  ;;  %v7102_v48 = vld [vmem:[#allocation7 + $0x698] sm:$0xff] }
 0x23f   :  { %v1945_v37 = vadd.f32 %v1944_v53, %v1545_v12  ;;  %v2684_v46 = vadd.f32 %v2683_v4, %v2284_v56  ;;  %v674_v12 = vld [vmem:[#allocation4 + $0x668] sm:$0xff]  ;;  %v1554_v53 = vmul.f32 %v345_v60, %v345_v60  ;;  %v2293_v4 = vmul.f32 %v1074_v5, %v1074_v5 }
 0x240   :  { %v1075_v31 = vsub.f32 %v674_v12, %v7096_v49  ;;  %v7103_v5 = vld [vmem:[#allocation7 + $0x6a0] sm:$0xff]  ;;  %v354_v49 = vld [vmem:[#allocation7 + $0x8f0] sm:$0xff] }
 0x241   :  { %v1946_v23 = vadd.f32 %v1945_v37, %v1546_v16  ;;  %v2685_v44 = vadd.f32 %v2684_v46, %v2285_v63  ;;  %v675_v16 = vld [vmem:[#allocation4 + $0x670] sm:$0xff]  ;;  %v1555_v37 = vmul.f32 %v346_v57, %v346_v57 }
 0x242   :  { %v1076_v27 = vsub.f32 %v675_v16, %v7097_v8  ;;  %v2294_v46 = vmul.f32 %v1075_v31, %v1075_v31  ;;  %v7104_v31 = vld [vmem:[#allocation7 + $0x6a8] sm:$0xff]  ;;  %v355_v8 = vld [vmem:[#allocation7 + $0x8f8] sm:$0xff] }
 0x243   :  { %v1947_v51 = vadd.f32 %v1946_v23, %v1547_v21  ;;  %v2686_v29 = vadd.f32 %v2685_v44, %v2286_v10  ;;  %v676_v21 = vld [vmem:[#allocation4 + $0x678] sm:$0xff]  ;;  %v1556_v23 = vmul.f32 %v347_v38, %v347_v38 }
 0x244   :  { %v1077_v41 = vsub.f32 %v676_v21, %v7098_v45  ;;  %v2295_v44 = vmul.f32 %v1076_v27, %v1076_v27  ;;  %v7105_v27 = vld [vmem:[#allocation7 + $0x6b0] sm:$0xff]  ;;  %v356_v45 = vld [vmem:[#allocation7 + $0x900] sm:$0xff] }
 0x245   :  { %v1948_v13 = vadd.f32 %v1947_v51, %v1548_v25  ;;  %v2687_v2 = vadd.f32 %v2686_v29, %v2287_v18  ;;  %v677_v25 = vld [vmem:[#allocation4 + $0x680] sm:$0xff]  ;;  %v1557_v51 = vmul.f32 %v348_v42, %v348_v42 }
 0x246   :  { %v1078_v11 = vsub.f32 %v677_v25, %v7099_v26  ;;  %v2296_v29 = vmul.f32 %v1077_v41, %v1077_v41  ;;  %v7106_v41 = vld [vmem:[#allocation7 + $0x6b8] sm:$0xff]  ;;  %v357_v26 = vld [vmem:[#allocation7 + $0x908] sm:$0xff] }
 0x247   :  { %v1949_v14 = vadd.f32 %v1948_v13, %v1549_v30  ;;  %v2688_v36 = vadd.f32 %v2687_v2, %v2288_v24  ;;  %v678_v30 = vld [vmem:[#allocation4 + $0x688] sm:$0xff]  ;;  %v1558_v13 = vmul.f32 %v349_v62, %v349_v62 }
 0x248   :  { %v1079_v19 = vsub.f32 %v678_v30, %v7100_v3  ;;  %v2297_v2 = vmul.f32 %v1078_v11, %v1078_v11  ;;  %v7107_v11 = vld [vmem:[#allocation7 + $0x6c0] sm:$0xff]  ;;  %v358_v3 = vld [vmem:[#allocation7 + $0x910] sm:$0xff] }
 0x249   :  { %v1950_v0 = vadd.f32 %v1949_v14, %v1550_v34  ;;  %v2689_v20 = vadd.f32 %v2688_v36, %v2289_v1  ;;  %v679_v34 = vld [vmem:[#allocation4 + $0x690] sm:$0xff]  ;;  %v1559_v14 = vmul.f32 %v350_v9, %v350_v9 }
 0x24a   :  { %v1080_v7 = vsub.f32 %v679_v34, %v7101_v28  ;;  %v2298_v36 = vmul.f32 %v1079_v19, %v1079_v19  ;;  %v7108_v19 = vld [vmem:[#allocation7 + $0x6c8] sm:$0xff]  ;;  %v359_v28 = vld [vmem:[#allocation7 + $0x918] sm:$0xff] }
 0x24b   :  { %v1951_v6 = vadd.f32 %v1950_v0, %v1551_v39  ;;  %v2690_v61 = vadd.f32 %v2689_v20, %v2290_v33  ;;  %v680_v39 = vld [vmem:[#allocation4 + $0x698] sm:$0xff]  ;;  %v1560_v0 = vmul.f32 %v351_v47, %v351_v47 }
 0x24c   :  { %v1081_v12 = vsub.f32 %v680_v39, %v7102_v48  ;;  %v2299_v20 = vmul.f32 %v1080_v7, %v1080_v7  ;;  %v7109_v7 = vld [vmem:[#allocation7 + $0x6d0] sm:$0xff]  ;;  %v360_v48 = vld [vmem:[#allocation7 + $0x920] sm:$0xff] }
 0x24d   :  { %v1952_v35 = vadd.f32 %v1951_v6, %v1552_v43  ;;  %v2691_v59 = vadd.f32 %v2690_v61, %v2291_v22  ;;  %v681_v43 = vld [vmem:[#allocation4 + $0x6a0] sm:$0xff]  ;;  %v1561_v6 = vmul.f32 %v352_v50, %v352_v50 }
 0x24e   :  { %v1082_v16 = vsub.f32 %v681_v43, %v7103_v5  ;;  %v2300_v61 = vmul.f32 %v1081_v12, %v1081_v12  ;;  %v7110_v12 = vld [vmem:[#allocation7 + $0x6d8] sm:$0xff]  ;;  %v361_v5 = vld [vmem:[#allocation7 + $0x928] sm:$0xff] }
 0x24f   :  { %v1953_v56 = vadd.f32 %v1952_v35, %v1553_v17  ;;  %v2692_v55 = vadd.f32 %v2691_v59, %v2292_v54  ;;  %v682_v17 = vld [vmem:[#allocation4 + $0x6a8] sm:$0xff]  ;;  %v1562_v35 = vmul.f32 %v353_v52, %v353_v52 }
 0x250   :  { %v1083_v21 = vsub.f32 %v682_v17, %v7104_v31  ;;  %v2301_v59 = vmul.f32 %v1082_v16, %v1082_v16  ;;  %v7111_v16 = vld [vmem:[#allocation7 + $0x6e0] sm:$0xff]  ;;  %v362_v31 = vld [vmem:[#allocation7 + $0x930] sm:$0xff] }
 0x251   :  { %v1954_v63 = vadd.f32 %v1953_v56, %v1554_v53  ;;  %v2693_v15 = vadd.f32 %v2692_v55, %v2293_v4  ;;  %v683_v53 = vld [vmem:[#allocation4 + $0x6b0] sm:$0xff]  ;;  %v1563_v56 = vmul.f32 %v354_v49, %v354_v49 }
 0x252   :  { %v1084_v25 = vsub.f32 %v683_v53, %v7105_v27  ;;  %v2302_v55 = vmul.f32 %v1083_v21, %v1083_v21  ;;  %v7112_v21 = vld [vmem:[#allocation7 + $0x6e8] sm:$0xff]  ;;  %v363_v27 = vld [vmem:[#allocation7 + $0x938] sm:$0xff] }
 0x253   :  { %v1955_v10 = vadd.f32 %v1954_v63, %v1555_v37  ;;  %v2694_v58 = vadd.f32 %v2693_v15, %v2294_v46  ;;  %v684_v37 = vld [vmem:[#allocation4 + $0x6b8] sm:$0xff]  ;;  %v1564_v63 = vmul.f32 %v355_v8, %v355_v8 }
 0x254   :  { %v1085_v30 = vsub.f32 %v684_v37, %v7106_v41  ;;  %v2303_v15 = vmul.f32 %v1084_v25, %v1084_v25  ;;  %v7113_v25 = vld [vmem:[#allocation7 + $0x6f0] sm:$0xff]  ;;  %v364_v41 = vld [vmem:[#allocation7 + $0x940] sm:$0xff] }
 0x255   :  { %v1956_v18 = vadd.f32 %v1955_v10, %v1556_v23  ;;  %v2695_v32 = vadd.f32 %v2694_v58, %v2295_v44  ;;  %v685_v23 = vld [vmem:[#allocation4 + $0x6c0] sm:$0xff]  ;;  %v1565_v10 = vmul.f32 %v356_v45, %v356_v45 }
 0x256   :  { %v1086_v34 = vsub.f32 %v685_v23, %v7107_v11  ;;  %v2304_v58 = vmul.f32 %v1085_v30, %v1085_v30  ;;  %v7114_v30 = vld [vmem:[#allocation7 + $0x6f8] sm:$0xff]  ;;  %v365_v11 = vld [vmem:[#allocation7 + $0x948] sm:$0xff] }
 0x257   :  { %v1957_v24 = vadd.f32 %v1956_v18, %v1557_v51  ;;  %v2696_v60 = vadd.f32 %v2695_v32, %v2296_v29  ;;  %v686_v51 = vld [vmem:[#allocation4 + $0x6c8] sm:$0xff]  ;;  %v1566_v18 = vmul.f32 %v357_v26, %v357_v26 }
 0x258   :  { %v1087_v39 = vsub.f32 %v686_v51, %v7108_v19  ;;  %v2305_v32 = vmul.f32 %v1086_v34, %v1086_v34  ;;  %v7115_v34 = vld [vmem:[#allocation7 + $0x700] sm:$0xff]  ;;  %v366_v19 = vld [vmem:[#allocation7 + $0x950] sm:$0xff] }
 0x259   :  { %v1958_v1 = vadd.f32 %v1957_v24, %v1558_v13  ;;  %v2697_v57 = vadd.f32 %v2696_v60, %v2297_v2  ;;  %v687_v13 = vld [vmem:[#allocation4 + $0x6d0] sm:$0xff]  ;;  %v1567_v24 = vmul.f32 %v358_v3, %v358_v3 }
 0x25a   :  { %v1088_v43 = vsub.f32 %v687_v13, %v7109_v7  ;;  %v2306_v60 = vmul.f32 %v1087_v39, %v1087_v39  ;;  %v7116_v39 = vld [vmem:[#allocation7 + $0x708] sm:$0xff]  ;;  %v367_v7 = vld [vmem:[#allocation7 + $0x958] sm:$0xff] }
 0x25b   :  { %v1959_v33 = vadd.f32 %v1958_v1, %v1559_v14  ;;  %v2698_v38 = vadd.f32 %v2697_v57, %v2298_v36  ;;  %v688_v14 = vld [vmem:[#allocation4 + $0x6d8] sm:$0xff]  ;;  %v1568_v1 = vmul.f32 %v359_v28, %v359_v28 }
 0x25c   :  { %v1089_v17 = vsub.f32 %v688_v14, %v7110_v12  ;;  %v2307_v57 = vmul.f32 %v1088_v43, %v1088_v43  ;;  %v7117_v43 = vld [vmem:[#allocation7 + $0x710] sm:$0xff]  ;;  %v368_v12 = vld [vmem:[#allocation7 + $0x960] sm:$0xff] }
 0x25d   :  { %v1960_v22 = vadd.f32 %v1959_v33, %v1560_v0  ;;  %v2699_v42 = vadd.f32 %v2698_v38, %v2299_v20  ;;  %v689_v0 = vld [vmem:[#allocation4 + $0x6e0] sm:$0xff]  ;;  %v1569_v33 = vmul.f32 %v360_v48, %v360_v48 }
 0x25e   :  { %v1090_v53 = vsub.f32 %v689_v0, %v7111_v16  ;;  %v2308_v38 = vmul.f32 %v1089_v17, %v1089_v17  ;;  %v7118_v17 = vld [vmem:[#allocation7 + $0x718] sm:$0xff]  ;;  %v369_v16 = vld [vmem:[#allocation7 + $0x968] sm:$0xff] }
 0x25f   :  { %v1961_v54 = vadd.f32 %v1960_v22, %v1561_v6  ;;  %v2700_v62 = vadd.f32 %v2699_v42, %v2300_v61  ;;  %v690_v6 = vld [vmem:[#allocation4 + $0x6e8] sm:$0xff]  ;;  %v1570_v22 = vmul.f32 %v361_v5, %v361_v5 }
 0x260   :  { %v1091_v37 = vsub.f32 %v690_v6, %v7112_v21  ;;  %v2309_v42 = vmul.f32 %v1090_v53, %v1090_v53  ;;  %v7119_v53 = vld [vmem:[#allocation7 + $0x720] sm:$0xff]  ;;  %v370_v21 = vld [vmem:[#allocation7 + $0x970] sm:$0xff] }
 0x261   :  { %v1962_v4 = vadd.f32 %v1961_v54, %v1562_v35  ;;  %v2701_v9 = vadd.f32 %v2700_v62, %v2301_v59  ;;  %v691_v35 = vld [vmem:[#allocation4 + $0x6f0] sm:$0xff]  ;;  %v1571_v54 = vmul.f32 %v362_v31, %v362_v31 }
 0x262   :  { %v1092_v23 = vsub.f32 %v691_v35, %v7113_v25  ;;  %v2310_v62 = vmul.f32 %v1091_v37, %v1091_v37  ;;  %v7120_v37 = vld [vmem:[#allocation7 + $0x728] sm:$0xff]  ;;  %v371_v25 = vld [vmem:[#allocation7 + $0x978] sm:$0xff] }
 0x263   :  { %v1963_v46 = vadd.f32 %v1962_v4, %v1563_v56  ;;  %v2702_v47 = vadd.f32 %v2701_v9, %v2302_v55  ;;  %v692_v56 = vld [vmem:[#allocation4 + $0x6f8] sm:$0xff]  ;;  %v1572_v4 = vmul.f32 %v363_v27, %v363_v27 }
 0x264   :  { %v1093_v51 = vsub.f32 %v692_v56, %v7114_v30  ;;  %v2311_v9 = vmul.f32 %v1092_v23, %v1092_v23  ;;  %v7121_v23 = vld [vmem:[#allocation7 + $0x730] sm:$0xff]  ;;  %v372_v30 = vld [vmem:[#allocation7 + $0x980] sm:$0xff] }
 0x265   :  { %v1964_v44 = vadd.f32 %v1963_v46, %v1564_v63  ;;  %v2703_v50 = vadd.f32 %v2702_v47, %v2303_v15  ;;  %v693_v63 = vld [vmem:[#allocation4 + $0x700] sm:$0xff]  ;;  %v1573_v46 = vmul.f32 %v364_v41, %v364_v41 }
 0x266   :  { %v1094_v13 = vsub.f32 %v693_v63, %v7115_v34  ;;  %v2312_v47 = vmul.f32 %v1093_v51, %v1093_v51  ;;  %v7122_v51 = vld [vmem:[#allocation7 + $0x738] sm:$0xff]  ;;  %v373_v34 = vld [vmem:[#allocation7 + $0x988] sm:$0xff] }
 0x267   :  { %v1965_v29 = vadd.f32 %v1964_v44, %v1565_v10  ;;  %v2704_v52 = vadd.f32 %v2703_v50, %v2304_v58  ;;  %v694_v10 = vld [vmem:[#allocation4 + $0x708] sm:$0xff]  ;;  %v1574_v44 = vmul.f32 %v365_v11, %v365_v11 }
 0x268   :  { %v1095_v14 = vsub.f32 %v694_v10, %v7116_v39  ;;  %v2313_v50 = vmul.f32 %v1094_v13, %v1094_v13  ;;  %v7123_v13 = vld [vmem:[#allocation7 + $0x740] sm:$0xff]  ;;  %v374_v39 = vld [vmem:[#allocation7 + $0x990] sm:$0xff] }
 0x269   :  { %v1966_v2 = vadd.f32 %v1965_v29, %v1566_v18  ;;  %v2705_v49 = vadd.f32 %v2704_v52, %v2305_v32  ;;  %v695_v18 = vld [vmem:[#allocation4 + $0x710] sm:$0xff]  ;;  %v1575_v29 = vmul.f32 %v366_v19, %v366_v19 }
 0x26a   :  { %v1096_v0 = vsub.f32 %v695_v18, %v7117_v43  ;;  %v2314_v52 = vmul.f32 %v1095_v14, %v1095_v14  ;;  %v7124_v14 = vld [vmem:[#allocation7 + $0x748] sm:$0xff]  ;;  %v375_v43 = vld [vmem:[#allocation7 + $0x998] sm:$0xff] }
 0x26b   :  { %v1967_v36 = vadd.f32 %v1966_v2, %v1567_v24  ;;  %v2706_v8 = vadd.f32 %v2705_v49, %v2306_v60  ;;  %v696_v24 = vld [vmem:[#allocation4 + $0x718] sm:$0xff]  ;;  %v1576_v2 = vmul.f32 %v367_v7, %v367_v7 }
 0x26c   :  { %v1097_v6 = vsub.f32 %v696_v24, %v7118_v17  ;;  %v2315_v49 = vmul.f32 %v1096_v0, %v1096_v0  ;;  %v7125_v0 = vld [vmem:[#allocation7 + $0x750] sm:$0xff]  ;;  %v376_v17 = vld [vmem:[#allocation7 + $0x9a0] sm:$0xff] }
 0x26d   :  { %v1968_v20 = vadd.f32 %v1967_v36, %v1568_v1  ;;  %v2707_v45 = vadd.f32 %v2706_v8, %v2307_v57  ;;  %v697_v1 = vld [vmem:[#allocation4 + $0x720] sm:$0xff]  ;;  %v1577_v36 = vmul.f32 %v368_v12, %v368_v12 }
 0x26e   :  { %v1098_v35 = vsub.f32 %v697_v1, %v7119_v53  ;;  %v2316_v8 = vmul.f32 %v1097_v6, %v1097_v6  ;;  %v7126_v6 = vld [vmem:[#allocation7 + $0x758] sm:$0xff]  ;;  %v377_v53 = vld [vmem:[#allocation7 + $0x9a8] sm:$0xff] }
 0x26f   :  { %v1969_v61 = vadd.f32 %v1968_v20, %v1569_v33  ;;  %v2708_v26 = vadd.f32 %v2707_v45, %v2308_v38  ;;  %v698_v33 = vld [vmem:[#allocation4 + $0x728] sm:$0xff]  ;;  %v1578_v20 = vmul.f32 %v369_v16, %v369_v16 }
 0x270   :  { %v1099_v56 = vsub.f32 %v698_v33, %v7120_v37  ;;  %v2317_v45 = vmul.f32 %v1098_v35, %v1098_v35  ;;  %v7127_v35 = vld [vmem:[#allocation7 + $0x760] sm:$0xff]  ;;  %v378_v37 = vld [vmem:[#allocation7 + $0x9b0] sm:$0xff] }
 0x271   :  { %v1970_v59 = vadd.f32 %v1969_v61, %v1570_v22  ;;  %v2709_v3 = vadd.f32 %v2708_v26, %v2309_v42  ;;  %v699_v22 = vld [vmem:[#allocation4 + $0x730] sm:$0xff]  ;;  %v1579_v61 = vmul.f32 %v370_v21, %v370_v21 }
 0x272   :  { %v1100_v63 = vsub.f32 %v699_v22, %v7121_v23  ;;  %v2318_v26 = vmul.f32 %v1099_v56, %v1099_v56  ;;  %v7128_v56 = vld [vmem:[#allocation7 + $0x768] sm:$0xff]  ;;  %v379_v23 = vld [vmem:[#allocation7 + $0x9b8] sm:$0xff] }
 0x273   :  { %v1971_v55 = vadd.f32 %v1970_v59, %v1571_v54  ;;  %v2710_v28 = vadd.f32 %v2709_v3, %v2310_v62  ;;  %v700_v54 = vld [vmem:[#allocation4 + $0x738] sm:$0xff]  ;;  %v1580_v59 = vmul.f32 %v371_v25, %v371_v25 }
 0x274   :  { %v1101_v10 = vsub.f32 %v700_v54, %v7122_v51  ;;  %v2319_v3 = vmul.f32 %v1100_v63, %v1100_v63  ;;  %v7129_v63 = vld [vmem:[#allocation7 + $0x770] sm:$0xff]  ;;  %v380_v51 = vld [vmem:[#allocation7 + $0x9c0] sm:$0xff] }
 0x275   :  { %v1972_v15 = vadd.f32 %v1971_v55, %v1572_v4  ;;  %v2711_v48 = vadd.f32 %v2710_v28, %v2311_v9  ;;  %v701_v4 = vld [vmem:[#allocation4 + $0x740] sm:$0xff]  ;;  %v1581_v55 = vmul.f32 %v372_v30, %v372_v30 }
 0x276   :  { %v1102_v18 = vsub.f32 %v701_v4, %v7123_v13  ;;  %v2320_v28 = vmul.f32 %v1101_v10, %v1101_v10  ;;  %v7130_v10 = vld [vmem:[#allocation7 + $0x778] sm:$0xff]  ;;  %v381_v13 = vld [vmem:[#allocation7 + $0x9c8] sm:$0xff] }
 0x277   :  { %v1973_v58 = vadd.f32 %v1972_v15, %v1573_v46  ;;  %v2712_v5 = vadd.f32 %v2711_v48, %v2312_v47  ;;  %v702_v46 = vld [vmem:[#allocation4 + $0x748] sm:$0xff]  ;;  %v1582_v15 = vmul.f32 %v373_v34, %v373_v34 }
 0x278   :  { %v1103_v24 = vsub.f32 %v702_v46, %v7124_v14  ;;  %v2321_v48 = vmul.f32 %v1102_v18, %v1102_v18  ;;  %v7131_v18 = vld [vmem:[#allocation7 + $0x780] sm:$0xff]  ;;  %v382_v14 = vld [vmem:[#allocation7 + $0x9d0] sm:$0xff] }
 0x279   :  { %v1974_v32 = vadd.f32 %v1973_v58, %v1574_v44  ;;  %v2713_v31 = vadd.f32 %v2712_v5, %v2313_v50  ;;  %v703_v44 = vld [vmem:[#allocation4 + $0x750] sm:$0xff]  ;;  %v1583_v58 = vmul.f32 %v374_v39, %v374_v39 }
 0x27a   :  { %v1104_v1 = vsub.f32 %v703_v44, %v7125_v0  ;;  %v2322_v5 = vmul.f32 %v1103_v24, %v1103_v24  ;;  %v7132_v24 = vld [vmem:[#allocation7 + $0x788] sm:$0xff]  ;;  %v383_v0 = vld [vmem:[#allocation7 + $0x9d8] sm:$0xff] }
 0x27b   :  { %v1975_v60 = vadd.f32 %v1974_v32, %v1575_v29  ;;  %v2714_v27 = vadd.f32 %v2713_v31, %v2314_v52  ;;  %v704_v29 = vld [vmem:[#allocation4 + $0x758] sm:$0xff]  ;;  %v1584_v32 = vmul.f32 %v375_v43, %v375_v43 }
 0x27c   :  { %v1105_v33 = vsub.f32 %v704_v29, %v7126_v6  ;;  %v2323_v31 = vmul.f32 %v1104_v1, %v1104_v1  ;;  %v7133_v1 = vld [vmem:[#allocation7 + $0x790] sm:$0xff]  ;;  %v384_v6 = vld [vmem:[#allocation7 + $0x9e0] sm:$0xff] }
 0x27d   :  { %v1976_v57 = vadd.f32 %v1975_v60, %v1576_v2  ;;  %v2715_v41 = vadd.f32 %v2714_v27, %v2315_v49  ;;  %v705_v2 = vld [vmem:[#allocation4 + $0x760] sm:$0xff]  ;;  %v1585_v60 = vmul.f32 %v376_v17, %v376_v17 }
 0x27e   :  { %v1106_v22 = vsub.f32 %v705_v2, %v7127_v35  ;;  %v2324_v27 = vmul.f32 %v1105_v33, %v1105_v33  ;;  %v7134_v33 = vld [vmem:[#allocation7 + $0x798] sm:$0xff]  ;;  %v385_v35 = vld [vmem:[#allocation7 + $0x9e8] sm:$0xff] }
 0x27f   :  { %v1977_v38 = vadd.f32 %v1976_v57, %v1577_v36  ;;  %v2716_v11 = vadd.f32 %v2715_v41, %v2316_v8  ;;  %v706_v36 = vld [vmem:[#allocation4 + $0x768] sm:$0xff]  ;;  %v1586_v57 = vmul.f32 %v377_v53, %v377_v53 }
 0x280   :  { %v1107_v54 = vsub.f32 %v706_v36, %v7128_v56  ;;  %v2325_v41 = vmul.f32 %v1106_v22, %v1106_v22  ;;  %v7135_v22 = vld [vmem:[#allocation7 + $0x7a0] sm:$0xff]  ;;  %v386_v56 = vld [vmem:[#allocation7 + $0x9f0] sm:$0xff] }
 0x281   :  { %v1978_v42 = vadd.f32 %v1977_v38, %v1578_v20  ;;  %v2717_v19 = vadd.f32 %v2716_v11, %v2317_v45  ;;  %v707_v20 = vld [vmem:[#allocation4 + $0x770] sm:$0xff]  ;;  %v1587_v38 = vmul.f32 %v378_v37, %v378_v37 }
 0x282   :  { %v1108_v4 = vsub.f32 %v707_v20, %v7129_v63  ;;  %v2326_v11 = vmul.f32 %v1107_v54, %v1107_v54  ;;  %v7136_v54 = vld [vmem:[#allocation7 + $0x7a8] sm:$0xff]  ;;  %v387_v63 = vld [vmem:[#allocation7 + $0x9f8] sm:$0xff] }
 0x283   :  { %v1979_v62 = vadd.f32 %v1978_v42, %v1579_v61  ;;  %v2718_v7 = vadd.f32 %v2717_v19, %v2318_v26  ;;  %v708_v61 = vld [vmem:[#allocation4 + $0x778] sm:$0xff]  ;;  %v1588_v42 = vmul.f32 %v379_v23, %v379_v23 }
 0x284   :  { %v1109_v46 = vsub.f32 %v708_v61, %v7130_v10  ;;  %v2327_v19 = vmul.f32 %v1108_v4, %v1108_v4  ;;  %v7137_v4 = vld [vmem:[#allocation7 + $0x7b0] sm:$0xff]  ;;  %v388_v10 = vld [vmem:[#allocation7 + $0xa00] sm:$0xff] }
 0x285   :  { %v1980_v9 = vadd.f32 %v1979_v62, %v1580_v59  ;;  %v2719_v12 = vadd.f32 %v2718_v7, %v2319_v3  ;;  %v709_v59 = vld [vmem:[#allocation4 + $0x780] sm:$0xff]  ;;  %v1589_v62 = vmul.f32 %v380_v51, %v380_v51 }
 0x286   :  { %v1110_v44 = vsub.f32 %v709_v59, %v7131_v18  ;;  %v2328_v7 = vmul.f32 %v1109_v46, %v1109_v46  ;;  %v7138_v46 = vld [vmem:[#allocation7 + $0x7b8] sm:$0xff]  ;;  %v389_v18 = vld [vmem:[#allocation7 + $0xa08] sm:$0xff] }
 0x287   :  { %v1981_v47 = vadd.f32 %v1980_v9, %v1581_v55  ;;  %v2720_v16 = vadd.f32 %v2719_v12, %v2320_v28  ;;  %v710_v55 = vld [vmem:[#allocation4 + $0x788] sm:$0xff]  ;;  %v1590_v9 = vmul.f32 %v381_v13, %v381_v13 }
 0x288   :  { %v1111_v29 = vsub.f32 %v710_v55, %v7132_v24  ;;  %v2329_v12 = vmul.f32 %v1110_v44, %v1110_v44  ;;  %v7139_v44 = vld [vmem:[#allocation7 + $0x7c0] sm:$0xff]  ;;  %v390_v24 = vld [vmem:[#allocation7 + $0xa10] sm:$0xff] }
 0x289   :  { %v1982_v50 = vadd.f32 %v1981_v47, %v1582_v15  ;;  %v2721_v21 = vadd.f32 %v2720_v16, %v2321_v48  ;;  %v711_v15 = vld [vmem:[#allocation4 + $0x790] sm:$0xff]  ;;  %v1591_v47 = vmul.f32 %v382_v14, %v382_v14 }
 0x28a   :  { %v1112_v2 = vsub.f32 %v711_v15, %v7133_v1  ;;  %v2330_v16 = vmul.f32 %v1111_v29, %v1111_v29  ;;  %v7140_v29 = vld [vmem:[#allocation7 + $0x7c8] sm:$0xff]  ;;  %v391_v1 = vld [vmem:[#allocation7 + $0xa18] sm:$0xff] }
 0x28b   :  { %v1983_v52 = vadd.f32 %v1982_v50, %v1583_v58  ;;  %v2722_v25 = vadd.f32 %v2721_v21, %v2322_v5  ;;  %v712_v58 = vld [vmem:[#allocation4 + $0x798] sm:$0xff]  ;;  %v1592_v50 = vmul.f32 %v383_v0, %v383_v0 }
 0x28c   :  { %v1113_v36 = vsub.f32 %v712_v58, %v7134_v33  ;;  %v2331_v21 = vmul.f32 %v1112_v2, %v1112_v2  ;;  %v7141_v2 = vld [vmem:[#allocation7 + $0x7d0] sm:$0xff]  ;;  %v392_v33 = vld [vmem:[#allocation7 + $0xa20] sm:$0xff] }
 0x28d   :  { %v1984_v49 = vadd.f32 %v1983_v52, %v1584_v32  ;;  %v2723_v30 = vadd.f32 %v2722_v25, %v2323_v31  ;;  %v713_v32 = vld [vmem:[#allocation4 + $0x7a0] sm:$0xff]  ;;  %v1593_v52 = vmul.f32 %v384_v6, %v384_v6 }
 0x28e   :  { %v1114_v20 = vsub.f32 %v713_v32, %v7135_v22  ;;  %v2332_v25 = vmul.f32 %v1113_v36, %v1113_v36  ;;  %v7142_v36 = vld [vmem:[#allocation7 + $0x7d8] sm:$0xff]  ;;  %v393_v22 = vld [vmem:[#allocation7 + $0xa28] sm:$0xff] }
 0x28f   :  { %v1985_v8 = vadd.f32 %v1984_v49, %v1585_v60  ;;  %v2724_v34 = vadd.f32 %v2723_v30, %v2324_v27  ;;  %v714_v60 = vld [vmem:[#allocation4 + $0x7a8] sm:$0xff]  ;;  %v1594_v49 = vmul.f32 %v385_v35, %v385_v35 }
 0x290   :  { %v1115_v61 = vsub.f32 %v714_v60, %v7136_v54  ;;  %v2333_v30 = vmul.f32 %v1114_v20, %v1114_v20  ;;  %v7143_v20 = vld [vmem:[#allocation7 + $0x7e0] sm:$0xff]  ;;  %v394_v54 = vld [vmem:[#allocation7 + $0xa30] sm:$0xff] }
 0x291   :  { %v1986_v45 = vadd.f32 %v1985_v8, %v1586_v57  ;;  %v2725_v39 = vadd.f32 %v2724_v34, %v2325_v41  ;;  %v715_v57 = vld [vmem:[#allocation4 + $0x7b0] sm:$0xff]  ;;  %v1595_v8 = vmul.f32 %v386_v56, %v386_v56 }
 0x292   :  { %v1116_v59 = vsub.f32 %v715_v57, %v7137_v4  ;;  %v2334_v34 = vmul.f32 %v1115_v61, %v1115_v61  ;;  %v7144_v61 = vld [vmem:[#allocation7 + $0x7e8] sm:$0xff]  ;;  %v395_v4 = vld [vmem:[#allocation7 + $0xa38] sm:$0xff] }
 0x293   :  { %v1987_v26 = vadd.f32 %v1986_v45, %v1587_v38  ;;  %v2726_v43 = vadd.f32 %v2725_v39, %v2326_v11  ;;  %v716_v38 = vld [vmem:[#allocation4 + $0x7b8] sm:$0xff]  ;;  %v1596_v45 = vmul.f32 %v387_v63, %v387_v63 }
 0x294   :  { %v1117_v55 = vsub.f32 %v716_v38, %v7138_v46  ;;  %v2335_v39 = vmul.f32 %v1116_v59, %v1116_v59  ;;  %v7145_v59 = vld [vmem:[#allocation7 + $0x7f0] sm:$0xff]  ;;  %v396_v46 = vld [vmem:[#allocation7 + $0xa40] sm:$0xff] }
 0x295   :  { %v1988_v3 = vadd.f32 %v1987_v26, %v1588_v42  ;;  %v2727_v17 = vadd.f32 %v2726_v43, %v2327_v19  ;;  %v717_v42 = vld [vmem:[#allocation4 + $0x7c0] sm:$0xff]  ;;  %v1597_v26 = vmul.f32 %v388_v10, %v388_v10 }
 0x296   :  { %v1118_v15 = vsub.f32 %v717_v42, %v7139_v44  ;;  %v2336_v43 = vmul.f32 %v1117_v55, %v1117_v55  ;;  %v7146_v55 = vld [vmem:[#allocation7 + $0x7f8] sm:$0xff]  ;;  %v397_v44 = vld [vmem:[#allocation7 + $0xa48] sm:$0xff] }
 0x297   :  { %v1989_v28 = vadd.f32 %v1988_v3, %v1589_v62  ;;  %v2728_v53 = vadd.f32 %v2727_v17, %v2328_v7  ;;  %v718_v62 = vld [vmem:[#allocation4 + $0x7c8] sm:$0xff]  ;;  %v1598_v3 = vmul.f32 %v389_v18, %v389_v18 }
 0x298   :  { %v1119_v58 = vsub.f32 %v718_v62, %v7140_v29  ;;  %v2337_v17 = vmul.f32 %v1118_v15, %v1118_v15  ;;  %v7147_v15 = vld [vmem:[#allocation7 + $0x800] sm:$0xff]  ;;  %v398_v29 = vld [vmem:[#allocation7 + $0xa50] sm:$0xff] }
 0x299   :  { %v1990_v48 = vadd.f32 %v1989_v28, %v1590_v9  ;;  %v2729_v37 = vadd.f32 %v2728_v53, %v2329_v12  ;;  %v719_v9 = vld [vmem:[#allocation4 + $0x7d0] sm:$0xff]  ;;  %v1599_v28 = vmul.f32 %v390_v24, %v390_v24 }
 0x29a   :  { %v1120_v32 = vsub.f32 %v719_v9, %v7141_v2  ;;  %v2338_v53 = vmul.f32 %v1119_v58, %v1119_v58  ;;  %v7148_v58 = vld [vmem:[#allocation7 + $0x808] sm:$0xff]  ;;  %v399_v2 = vld [vmem:[#allocation7 + $0xa58] sm:$0xff] }
 0x29b   :  { %v1991_v5 = vadd.f32 %v1990_v48, %v1591_v47  ;;  %v2730_v23 = vadd.f32 %v2729_v37, %v2330_v16  ;;  %v720_v47 = vld [vmem:[#allocation4 + $0x7d8] sm:$0xff]  ;;  %v1600_v48 = vmul.f32 %v391_v1, %v391_v1 }
 0x29c   :  { %v1121_v60 = vsub.f32 %v720_v47, %v7142_v36  ;;  %v2339_v37 = vmul.f32 %v1120_v32, %v1120_v32  ;;  %v7149_v32 = vld [vmem:[#allocation7 + $0x810] sm:$0xff]  ;;  %v400_v36 = vld [vmem:[#allocation7 + $0xa60] sm:$0xff] }
 0x29d   :  { %v1992_v31 = vadd.f32 %v1991_v5, %v1592_v50  ;;  %v2731_v51 = vadd.f32 %v2730_v23, %v2331_v21  ;;  %v721_v50 = vld [vmem:[#allocation4 + $0x7e0] sm:$0xff]  ;;  %v1601_v5 = vmul.f32 %v392_v33, %v392_v33 }
 0x29e   :  { %v1122_v57 = vsub.f32 %v721_v50, %v7143_v20  ;;  %v2340_v23 = vmul.f32 %v1121_v60, %v1121_v60  ;;  %v7150_v60 = vld [vmem:[#allocation7 + $0x818] sm:$0xff]  ;;  %v7729_v20 = vld [vmem:[#allocation7 + $0xa68] sm:$0xff] }
 0x29f   :  { %v1993_v27 = vadd.f32 %v1992_v31, %v1593_v52  ;;  %v2732_v13 = vadd.f32 %v2731_v51, %v2332_v25  ;;  %v722_v52 = vld [vmem:[#allocation4 + $0x7e8] sm:$0xff]  ;;  %v1602_v31 = vmul.f32 %v393_v22, %v393_v22 }
 0x2a0   :  { %v1123_v38 = vsub.f32 %v722_v52, %v7144_v61  ;;  %v2341_v51 = vmul.f32 %v1122_v57, %v1122_v57  ;;  %v7151_v57 = vld [vmem:[#allocation7 + $0x820] sm:$0xff]  ;;  %v7733_v61 = vld [vmem:[#allocation7 + $0xa70] sm:$0xff] }
 0x2a1   :  { %v1994_v41 = vadd.f32 %v1993_v27, %v1594_v49  ;;  %v2733_v14 = vadd.f32 %v2732_v13, %v2333_v30  ;;  %v723_v49 = vld [vmem:[#allocation4 + $0x7f0] sm:$0xff]  ;;  %v1603_v27 = vmul.f32 %v394_v54, %v394_v54 }
 0x2a2   :  { %v1124_v42 = vsub.f32 %v723_v49, %v7145_v59  ;;  %v2342_v13 = vmul.f32 %v1123_v38, %v1123_v38  ;;  %v7152_v38 = vld [vmem:[#allocation7 + $0x828] sm:$0xff]  ;;  %v7737_v59 = vld [vmem:[#allocation7 + $0xa78] sm:$0xff] }
 0x2a3   :  { %v1995_v11 = vadd.f32 %v1994_v41, %v1595_v8  ;;  %v2734_v0 = vadd.f32 %v2733_v14, %v2334_v34  ;;  %v724_v8 = vld [vmem:[#allocation4 + $0x7f8] sm:$0xff]  ;;  %v1604_v41 = vmul.f32 %v395_v4, %v395_v4 }
 0x2a4   :  { %v1125_v62 = vsub.f32 %v724_v8, %v7146_v55  ;;  %v2343_v14 = vmul.f32 %v1124_v42, %v1124_v42  ;;  %v7153_v42 = vld [vmem:[#allocation7 + $0x830] sm:$0xff]  ;;  %v7741_v55 = vld [vmem:[#allocation7 + $0xa80] sm:$0xff] }
 0x2a5   :  { %v1996_v19 = vadd.f32 %v1995_v11, %v1596_v45  ;;  %v2735_v6 = vadd.f32 %v2734_v0, %v2335_v39  ;;  %v725_v45 = vld [vmem:[#allocation4 + $0x800] sm:$0xff]  ;;  %v1605_v11 = vmul.f32 %v396_v46, %v396_v46 }
 0x2a6   :  { %v1126_v9 = vsub.f32 %v725_v45, %v7147_v15  ;;  %v2344_v0 = vmul.f32 %v1125_v62, %v1125_v62  ;;  %v7154_v62 = vld [vmem:[#allocation7 + $0x838] sm:$0xff]  ;;  %v7745_v15 = vld [vmem:[#allocation7 + $0xa88] sm:$0xff] }
 0x2a7   :  { %v1997_v7 = vadd.f32 %v1996_v19, %v1597_v26  ;;  %v2736_v35 = vadd.f32 %v2735_v6, %v2336_v43  ;;  %v726_v26 = vld [vmem:[#allocation4 + $0x808] sm:$0xff]  ;;  %v1606_v19 = vmul.f32 %v397_v44, %v397_v44 }
 0x2a8   :  { %v1127_v47 = vsub.f32 %v726_v26, %v7148_v58  ;;  %v2345_v6 = vmul.f32 %v1126_v9, %v1126_v9  ;;  %v7155_v9 = vld [vmem:[#allocation7 + $0x840] sm:$0xff]  ;;  %v7749_v58 = vld [vmem:[#allocation7 + $0xa90] sm:$0xff] }
 0x2a9   :  { %v1998_v12 = vadd.f32 %v1997_v7, %v1598_v3  ;;  %v2737_v56 = vadd.f32 %v2736_v35, %v2337_v17  ;;  %v727_v3 = vld [vmem:[#allocation4 + $0x810] sm:$0xff]  ;;  %v1607_v7 = vmul.f32 %v398_v29, %v398_v29 }
 0x2aa   :  { %v1128_v50 = vsub.f32 %v727_v3, %v7149_v32  ;;  %v2346_v35 = vmul.f32 %v1127_v47, %v1127_v47  ;;  %v7156_v47 = vld [vmem:[#allocation7 + $0x848] sm:$0xff]  ;;  %v7753_v32 = vld [vmem:[#allocation7 + $0xa98] sm:$0xff] }
 0x2ab   :  { %v1999_v16 = vadd.f32 %v1998_v12, %v1599_v28  ;;  %v2738_v63 = vadd.f32 %v2737_v56, %v2338_v53  ;;  %v728_v28 = vld [vmem:[#allocation4 + $0x818] sm:$0xff]  ;;  %v1608_v12 = vmul.f32 %v399_v2, %v399_v2 }
 0x2ac   :  { %v1129_v52 = vsub.f32 %v728_v28, %v7150_v60  ;;  %v2347_v56 = vmul.f32 %v1128_v50, %v1128_v50  ;;  %v7157_v50 = vld [vmem:[#allocation7 + $0x850] sm:$0xff]  ;;  %v7757_v60 = vld [vmem:[#allocation7 + $0xaa0] sm:$0xff] }
 0x2ad   :  { %v2000_v21 = vadd.f32 %v1999_v16, %v1600_v48  ;;  %v2739_v10 = vadd.f32 %v2738_v63, %v2339_v37  ;;  %v729_v48 = vld [vmem:[#allocation4 + $0x820] sm:$0xff]  ;;  %v1609_v16 = vmul.f32 %v400_v36, %v400_v36 }
 0x2ae   :  { %v1130_v49 = vsub.f32 %v729_v48, %v7151_v57  ;;  %v2348_v63 = vmul.f32 %v1129_v52, %v1129_v52  ;;  %v7158_v52 = vld [vmem:[#allocation7 + $0x858] sm:$0xff]  ;;  %v7761_v57 = vld [vmem:[#allocation7 + $0xaa8] sm:$0xff] }
 0x2af   :  { %v2001_v25 = vadd.f32 %v2000_v21, %v1601_v5  ;;  %v2740_v18 = vadd.f32 %v2739_v10, %v2340_v23  ;;  %v730_v5 = vld [vmem:[#allocation4 + $0x828] sm:$0xff]  ;;  %v1610_v21 = vmul.f32 %v7729_v20, %v7729_v20 }
 0x2b0   :  { %v1131_v8 = vsub.f32 %v730_v5, %v7152_v38  ;;  %v2349_v10 = vmul.f32 %v1130_v49, %v1130_v49 }
 0x2b1   :  { %v2002_v30 = vadd.f32 %v2001_v25, %v1602_v31  ;;  %v2741_v24 = vadd.f32 %v2740_v18, %v2341_v51  ;;  %v731_v31 = vld [vmem:[#allocation4 + $0x830] sm:$0xff]  ;;  %v1611_v25 = vmul.f32 %v7733_v61, %v7733_v61 }
 0x2b2   :  { %v1132_v45 = vsub.f32 %v731_v31, %v7153_v42  ;;  %v2350_v18 = vmul.f32 %v1131_v8, %v1131_v8  ;;  %v1618_v31 = vmul.f32 %v7761_v57, %v7761_v57 }
 0x2b3   :  { %v2003_v34 = vadd.f32 %v2002_v30, %v1603_v27  ;;  %v2742_v1 = vadd.f32 %v2741_v24, %v2342_v13  ;;  %v732_v27 = vld [vmem:[#allocation4 + $0x838] sm:$0xff]  ;;  %v1612_v30 = vmul.f32 %v7737_v59, %v7737_v59 }
 0x2b4   :  { %v1133_v26 = vsub.f32 %v732_v27, %v7154_v62  ;;  %v2351_v24 = vmul.f32 %v1132_v45, %v1132_v45  ;;  %v7774_v45 = vld [vmem:[#allocation7 + $0xac0] sm:$0xff] }
 0x2b5   :  { %v2004_v39 = vadd.f32 %v2003_v34, %v1604_v41  ;;  %v2743_v33 = vadd.f32 %v2742_v1, %v2343_v14  ;;  %v733_v41 = vld [vmem:[#allocation4 + $0x840] sm:$0xff]  ;;  %v1613_v34 = vmul.f32 %v7741_v55, %v7741_v55 }
 0x2b6   :  { %v1134_v3 = vsub.f32 %v733_v41, %v7155_v9  ;;  %v2352_v1 = vmul.f32 %v1133_v26, %v1133_v26  ;;  %v1621_v41 = vmul.f32 %v7774_v45, %v7774_v45 }
 0x2b7   :  { %v2005_v43 = vadd.f32 %v2004_v39, %v1605_v11  ;;  %v2744_v22 = vadd.f32 %v2743_v33, %v2344_v0  ;;  %v734_v11 = vld [vmem:[#allocation4 + $0x848] sm:$0xff]  ;;  %v1614_v39 = vmul.f32 %v7745_v15, %v7745_v15 }
 0x2b8   :  { %v1135_v28 = vsub.f32 %v734_v11, %v7156_v47  ;;  %v2353_v33 = vmul.f32 %v1134_v3, %v1134_v3  ;;  %v7782_v11 = vld [vmem:[#allocation7 + $0xad0] sm:$0xff]  ;;  %v7790_v3 = vld [vmem:[#allocation7 + $0xae0] sm:$0xff] }
 0x2b9   :  { %v2006_v17 = vadd.f32 %v2005_v43, %v1606_v19  ;;  %v2745_v54 = vadd.f32 %v2744_v22, %v2345_v6  ;;  %v735_v19 = vld [vmem:[#allocation4 + $0x850] sm:$0xff]  ;;  %v1615_v43 = vmul.f32 %v7749_v58, %v7749_v58 }
 0x2ba   :  { %v1136_v48 = vsub.f32 %v735_v19, %v7157_v50  ;;  %v1625_v19 = vmul.f32 %v7790_v3, %v7790_v3  ;;  %v7802_v50 = vld [vmem:[#allocation7 + $0xaf8] sm:$0xff] }
 0x2bb   :  { %v2007_v53 = vadd.f32 %v2006_v17, %v1607_v7  ;;  %v2746_v4 = vadd.f32 %v2745_v54, %v2346_v35  ;;  %v736_v7 = vld [vmem:[#allocation4 + $0x858] sm:$0xff]  ;;  %v1616_v17 = vmul.f32 %v7753_v32, %v7753_v32  ;;  %v2354_v35 = vmul.f32 %v1135_v28, %v1135_v28 }
 0x2bc   :  { %v1137_v5 = vsub.f32 %v736_v7, %v7158_v52  ;;  %v7766_v54 = vld [vmem:[#allocation7 + $0xab0] sm:$0xff]  ;;  %v739_v7 = vld [vmem:[#allocation4 + $0x870] sm:$0xff]  ;;  %v741_v52 = vld [vmem:[#allocation4 + $0x880] sm:$0xff] }
 0x2bd   :  { %v2008_v37 = vadd.f32 %v2007_v53, %v1608_v12  ;;  %v2747_v46 = vadd.f32 %v2746_v4, %v2347_v56  ;;  %v737_v12 = vld [vmem:[#allocation4 + $0x860] sm:$0xff]  ;;  %v1619_v38 = vmul.f32 %v7766_v54, %v7766_v54  ;;  %v7798_v28 = vld [vmem:[#allocation7 + $0xaf0] sm:$0xff] }
 0x2be   :  { %v1138_v49 = vsub.f32 %v737_v12, %v7725_v40  ;;  %v2356_v27 = vmul.f32 %v1137_v5, %v1137_v5  ;;  %v7160_v12 = vld [vmem:[#allocation7 + $0x870] sm:$0xff]  ;;  %v742_v5 = vld [vmem:[#allocation4 + $0x888] sm:$0xff] }
 0x2bf   :  { %v2009_v23 = vadd.f32 %v2008_v37, %v1609_v16  ;;  %v2748_v44 = vadd.f32 %v2747_v46, %v2348_v63  ;;  %v1617_v16 = vmul.f32 %v7757_v60, %v7757_v60  ;;  %v2355_v37 = vmul.f32 %v1136_v48, %v1136_v48  ;;  %v740_v48 = vld [vmem:[#allocation4 + $0x878] sm:$0xff] }
 0x2c0   :  { %v2357_v4 = vmul.f32 %v1138_v49, %v1138_v49 }
 0x2c1   :  { %v2010_v51 = vadd.f32 %v2009_v23, %v1610_v21  ;;  %v2749_v29 = vadd.f32 %v2748_v44, %v2349_v10  ;;  %v7770_v23 = vld [vmem:[#allocation7 + $0xab8] sm:$0xff]  ;;  %v7778_v10 = vld [vmem:[#allocation7 + $0xac8] sm:$0xff] }
 0x2c2   :  { %v1620_v63 = vmul.f32 %v7770_v23, %v7770_v23  ;;  %v1622_v46 = vmul.f32 %v7778_v10, %v7778_v10 }
 0x2c3   :  { %v2011_v13 = vadd.f32 %v2010_v51, %v1611_v25  ;;  %v2750_v2 = vadd.f32 %v2749_v29, %v2350_v18  ;;  %v7786_v18 = vld [vmem:[#allocation7 + $0xad8] sm:$0xff] }
 0x2c4   :  { %v1624_v44 = vmul.f32 %v7786_v18, %v7786_v18 }
 0x2c5   :  { %v2012_v14 = vadd.f32 %v2011_v13, %v1612_v30  ;;  %v2751_v36 = vadd.f32 %v2750_v2, %v2351_v24  ;;  %v738_v24 = vld [vmem:[#allocation4 + $0x868] sm:$0xff] }
 0x2c7   :  { %v2013_v0 = vadd.f32 %v2012_v14, %v1613_v34  ;;  %v2752_v22 = vadd.f32 %v2751_v36, %v2352_v1  ;;  %v1623_v34 = vmul.f32 %v7782_v11, %v7782_v11  ;;  %v7794_v14 = vld [vmem:[#allocation7 + $0xae8] sm:$0xff]  ;;  %v1627_v1 = vmul.f32 %v7798_v28, %v7798_v28  ;;  %v7806_v36 = vld [vmem:[#allocation7 + $0xb00] sm:$0xff] }
 0x2c8   :  { %v1626_v29 = vmul.f32 %v7794_v14, %v7794_v14 }
 0x2c9   :  { %v2014_v6 = vadd.f32 %v2013_v0, %v1614_v39  ;;  %v2753_v56 = vadd.f32 %v2752_v22, %v2353_v33 }
 0x2cb   :  { %v2015_v53 = vadd.f32 %v2014_v6, %v1615_v43  ;;  %v2754_v25 = vadd.f32 %v2753_v56, %v2354_v35  ;;  %v7159_v43 = vld [vmem:[#allocation7 + $0x868] sm:$0xff]  ;;  %v1628_v6 = vmul.f32 %v7802_v50, %v7802_v50  ;;  %v1629_v35 = vmul.f32 %v7806_v36, %v7806_v36 }
 0x2cc   :  { %v1139_v0 = vsub.f32 %v738_v24, %v7159_v43  ;;  %v7822_v24 = vld [vmem:[#allocation7 + $0xb20] sm:$0xff] }
 0x2cd   :  { %v2016_v21 = vadd.f32 %v2015_v53, %v1616_v17  ;;  %v2755_v42 = vadd.f32 %v2754_v25, %v2355_v37  ;;  %v1140_v17 = vsub.f32 %v739_v7, %v7160_v12  ;;  %v7162_v37 = vld [vmem:[#allocation7 + $0x880] sm:$0xff]  ;;  %v7814_v25 = vld [vmem:[#allocation7 + $0xb10] sm:$0xff]  ;;  %v1633_v43 = vmul.f32 %v7822_v24, %v7822_v24 }
 0x2ce   :  { %v2358_v49 = vmul.f32 %v1139_v0, %v1139_v0  ;;  %v1142_v56 = vsub.f32 %v741_v52, %v7162_v37  ;;  %v746_v7 = vld [vmem:[#allocation4 + $0x8a8] sm:$0xff] }
 0x2cf   :  { %v2017_v8 = vadd.f32 %v2016_v21, %v1617_v16  ;;  %v2756_v51 = vadd.f32 %v2755_v42, %v2356_v27  ;;  %v7161_v16 = vld [vmem:[#allocation7 + $0x878] sm:$0xff]  ;;  %v743_v21 = vld [vmem:[#allocation4 + $0x890] sm:$0xff]  ;;  %v2359_v27 = vmul.f32 %v1140_v17, %v1140_v17  ;;  %v1631_v42 = vmul.f32 %v7814_v25, %v7814_v25 }
 0x2d0   :  { %v1141_v53 = vsub.f32 %v740_v48, %v7161_v16  ;;  %v7166_v48 = vld [vmem:[#allocation7 + $0x8a0] sm:$0xff]  ;;  %v747_v17 = vld [vmem:[#allocation4 + $0x8b0] sm:$0xff]  ;;  %v7830_v16 = vld [vmem:[#allocation7 + $0xb30] sm:$0xff] }
 0x2d1   :  { %v2018_v40 = vadd.f32 %v2017_v8, %v1618_v31  ;;  %v2757_v26 = vadd.f32 %v2756_v51, %v2357_v4  ;;  %v7810_v31 = vld [vmem:[#allocation7 + $0xb08] sm:$0xff]  ;;  %v744_v4 = vld [vmem:[#allocation4 + $0x898] sm:$0xff] }
 0x2d3   :  { %v2019_v30 = vadd.f32 %v2018_v40, %v1619_v38  ;;  %v1630_v38 = vmul.f32 %v7810_v31, %v7810_v31  ;;  %v2758_v51 = vadd.f32 %v2757_v26, %v2358_v49  ;;  %v1635_v49 = vmul.f32 %v7830_v16, %v7830_v16 }
 0x2d5   :  { %v2020_v62 = vadd.f32 %v2019_v30, %v1620_v63  ;;  %v7163_v63 = vld [vmem:[#allocation7 + $0x888] sm:$0xff]  ;;  %v2360_v30 = vmul.f32 %v1141_v53, %v1141_v53 }
 0x2d6   :  { %v1143_v40 = vsub.f32 %v742_v5, %v7163_v63  ;;  %v7167_v53 = vld [vmem:[#allocation7 + $0x8a8] sm:$0xff]  ;;  %v749_v63 = vld [vmem:[#allocation4 + $0x8c0] sm:$0xff] }
 0x2d7   :  { %v2021_v13 = vadd.f32 %v2020_v62, %v1621_v41  ;;  %v7164_v62 = vld [vmem:[#allocation7 + $0x890] sm:$0xff] }
 0x2d8   :  { %v2362_v0 = vmul.f32 %v1143_v40, %v1143_v40 }
 0x2d9   :  { %v2022_v9 = vadd.f32 %v2021_v13, %v1622_v46  ;;  %v7818_v46 = vld [vmem:[#allocation7 + $0xb18] sm:$0xff] }
 0x2da   :  { %v745_v13 = vld [vmem:[#allocation4 + $0x8a0] sm:$0xff] }
 0x2db   :  { %v2023_v39 = vadd.f32 %v2022_v9, %v1623_v34  ;;  %v1144_v34 = vsub.f32 %v743_v21, %v7164_v62  ;;  %v1146_v12 = vsub.f32 %v745_v13, %v7166_v48  ;;  %v7846_v48 = vld [vmem:[#allocation7 + $0xb50] sm:$0xff] }
 0x2dd   :  { %v2024_v47 = vadd.f32 %v2023_v39, %v1624_v44  ;;  %v1632_v44 = vmul.f32 %v7818_v46, %v7818_v46  ;;  %v2759_v39 = vadd.f32 %v2758_v51, %v2359_v27  ;;  %v2363_v52 = vmul.f32 %v1144_v34, %v1144_v34  ;;  %v7169_v51 = vld [vmem:[#allocation7 + $0x8b8] sm:$0xff]  ;;  %v750_v34 = vld [vmem:[#allocation4 + $0x8c8] sm:$0xff] }
 0x2df   :  { %v2025_v2 = vadd.f32 %v2024_v47, %v1625_v19  ;;  %v2361_v19 = vmul.f32 %v1142_v56, %v1142_v56 }
 0x2e1   :  { %v2026_v33 = vadd.f32 %v2025_v2, %v1626_v29  ;;  %v7165_v29 = vld [vmem:[#allocation7 + $0x898] sm:$0xff]  ;;  %v7826_v2 = vld [vmem:[#allocation7 + $0xb28] sm:$0xff] }
 0x2e2   :  { %v1145_v47 = vsub.f32 %v744_v4, %v7165_v29  ;;  %v7170_v29 = vld [vmem:[#allocation7 + $0x8c0] sm:$0xff] }
 0x2e3   :  { %v2027_v22 = vadd.f32 %v2026_v33, %v1627_v1  ;;  %v2760_v1 = vadd.f32 %v2759_v39, %v2360_v30  ;;  %v7838_v30 = vld [vmem:[#allocation7 + $0xb40] sm:$0xff]  ;;  %v7842_v39 = vld [vmem:[#allocation7 + $0xb48] sm:$0xff] }
 0x2e4   :  { %v2364_v37 = vmul.f32 %v1145_v47, %v1145_v47  ;;  %v1637_v13 = vmul.f32 %v7838_v30, %v7838_v30  ;;  %v1150_v47 = vsub.f32 %v749_v63, %v7170_v29  ;;  %v7854_v63 = vld [vmem:[#allocation7 + $0xb60] sm:$0xff] }
 0x2e5   :  { %v2028_v8 = vadd.f32 %v2027_v22, %v1628_v6  ;;  %v1634_v6 = vmul.f32 %v7826_v2, %v7826_v2  ;;  %v2761_v5 = vadd.f32 %v2760_v1, %v2361_v19  ;;  %v748_v22 = vld [vmem:[#allocation4 + $0x8b8] sm:$0xff] }
 0x2e6   :  { %v1149_v62 = vsub.f32 %v748_v22, %v7169_v51  ;;  %v7172_v22 = vld [vmem:[#allocation7 + $0x8d0] sm:$0xff] }
 0x2e7   :  { %v2029_v41 = vadd.f32 %v2028_v8, %v1629_v35  ;;  %v1147_v35 = vsub.f32 %v746_v7, %v7167_v53  ;;  %v2762_v56 = vadd.f32 %v2761_v5, %v2362_v0  ;;  %v7168_v8 = vld [vmem:[#allocation7 + $0x8b0] sm:$0xff]  ;;  %v751_v7 = vld [vmem:[#allocation4 + $0x8d0] sm:$0xff] }
 0x2e8   :  { %v1148_v27 = vsub.f32 %v747_v17, %v7168_v8  ;;  %v2368_v5 = vmul.f32 %v1149_v62, %v1149_v62  ;;  %v2369_v8 = vmul.f32 %v1150_v47, %v1150_v47 }
 0x2e9   :  { %v2030_v9 = vadd.f32 %v2029_v41, %v1630_v38  ;;  %v7834_v38 = vld [vmem:[#allocation7 + $0xb38] sm:$0xff]  ;;  %v2763_v41 = vadd.f32 %v2762_v56, %v2363_v52 }
 0x2ea   :  { %v1636_v40 = vmul.f32 %v7834_v38, %v7834_v38  ;;  %v2367_v0 = vmul.f32 %v1148_v27, %v1148_v27 }
 0x2eb   :  { %v2031_v26 = vadd.f32 %v2030_v9, %v1631_v42  ;;  %v2365_v42 = vmul.f32 %v1146_v12, %v1146_v12  ;;  %v2366_v9 = vmul.f32 %v1147_v35, %v1147_v35  ;;  %v2764_v19 = vadd.f32 %v2763_v41, %v2364_v37  ;;  %v7171_v12 = vld [vmem:[#allocation7 + $0x8c8] sm:$0xff]  ;;  %v7850_v35 = vld [vmem:[#allocation7 + $0xb58] sm:$0xff] }
 0x2ec   :  { %v1151_v17 = vsub.f32 %v750_v34, %v7171_v12  ;;  %v1640_v37 = vmul.f32 %v7850_v35, %v7850_v35  ;;  %v1641_v41 = vmul.f32 %v7854_v63, %v7854_v63  ;;  %v756_v12 = vld [vmem:[#allocation4 + $0x8f8] sm:$0xff] }
 0x2ed   :  { %v2032_v33 = vadd.f32 %v2031_v26, %v1632_v44  ;;  %v2765_v1 = vadd.f32 %v2764_v19, %v2365_v42  ;;  %v754_v42 = vld [vmem:[#allocation4 + $0x8e8] sm:$0xff]  ;;  %v755_v19 = vld [vmem:[#allocation4 + $0x8f0] sm:$0xff] }
 0x2ee   :  { %v2370_v62 = vmul.f32 %v1151_v17, %v1151_v17 }
 0x2ef   :  { %v2033_v21 = vadd.f32 %v2032_v33, %v1633_v43  ;;  %v1638_v43 = vmul.f32 %v7842_v39, %v7842_v39  ;;  %v1639_v33 = vmul.f32 %v7846_v48, %v7846_v48  ;;  %v2766_v53 = vadd.f32 %v2765_v1, %v2366_v9 }
 0x2f1   :  { %v2034_v4 = vadd.f32 %v2033_v21, %v1634_v6  ;;  %v752_v6 = vld [vmem:[#allocation4 + $0x8d8] sm:$0xff]  ;;  %v753_v21 = vld [vmem:[#allocation4 + $0x8e0] sm:$0xff]  ;;  %v2767_v27 = vadd.f32 %v2766_v53, %v2367_v0  ;;  %v7175_v0 = vld [vmem:[#allocation7 + $0x8e8] sm:$0xff] }
 0x2f2   :  { %v1155_v1 = vsub.f32 %v754_v42, %v7175_v0  ;;  %v7176_v53 = vld [vmem:[#allocation7 + $0x8f0] sm:$0xff] }
 0x2f3   :  { %v2035_v44 = vadd.f32 %v2034_v4, %v1635_v49  ;;  %v1152_v49 = vsub.f32 %v751_v7, %v7172_v22  ;;  %v2768_v34 = vadd.f32 %v2767_v27, %v2368_v5  ;;  %v7866_v5 = vld [vmem:[#allocation7 + $0xb78] sm:$0xff]  ;;  %v1156_v22 = vsub.f32 %v755_v19, %v7176_v53  ;;  %v7870_v27 = vld [vmem:[#allocation7 + $0xb80] sm:$0xff]  ;;  %v760_v53 = vld [vmem:[#allocation4 + $0x918] sm:$0xff] }
 0x2f4   :  { %8234 = vst [vmem:[#allocation14_spill] sm:$0xff] %v7866_v5  ;;  %8235 = vst [vmem:[#allocation15_spill] sm:$0xff] %v7870_v27  ;;  %v7178_v19 = vld [vmem:[#allocation7 + $0x900] sm:$0xff] }
 0x2f5   :  { %v2036_v26 = vadd.f32 %v2035_v44, %v1636_v40  ;;  %v7173_v40 = vld [vmem:[#allocation7 + $0x8d8] sm:$0xff]  ;;  %v7174_v44 = vld [vmem:[#allocation7 + $0x8e0] sm:$0xff]  ;;  %v2371_v7 = vmul.f32 %v1152_v49, %v1152_v49  ;;  %v1644_v49 = vmul.f32 %v7866_v5, %v7866_v5  ;;  %v791_v5 = vld [vmem:[#allocation4 + $0xa10] sm:$0xff] }
 0x2f6   :  { %v1153_v4 = vsub.f32 %v752_v6, %v7173_v40  ;;  %v1154_v9 = vsub.f32 %v753_v21, %v7174_v44  ;;  %v757_v21 = vld [vmem:[#allocation4 + $0x900] sm:$0xff]  ;;  %v7874_v44 = vld [vmem:[#allocation7 + $0xb88] sm:$0xff] }
 0x2f7   :  { %v2037_v52 = vadd.f32 %v2036_v26, %v1637_v13  ;;  %v7858_v13 = vld [vmem:[#allocation7 + $0xb68] sm:$0xff]  ;;  %v7862_v26 = vld [vmem:[#allocation7 + $0xb70] sm:$0xff]  ;;  %v7177_v40 = vld [vmem:[#allocation7 + $0x8f8] sm:$0xff]  ;;  %8236 = vst [vmem:[#allocation16_spill] sm:$0xff] %v7874_v44 }
 0x2f8   :  { %v1642_v29 = vmul.f32 %v7858_v13, %v7858_v13  ;;  %8233 = vst [vmem:[#allocation13_spill] sm:$0xff] %v7862_v26  ;;  %v1643_v17 = vmul.f32 %v7862_v26, %v7862_v26  ;;  %v1157_v42 = vsub.f32 %v756_v12, %v7177_v40  ;;  %v7179_v12 = vld [vmem:[#allocation7 + $0x908] sm:$0xff]  ;;  %v7212_v26 = vld [vmem:[#allocation7 + $0xa10] sm:$0xff] }
 0x2f9   :  { %v2038_v56 = vadd.f32 %v2037_v52, %v1638_v43  ;;  %v2769_v43 = vadd.f32 %v2768_v34, %v2369_v8 }
 0x2fb   :  { %v2039_v51 = vadd.f32 %v2038_v56, %v1639_v33  ;;  %v2372_v33 = vmul.f32 %v1153_v4, %v1153_v4  ;;  %v2770_v52 = vadd.f32 %v2769_v43, %v2370_v62  ;;  %v2373_v56 = vmul.f32 %v1154_v9, %v1154_v9  ;;  %v759_v43 = vld [vmem:[#allocation4 + $0x910] sm:$0xff] }
 0x2fc   :  { %v1645_v4 = vmul.f32 %v7870_v27, %v7870_v27  ;;  %v2374_v62 = vmul.f32 %v1155_v1, %v1155_v1  ;;  %v1646_v9 = vmul.f32 %v7874_v44, %v7874_v44  ;;  %v762_v44 = vld [vmem:[#allocation4 + $0x928] sm:$0xff] }
 0x2fd   :  { %v2040_v47 = vadd.f32 %v2039_v51, %v1640_v37  ;;  %v2771_v8 = vadd.f32 %v2770_v52, %v2371_v7  ;;  %v758_v51 = vld [vmem:[#allocation4 + $0x908] sm:$0xff]  ;;  %v2375_v7 = vmul.f32 %v1156_v22, %v1156_v22 }
 0x2fe   :  { %v1159_v52 = vsub.f32 %v758_v51, %v7179_v12  ;;  %v7181_v51 = vld [vmem:[#allocation7 + $0x918] sm:$0xff] }
 0x2ff   :  { %v2041_v6 = vadd.f32 %v2040_v47, %v1641_v41  ;;  %v2772_v34 = vadd.f32 %v2771_v8, %v2372_v33  ;;  %v1158_v47 = vsub.f32 %v757_v21, %v7178_v19  ;;  %v2376_v33 = vmul.f32 %v1157_v42, %v1157_v42  ;;  %v7882_v8 = vld [vmem:[#allocation7 + $0xb98] sm:$0xff]  ;;  %v7180_v21 = vld [vmem:[#allocation7 + $0x910] sm:$0xff] }
 0x300   :  { %8238 = vst [vmem:[#allocation18_spill] sm:$0xff] %v7882_v8  ;;  %v1160_v40 = vsub.f32 %v759_v43, %v7180_v21  ;;  %v761_v19 = vld [vmem:[#allocation4 + $0x920] sm:$0xff]  ;;  %v1648_v22 = vmul.f32 %v7882_v8, %v7882_v8  ;;  %v1161_v12 = vsub.f32 %v760_v53, %v7181_v51  ;;  %v7182_v43 = vld [vmem:[#allocation7 + $0x920] sm:$0xff]  ;;  %v7183_v53 = vld [vmem:[#allocation7 + $0x928] sm:$0xff] }
 0x301   :  { %v2042_v37 = vadd.f32 %v2041_v6, %v1642_v29  ;;  %v2773_v0 = vadd.f32 %v2772_v34, %v2373_v56  ;;  %v7878_v6 = vld [vmem:[#allocation7 + $0xb90] sm:$0xff]  ;;  %v2377_v56 = vmul.f32 %v1158_v47, %v1158_v47  ;;  %v7886_v34 = vld [vmem:[#allocation7 + $0xba0] sm:$0xff]  ;;  %v1162_v21 = vsub.f32 %v761_v19, %v7182_v43 }
 0x302   :  { %8237 = vst [vmem:[#allocation17_spill] sm:$0xff] %v7878_v6  ;;  %v1647_v1 = vmul.f32 %v7878_v6, %v7878_v6  ;;  %8239 = vst [vmem:[#allocation19_spill] sm:$0xff] %v7886_v34  ;;  %v1649_v42 = vmul.f32 %v7886_v34, %v7886_v34  ;;  %v763_v6 = vld [vmem:[#allocation4 + $0x930] sm:$0xff]  ;;  %v1163_v51 = vsub.f32 %v762_v44, %v7183_v53  ;;  %v764_v8 = vld [vmem:[#allocation4 + $0x938] sm:$0xff] }
 0x303   :  { %v2043_v41 = vadd.f32 %v2042_v37, %v1643_v17  ;;  %v2774_v37 = vadd.f32 %v2773_v0, %v2374_v62  ;;  %v2378_v62 = vmul.f32 %v1159_v52, %v1159_v52  ;;  %v7890_v0 = vld [vmem:[#allocation7 + $0xba8] sm:$0xff]  ;;  %v7184_v19 = vld [vmem:[#allocation7 + $0x930] sm:$0xff]  ;;  %v765_v34 = vld [vmem:[#allocation4 + $0x940] sm:$0xff] }
 0x304   :  { %8240 = vst [vmem:[#allocation20_spill] sm:$0xff] %v7890_v0  ;;  %v1650_v47 = vmul.f32 %v7890_v0, %v7890_v0  ;;  %v1164_v43 = vsub.f32 %v763_v6, %v7184_v19  ;;  %v7185_v44 = vld [vmem:[#allocation7 + $0x938] sm:$0xff]  ;;  %v766_v0 = vld [vmem:[#allocation4 + $0x948] sm:$0xff] }
 0x305   :  { %v2044_v29 = vadd.f32 %v2043_v41, %v1644_v49  ;;  %v2775_v41 = vadd.f32 %v2774_v37, %v2375_v7  ;;  %v2379_v7 = vmul.f32 %v1160_v40, %v1160_v40  ;;  %v7894_v37 = vld [vmem:[#allocation7 + $0xbb0] sm:$0xff]  ;;  %v1165_v53 = vsub.f32 %v764_v8, %v7185_v44  ;;  %v7186_v6 = vld [vmem:[#allocation7 + $0x940] sm:$0xff]  ;;  %v7187_v8 = vld [vmem:[#allocation7 + $0x948] sm:$0xff] }
 0x306   :  { %8241 = vst [vmem:[#allocation21_spill] sm:$0xff] %v7894_v37  ;;  %v1651_v52 = vmul.f32 %v7894_v37, %v7894_v37  ;;  %v1166_v19 = vsub.f32 %v765_v34, %v7186_v6  ;;  %v767_v37 = vld [vmem:[#allocation4 + $0x950] sm:$0xff]  ;;  %v1167_v44 = vsub.f32 %v766_v0, %v7187_v8  ;;  %v7188_v34 = vld [vmem:[#allocation7 + $0x950] sm:$0xff]  ;;  %v7189_v0 = vld [vmem:[#allocation7 + $0x958] sm:$0xff] }
 0x307   :  { %v2045_v17 = vadd.f32 %v2044_v29, %v1645_v4  ;;  %v2776_v29 = vadd.f32 %v2775_v41, %v2376_v33  ;;  %v2380_v33 = vmul.f32 %v1161_v12, %v1161_v12  ;;  %v7898_v41 = vld [vmem:[#allocation7 + $0xbb8] sm:$0xff]  ;;  %v1168_v6 = vsub.f32 %v767_v37, %v7188_v34  ;;  %v7190_v37 = vld [vmem:[#allocation7 + $0x960] sm:$0xff] }
 0x308   :  { %8242 = vst [vmem:[#allocation22_spill] sm:$0xff] %v7898_v41  ;;  %v1652_v40 = vmul.f32 %v7898_v41, %v7898_v41  ;;  %v768_v41 = vld [vmem:[#allocation4 + $0x958] sm:$0xff] }
 0x309   :  { %v2046_v49 = vadd.f32 %v2045_v17, %v1646_v9  ;;  %v2777_v17 = vadd.f32 %v2776_v29, %v2377_v56  ;;  %v2381_v56 = vmul.f32 %v1162_v21, %v1162_v21  ;;  %v7902_v29 = vld [vmem:[#allocation7 + $0xbc0] sm:$0xff]  ;;  %v1169_v8 = vsub.f32 %v768_v41, %v7189_v0  ;;  %v7191_v41 = vld [vmem:[#allocation7 + $0x968] sm:$0xff] }
 0x30a   :  { %8243 = vst [vmem:[#allocation23_spill] sm:$0xff] %v7902_v29  ;;  %v1653_v12 = vmul.f32 %v7902_v29, %v7902_v29  ;;  %v769_v29 = vld [vmem:[#allocation4 + $0x960] sm:$0xff] }
 0x30b   :  { %v2047_v4 = vadd.f32 %v2046_v49, %v1647_v1  ;;  %v2778_v49 = vadd.f32 %v2777_v17, %v2378_v62  ;;  %v2382_v62 = vmul.f32 %v1163_v51, %v1163_v51  ;;  %v7906_v17 = vld [vmem:[#allocation7 + $0xbc8] sm:$0xff]  ;;  %v1170_v34 = vsub.f32 %v769_v29, %v7190_v37  ;;  %v7192_v29 = vld [vmem:[#allocation7 + $0x970] sm:$0xff] }
 0x30c   :  { %8244 = vst [vmem:[#allocation24_spill] sm:$0xff] %v7906_v17  ;;  %v1654_v21 = vmul.f32 %v7906_v17, %v7906_v17  ;;  %v770_v17 = vld [vmem:[#allocation4 + $0x968] sm:$0xff] }
 0x30d   :  { %v2048_v9 = vadd.f32 %v2047_v4, %v1648_v22  ;;  %v2779_v4 = vadd.f32 %v2778_v49, %v2379_v7  ;;  %v2383_v7 = vmul.f32 %v1164_v43, %v1164_v43  ;;  %v7910_v49 = vld [vmem:[#allocation7 + $0xbd0] sm:$0xff]  ;;  %v1171_v0 = vsub.f32 %v770_v17, %v7191_v41  ;;  %v7193_v17 = vld [vmem:[#allocation7 + $0x978] sm:$0xff] }
 0x30e   :  { %8245 = vst [vmem:[#allocation25_spill] sm:$0xff] %v7910_v49  ;;  %v1655_v51 = vmul.f32 %v7910_v49, %v7910_v49  ;;  %v771_v49 = vld [vmem:[#allocation4 + $0x970] sm:$0xff] }
 0x30f   :  { %v2049_v1 = vadd.f32 %v2048_v9, %v1649_v42  ;;  %v2780_v9 = vadd.f32 %v2779_v4, %v2380_v33  ;;  %v2384_v33 = vmul.f32 %v1165_v53, %v1165_v53  ;;  %v7914_v4 = vld [vmem:[#allocation7 + $0xbd8] sm:$0xff]  ;;  %v1172_v37 = vsub.f32 %v771_v49, %v7192_v29  ;;  %v7194_v49 = vld [vmem:[#allocation7 + $0x980] sm:$0xff] }
 0x310   :  { %8246 = vst [vmem:[#allocation26_spill] sm:$0xff] %v7914_v4  ;;  %v1656_v43 = vmul.f32 %v7914_v4, %v7914_v4  ;;  %v772_v4 = vld [vmem:[#allocation4 + $0x978] sm:$0xff] }
 0x311   :  { %v2050_v22 = vadd.f32 %v2049_v1, %v1650_v47  ;;  %v2781_v1 = vadd.f32 %v2780_v9, %v2381_v56  ;;  %v2385_v56 = vmul.f32 %v1166_v19, %v1166_v19  ;;  %v7918_v9 = vld [vmem:[#allocation7 + $0xbe0] sm:$0xff]  ;;  %v1173_v41 = vsub.f32 %v772_v4, %v7193_v17  ;;  %v7195_v4 = vld [vmem:[#allocation7 + $0x988] sm:$0xff] }
 0x312   :  { %8247 = vst [vmem:[#allocation27_spill] sm:$0xff] %v7918_v9  ;;  %v1657_v53 = vmul.f32 %v7918_v9, %v7918_v9  ;;  %v773_v9 = vld [vmem:[#allocation4 + $0x980] sm:$0xff] }
 0x313   :  { %v2051_v42 = vadd.f32 %v2050_v22, %v1651_v52  ;;  %v2782_v22 = vadd.f32 %v2781_v1, %v2382_v62  ;;  %v2386_v62 = vmul.f32 %v1167_v44, %v1167_v44  ;;  %v7922_v1 = vld [vmem:[#allocation7 + $0xbe8] sm:$0xff]  ;;  %v1174_v29 = vsub.f32 %v773_v9, %v7194_v49  ;;  %v7196_v9 = vld [vmem:[#allocation7 + $0x990] sm:$0xff] }
 0x314   :  { %8248 = vst [vmem:[#allocation28_spill] sm:$0xff] %v7922_v1  ;;  %v1658_v19 = vmul.f32 %v7922_v1, %v7922_v1  ;;  %v774_v1 = vld [vmem:[#allocation4 + $0x988] sm:$0xff] }
 0x315   :  { %v2052_v47 = vadd.f32 %v2051_v42, %v1652_v40  ;;  %v2783_v42 = vadd.f32 %v2782_v22, %v2383_v7  ;;  %v2387_v7 = vmul.f32 %v1168_v6, %v1168_v6  ;;  %v7926_v22 = vld [vmem:[#allocation7 + $0xbf0] sm:$0xff]  ;;  %v1175_v17 = vsub.f32 %v774_v1, %v7195_v4  ;;  %v7197_v1 = vld [vmem:[#allocation7 + $0x998] sm:$0xff] }
 0x316   :  { %8249 = vst [vmem:[#allocation29_spill] sm:$0xff] %v7926_v22  ;;  %v1659_v44 = vmul.f32 %v7926_v22, %v7926_v22  ;;  %v775_v22 = vld [vmem:[#allocation4 + $0x990] sm:$0xff] }
 0x317   :  { %v2053_v52 = vadd.f32 %v2052_v47, %v1653_v12  ;;  %v2784_v47 = vadd.f32 %v2783_v42, %v2384_v33  ;;  %v2388_v33 = vmul.f32 %v1169_v8, %v1169_v8  ;;  %v7930_v42 = vld [vmem:[#allocation7 + $0xbf8] sm:$0xff]  ;;  %v1176_v49 = vsub.f32 %v775_v22, %v7196_v9  ;;  %v7198_v22 = vld [vmem:[#allocation7 + $0x9a0] sm:$0xff] }
 0x318   :  { %8250 = vst [vmem:[#allocation30_spill] sm:$0xff] %v7930_v42  ;;  %v1660_v6 = vmul.f32 %v7930_v42, %v7930_v42  ;;  %v776_v42 = vld [vmem:[#allocation4 + $0x998] sm:$0xff] }
 0x319   :  { %v2054_v40 = vadd.f32 %v2053_v52, %v1654_v21  ;;  %v2785_v52 = vadd.f32 %v2784_v47, %v2385_v56  ;;  %v2389_v56 = vmul.f32 %v1170_v34, %v1170_v34  ;;  %v7934_v47 = vld [vmem:[#allocation7 + $0xc00] sm:$0xff]  ;;  %v1177_v4 = vsub.f32 %v776_v42, %v7197_v1  ;;  %v7199_v42 = vld [vmem:[#allocation7 + $0x9a8] sm:$0xff] }
 0x31a   :  { %8251 = vst [vmem:[#allocation31_spill] sm:$0xff] %v7934_v47  ;;  %v1661_v8 = vmul.f32 %v7934_v47, %v7934_v47  ;;  %v777_v47 = vld [vmem:[#allocation4 + $0x9a0] sm:$0xff] }
 0x31b   :  { %v2055_v12 = vadd.f32 %v2054_v40, %v1655_v51  ;;  %v2786_v40 = vadd.f32 %v2785_v52, %v2386_v62  ;;  %v2390_v62 = vmul.f32 %v1171_v0, %v1171_v0  ;;  %v7938_v52 = vld [vmem:[#allocation7 + $0xc08] sm:$0xff]  ;;  %v1178_v9 = vsub.f32 %v777_v47, %v7198_v22  ;;  %v7200_v47 = vld [vmem:[#allocation7 + $0x9b0] sm:$0xff] }
 0x31c   :  { %8252 = vst [vmem:[#allocation32_spill] sm:$0xff] %v7938_v52  ;;  %v1662_v34 = vmul.f32 %v7938_v52, %v7938_v52  ;;  %v778_v52 = vld [vmem:[#allocation4 + $0x9a8] sm:$0xff] }
 0x31d   :  { %v2056_v21 = vadd.f32 %v2055_v12, %v1656_v43  ;;  %v2787_v12 = vadd.f32 %v2786_v40, %v2387_v7  ;;  %v2391_v7 = vmul.f32 %v1172_v37, %v1172_v37  ;;  %v7942_v40 = vld [vmem:[#allocation7 + $0xc10] sm:$0xff]  ;;  %v1179_v1 = vsub.f32 %v778_v52, %v7199_v42  ;;  %v7201_v52 = vld [vmem:[#allocation7 + $0x9b8] sm:$0xff] }
 0x31e   :  { %8253 = vst [vmem:[#allocation33_spill] sm:$0xff] %v7942_v40  ;;  %v1663_v0 = vmul.f32 %v7942_v40, %v7942_v40  ;;  %v779_v40 = vld [vmem:[#allocation4 + $0x9b0] sm:$0xff] }
 0x31f   :  { %v2057_v51 = vadd.f32 %v2056_v21, %v1657_v53  ;;  %v2788_v21 = vadd.f32 %v2787_v12, %v2388_v33  ;;  %v2392_v33 = vmul.f32 %v1173_v41, %v1173_v41  ;;  %v7946_v12 = vld [vmem:[#allocation7 + $0xc18] sm:$0xff]  ;;  %v1180_v22 = vsub.f32 %v779_v40, %v7200_v47  ;;  %v7202_v40 = vld [vmem:[#allocation7 + $0x9c0] sm:$0xff] }
 0x320   :  { %8254 = vst [vmem:[#allocation34_spill] sm:$0xff] %v7946_v12  ;;  %v1664_v37 = vmul.f32 %v7946_v12, %v7946_v12  ;;  %v780_v12 = vld [vmem:[#allocation4 + $0x9b8] sm:$0xff] }
 0x321   :  { %v2058_v43 = vadd.f32 %v2057_v51, %v1658_v19  ;;  %v2789_v51 = vadd.f32 %v2788_v21, %v2389_v56  ;;  %v2393_v56 = vmul.f32 %v1174_v29, %v1174_v29  ;;  %v7950_v21 = vld [vmem:[#allocation7 + $0xc20] sm:$0xff]  ;;  %v1181_v42 = vsub.f32 %v780_v12, %v7201_v52  ;;  %v7203_v12 = vld [vmem:[#allocation7 + $0x9c8] sm:$0xff] }
 0x322   :  { %8255 = vst [vmem:[#allocation35_spill] sm:$0xff] %v7950_v21  ;;  %v1665_v41 = vmul.f32 %v7950_v21, %v7950_v21  ;;  %v781_v21 = vld [vmem:[#allocation4 + $0x9c0] sm:$0xff] }
 0x323   :  { %v2059_v53 = vadd.f32 %v2058_v43, %v1659_v44  ;;  %v2790_v43 = vadd.f32 %v2789_v51, %v2390_v62  ;;  %v2394_v62 = vmul.f32 %v1175_v17, %v1175_v17  ;;  %v7954_v51 = vld [vmem:[#allocation7 + $0xc28] sm:$0xff]  ;;  %v1182_v47 = vsub.f32 %v781_v21, %v7202_v40  ;;  %v7204_v21 = vld [vmem:[#allocation7 + $0x9d0] sm:$0xff] }
 0x324   :  { %8256 = vst [vmem:[#allocation36_spill] sm:$0xff] %v7954_v51  ;;  %v1666_v29 = vmul.f32 %v7954_v51, %v7954_v51  ;;  %v782_v51 = vld [vmem:[#allocation4 + $0x9c8] sm:$0xff] }
 0x325   :  { %v2060_v19 = vadd.f32 %v2059_v53, %v1660_v6  ;;  %v2791_v53 = vadd.f32 %v2790_v43, %v2391_v7  ;;  %v2395_v7 = vmul.f32 %v1176_v49, %v1176_v49  ;;  %v7958_v43 = vld [vmem:[#allocation7 + $0xc30] sm:$0xff]  ;;  %v1183_v52 = vsub.f32 %v782_v51, %v7203_v12  ;;  %v7205_v51 = vld [vmem:[#allocation7 + $0x9d8] sm:$0xff] }
 0x326   :  { %8257 = vst [vmem:[#allocation37_spill] sm:$0xff] %v7958_v43  ;;  %v1667_v17 = vmul.f32 %v7958_v43, %v7958_v43  ;;  %v783_v43 = vld [vmem:[#allocation4 + $0x9d0] sm:$0xff] }
 0x327   :  { %v2061_v44 = vadd.f32 %v2060_v19, %v1661_v8  ;;  %v2792_v19 = vadd.f32 %v2791_v53, %v2392_v33  ;;  %v2396_v33 = vmul.f32 %v1177_v4, %v1177_v4  ;;  %v7962_v53 = vld [vmem:[#allocation7 + $0xc38] sm:$0xff]  ;;  %v1184_v40 = vsub.f32 %v783_v43, %v7204_v21  ;;  %v7206_v43 = vld [vmem:[#allocation7 + $0x9e0] sm:$0xff] }
 0x328   :  { %8258 = vst [vmem:[#allocation38_spill] sm:$0xff] %v7962_v53  ;;  %v1668_v49 = vmul.f32 %v7962_v53, %v7962_v53  ;;  %v784_v53 = vld [vmem:[#allocation4 + $0x9d8] sm:$0xff] }
 0x329   :  { %v2062_v6 = vadd.f32 %v2061_v44, %v1662_v34  ;;  %v2793_v44 = vadd.f32 %v2792_v19, %v2393_v56  ;;  %v2397_v56 = vmul.f32 %v1178_v9, %v1178_v9  ;;  %v7966_v19 = vld [vmem:[#allocation7 + $0xc40] sm:$0xff]  ;;  %v1185_v12 = vsub.f32 %v784_v53, %v7205_v51  ;;  %v7207_v53 = vld [vmem:[#allocation7 + $0x9e8] sm:$0xff] }
 0x32a   :  { %8259 = vst [vmem:[#allocation39_spill] sm:$0xff] %v7966_v19  ;;  %v1669_v4 = vmul.f32 %v7966_v19, %v7966_v19  ;;  %v785_v19 = vld [vmem:[#allocation4 + $0x9e0] sm:$0xff] }
 0x32b   :  { %v2063_v8 = vadd.f32 %v2062_v6, %v1663_v0  ;;  %v2794_v6 = vadd.f32 %v2793_v44, %v2394_v62  ;;  %v2398_v62 = vmul.f32 %v1179_v1, %v1179_v1  ;;  %v7970_v44 = vld [vmem:[#allocation7 + $0xc48] sm:$0xff]  ;;  %v1186_v21 = vsub.f32 %v785_v19, %v7206_v43  ;;  %v7208_v43 = vld [vmem:[#allocation7 + $0x9f0] sm:$0xff] }
 0x32c   :  { %8260 = vst [vmem:[#allocation40_spill] sm:$0xff] %v7970_v44  ;;  %v1670_v9 = vmul.f32 %v7970_v44, %v7970_v44  ;;  %v786_v44 = vld [vmem:[#allocation4 + $0x9e8] sm:$0xff]  ;;  %v2404_v19 = vmul.f32 %v1185_v12, %v1185_v12 }
 0x32d   :  { %v2064_v34 = vadd.f32 %v2063_v8, %v1664_v37  ;;  %v2795_v8 = vadd.f32 %v2794_v6, %v2395_v7  ;;  %v2399_v7 = vmul.f32 %v1180_v22, %v1180_v22  ;;  %v7974_v6 = vld [vmem:[#allocation7 + $0xc50] sm:$0xff]  ;;  %v1187_v51 = vsub.f32 %v786_v44, %v7207_v53  ;;  %v7209_v53 = vld [vmem:[#allocation7 + $0x9f8] sm:$0xff] }
 0x32e   :  { %8261 = vst [vmem:[#allocation41_spill] sm:$0xff] %v7974_v6  ;;  %v1671_v1 = vmul.f32 %v7974_v6, %v7974_v6  ;;  %v787_v6 = vld [vmem:[#allocation4 + $0x9f0] sm:$0xff] }
 0x32f   :  { %v2065_v0 = vadd.f32 %v2064_v34, %v1665_v41  ;;  %v2796_v34 = vadd.f32 %v2795_v8, %v2396_v33  ;;  %v2400_v33 = vmul.f32 %v1181_v42, %v1181_v42  ;;  %v7978_v8 = vld [vmem:[#allocation7 + $0xc58] sm:$0xff] }
 0x330   :  { %8262 = vst [vmem:[#allocation42_spill] sm:$0xff] %v7978_v8  ;;  %v1672_v22 = vmul.f32 %v7978_v8, %v7978_v8  ;;  %v7992_v8 = vld [vmem:[#allocation7 + $0xc78] sm:$0xff] }
 0x331   :  { %v2066_v37 = vadd.f32 %v2065_v0, %v1666_v29  ;;  %v2797_v0 = vadd.f32 %v2796_v34, %v2397_v56  ;;  %v2401_v56 = vmul.f32 %v1182_v47, %v1182_v47  ;;  %v7982_v34 = vld [vmem:[#allocation7 + $0xc60] sm:$0xff]  ;;  %8266 = vst [vmem:[#allocation46_spill] sm:$0xff] %v7992_v8 }
 0x332   :  { %8263 = vst [vmem:[#allocation43_spill] sm:$0xff] %v7982_v34  ;;  %v1673_v42 = vmul.f32 %v7982_v34, %v7982_v34 }
 0x333   :  { %v2067_v41 = vadd.f32 %v2066_v37, %v1667_v17  ;;  %v2798_v37 = vadd.f32 %v2797_v0, %v2398_v62  ;;  %v2402_v62 = vmul.f32 %v1183_v52, %v1183_v52  ;;  %v7986_v0 = vld [vmem:[#allocation7 + $0xc68] sm:$0xff] }
 0x334   :  { %8264 = vst [vmem:[#allocation44_spill] sm:$0xff] %v7986_v0  ;;  %v1674_v47 = vmul.f32 %v7986_v0, %v7986_v0  ;;  %v1188_v0 = vsub.f32 %v787_v6, %v7208_v43  ;;  %v7210_v6 = vld [vmem:[#allocation7 + $0xa00] sm:$0xff] }
 0x335   :  { %v2068_v29 = vadd.f32 %v2067_v41, %v1668_v49  ;;  %v2799_v41 = vadd.f32 %v2798_v37, %v2399_v7  ;;  %v2403_v7 = vmul.f32 %v1184_v40, %v1184_v40  ;;  %v7990_v37 = vld [vmem:[#allocation7 + $0xc70] sm:$0xff]  ;;  %v1676_v40 = vmul.f32 %v7992_v8, %v7992_v8 }
 0x336   :  { %8265 = vst [vmem:[#allocation45_spill] sm:$0xff] %v7990_v37  ;;  %v1675_v52 = vmul.f32 %v7990_v37, %v7990_v37  ;;  %v2407_v8 = vmul.f32 %v1188_v0, %v1188_v0  ;;  %v794_v0 = vld [vmem:[#allocation4 + $0xa28] sm:$0xff] }
 0x337   :  { %v2069_v17 = vadd.f32 %v2068_v29, %v1669_v4  ;;  %v2800_v29 = vadd.f32 %v2799_v41, %v2400_v33  ;;  %v788_v41 = vld [vmem:[#allocation4 + $0x9f8] sm:$0xff] }
 0x338   :  { %v1189_v34 = vsub.f32 %v788_v41, %v7209_v53  ;;  %v1192_v41 = vsub.f32 %v791_v5, %v7212_v26 }
 0x339   :  { %v2070_v49 = vadd.f32 %v2069_v17, %v1670_v9  ;;  %v2801_v17 = vadd.f32 %v2800_v29, %v2401_v56  ;;  %v2405_v56 = vmul.f32 %v1186_v21, %v1186_v21  ;;  %v789_v29 = vld [vmem:[#allocation4 + $0xa00] sm:$0xff] }
 0x33a   :  { %v2408_v21 = vmul.f32 %v1189_v34, %v1189_v34  ;;  %v795_v34 = vld [vmem:[#allocation4 + $0xa30] sm:$0xff] }
 0x33b   :  { %v2071_v4 = vadd.f32 %v2070_v49, %v1671_v1  ;;  %v7994_v1 = vld [vmem:[#allocation7 + $0xc80] sm:$0x7f]  ;;  %v2802_v49 = vadd.f32 %v2801_v17, %v2402_v62  ;;  %v1190_v17 = vsub.f32 %v789_v29, %v7210_v6  ;;  %v796_v6 = vld [vmem:[#allocation4 + $0xa38] sm:$0xff] }
 0x33c   :  { %8267 = vst [vmem:[#allocation47_spill] sm:$0xff] %v7994_v1  ;;  %v790_v62 = vld [vmem:[#allocation4 + $0xa08] sm:$0xff] }
 0x33d   :  { %v2072_v9 = vadd.f32 %v2071_v4, %v1672_v22  ;;  %v1677_v22 = vmul.f32 %v7994_v1, %v7994_v1  ;;  %v2803_v4 = vadd.f32 %v2802_v49, %v2403_v7  ;;  %v7211_v1 = vld [vmem:[#allocation7 + $0xa08] sm:$0xff]  ;;  %v792_v49 = vld [vmem:[#allocation4 + $0xa18] sm:$0xff] }
 0x33f   :  { %v2073_v33 = vadd.f32 %v2072_v9, %v1673_v42  ;;  %v2406_v42 = vmul.f32 %v1187_v51, %v1187_v51  ;;  %v2804_v12 = vadd.f32 %v2803_v4, %v2404_v19  ;;  %v2078_v9 = vsel %vm2077_vm0, %v1677_v22, 0.0  ;;  %v7213_v4 = vld [vmem:[#allocation7 + $0xa18] sm:$0xff] }
 0x340   :  { %v2409_v51 = vmul.f32 %v1190_v17, %v1190_v17  ;;  %v1193_v22 = vsub.f32 %v792_v49, %v7213_v4  ;;  %v7217_v49 = vld [vmem:[#allocation7 + $0xa38] sm:$0xff]  ;;  %v7218_v4 = vld [vmem:[#allocation7 + $0xa40] sm:$0xff] }
 0x341   :  { %v2074_v44 = vadd.f32 %v2073_v33, %v1674_v47  ;;  %v2805_v27 = vadd.f32 %v2804_v12, %v2405_v56  ;;  %v1191_v47 = vsub.f32 %v790_v62, %v7211_v1  ;;  %v2411_v1 = vmul.f32 %v1192_v41, %v1192_v41 }
 0x342   :  { %v2412_v26 = vmul.f32 %v1193_v22, %v1193_v22 }
 0x343   :  { %v2075_v37 = vadd.f32 %v2074_v44, %v1675_v52  ;;  %v2806_v7 = vadd.f32 %v2805_v27, %v2406_v42  ;;  %v793_v44 = vld [vmem:[#allocation4 + $0xa20] sm:$0xff]  ;;  %v2410_v29 = vmul.f32 %v1191_v47, %v1191_v47  ;;  %v7215_v27 = vld [vmem:[#allocation7 + $0xa28] sm:$0xff] }
 0x344   :  { %v1195_v42 = vsub.f32 %v794_v0, %v7215_v27  ;;  %v797_v47 = vld [vmem:[#allocation4 + $0xa40] sm:$0xff] }
 0x345   :  { %v2076_v43 = vadd.f32 %v2075_v37, %v1676_v40  ;;  %v2807_v19 = vadd.f32 %v2806_v7, %v2407_v8  ;;  %v7214_v40 = vld [vmem:[#allocation7 + $0xa20] sm:$0xff]  ;;  %v7216_v8 = vld [vmem:[#allocation7 + $0xa30] sm:$0xff] }
 0x346   :  { %v1194_v56 = vsub.f32 %v793_v44, %v7214_v40  ;;  %v1196_v17 = vsub.f32 %v795_v34, %v7216_v8  ;;  %v2414_v44 = vmul.f32 %v1195_v42, %v1195_v42  ;;  %v7219_v40 = vld [vmem:[#allocation7 + $0xa48] sm:$0xff]  ;;  %v7220_v34 = vld [vmem:[#allocation7 + $0xa50] sm:$0xff]  ;;  %v7221_v42 = vld [vmem:[#allocation7 + $0xa58] sm:$0xff] }
 0x347   :  { %v2079_v33 = vadd.f32 %v2078_v9, %v2076_v43  ;;  %v2808_v37 = vadd.f32 %v2807_v19, %v2408_v21  ;;  %v1276_v21 = vld [vmem:[#allocation2] sm:$0x1] }
 0x348   :  { %v2413_v7 = vmul.f32 %v1194_v56, %v1194_v56 }
 0x349   :  { %v2080_v52 = vrot.slane %v2079_v33, 4  ;;  %v2809_v62 = vadd.f32 %v2808_v37, %v2409_v51  ;;  %v798_v51 = vld [vmem:[#allocation4 + $0xa48] sm:$0xff]  ;;  %v1198_v37 = vsub.f32 %v797_v47, %v7218_v4 }
 0x34a   :  { %v7222_v47 = vld [vmem:[#allocation7 + $0xa60] sm:$0xff] }
 0x34b   :  { %v2081_v53 = vadd.f32 %v2080_v52, %v2079_v33  ;;  %v2810_v5 = vadd.f32 %v2809_v62, %v2410_v29  ;;  %v1197_v52 = vsub.f32 %v796_v6, %v7217_v49  ;;  %v799_v29 = vld [vmem:[#allocation4 + $0xa50] sm:$0xff] }
 0x34c   :  { %v1200_v27 = vsub.f32 %v799_v29, %v7220_v34  ;;  %v803_v49 = vld [vmem:[#allocation4 + $0xa70] sm:$0xff] }
 0x34d   :  { %v2082_v12 = vrot.slane %v2081_v53, 2  ;;  %v2811_v33 = vadd.f32 %v2810_v5, %v2411_v1  ;;  %v2416_v62 = vmul.f32 %v1197_v52, %v1197_v52  ;;  %v800_v1 = vld [vmem:[#allocation4 + $0xa58] sm:$0xff]  ;;  %v2417_v5 = vmul.f32 %v1198_v37, %v1198_v37 }
 0x34f   :  { %v2083_v9 = vadd.f32 %v2082_v12, %v2081_v53  ;;  %v2812_v41 = vadd.f32 %v2811_v33, %v2412_v26  ;;  %v2415_v53 = vmul.f32 %v1196_v17, %v1196_v17  ;;  %v1199_v12 = vsub.f32 %v798_v51, %v7219_v40  ;;  %v802_v33 = vld [vmem:[#allocation4 + $0xa68] sm:$0xff] }
 0x350   :  { %v1201_v26 = vsub.f32 %v800_v1, %v7221_v42  ;;  %v1204_v51 = vsub.f32 %v803_v49, %v7733_v61  ;;  %v806_v40 = vld [vmem:[#allocation4 + $0xa88] sm:$0xff]  ;;  %v807_v1 = vld [vmem:[#allocation4 + $0xa90] sm:$0xff]  ;;  %v809_v42 = vld [vmem:[#allocation4 + $0xaa0] sm:$0xff] }
 0x351   :  { %v2084_v43 = vrot.slane %v2083_v9, 1  ;;  %v2813_v22 = vadd.f32 %v2812_v41, %v2413_v7  ;;  %v2418_v8 = vmul.f32 %v1199_v12, %v1199_v12  ;;  %v2419_v7 = vmul.f32 %v1200_v27, %v1200_v27  ;;  %v804_v41 = vld [vmem:[#allocation4 + $0xa78] sm:$0xff] }
 0x352   :  { %v2420_v52 = vmul.f32 %v1201_v26, %v1201_v26  ;;  %v1208_v61 = vsub.f32 %v807_v1, %v7749_v58  ;;  %v812_v49 = vld [vmem:[#allocation4 + $0xab8] sm:$0xff] }
 0x353   :  { %v2085_v19 = vadd.f32 %v2084_v43, %v2083_v9  ;;  %v2814_v56 = vadd.f32 %v2813_v22, %v2414_v44  ;;  %v801_v9 = vld [vmem:[#allocation4 + $0xa60] sm:$0xff] }
 0x354   :  { %v1202_v17 = vsub.f32 %v801_v9, %v7222_v47 }
 0x355   :  { %v2086_v0 = vadd.f32 %v2085_v19, %v1276_v21  ;;  %v2815_v6 = vadd.f32 %v2814_v56, %v2415_v53  ;;  %v1203_v19 = vsub.f32 %v802_v33, %v7729_v20  ;;  %v1205_v53 = vsub.f32 %v804_v41, %v7737_v59 }
 0x356   :  { %v2421_v4 = vmul.f32 %v1202_v17, %v1202_v17  ;;  %v1207_v20 = vsub.f32 %v806_v40, %v7745_v15  ;;  %v2427_v33 = vmul.f32 %v1208_v61, %v1208_v61  ;;  %v811_v17 = vld [vmem:[#allocation4 + $0xab0] sm:$0xff]  ;;  %v816_v40 = vld [vmem:[#allocation4 + $0xad8] sm:$0xff] }
 0x357   :  { %2087 = vst [vmem:[#allocation2] sm:$0x1] %v2086_v0  ;;  %v2816_v43 = vadd.f32 %v2815_v6, %v2416_v62  ;;  %v805_v0 = vld [vmem:[#allocation4 + $0xa80] sm:$0xff]  ;;  %v2422_v22 = vmul.f32 %v1203_v19, %v1203_v19  ;;  %v2423_v62 = vmul.f32 %v1204_v51, %v1204_v51  ;;  %v2424_v34 = vmul.f32 %v1205_v53, %v1205_v53  ;;  %v815_v53 = vld [vmem:[#allocation4 + $0xad0] sm:$0xff] }
 0x358   :  { %v1206_v12 = vsub.f32 %v805_v0, %v7741_v55  ;;  %v2426_v26 = vmul.f32 %v1207_v20, %v1207_v20  ;;  %v1210_v55 = vsub.f32 %v809_v42, %v7757_v60  ;;  %v1212_v58 = vsub.f32 %v811_v17, %v7766_v54 }
 0x359   :  { %v2817_v21 = vadd.f32 %v2816_v43, %v2417_v5  ;;  %v808_v5 = vld [vmem:[#allocation4 + $0xa98] sm:$0xff]  ;;  %v810_v43 = vld [vmem:[#allocation4 + $0xaa8] sm:$0xff]  ;;  %v1216_v54 = vsub.f32 %v815_v53, %v7782_v11 }
 0x35a   :  { %v2425_v6 = vmul.f32 %v1206_v12, %v1206_v12  ;;  %v1209_v59 = vsub.f32 %v808_v5, %v7753_v32  ;;  %v1211_v15 = vsub.f32 %v810_v43, %v7761_v57  ;;  %v2429_v19 = vmul.f32 %v1210_v55, %v1210_v55  ;;  %v820_v11 = vld [vmem:[#allocation4 + $0xaf8] sm:$0xff] }
 0x35b   :  { %v2818_v44 = vadd.f32 %v2817_v21, %v2418_v8  ;;  %v1213_v32 = vsub.f32 %v812_v49, %v7770_v23  ;;  %v1217_v23 = vsub.f32 %v816_v40, %v7786_v18  ;;  %v821_v18 = vld [vmem:[#allocation4 + $0xb00] sm:$0xff]  ;;  %v1221_v43 = vsub.f32 %v820_v11, %v7802_v50 }
 0x35c   :  { %v2430_v41 = vmul.f32 %v1211_v15, %v1211_v15  ;;  %v829_v40 = vld [vmem:[#allocation4 + $0xb40] sm:$0xff] }
 0x35d   :  { %v2819_v37 = vadd.f32 %v2818_v44, %v2419_v7  ;;  %v2428_v7 = vmul.f32 %v1209_v59, %v1209_v59  ;;  %v813_v44 = vld [vmem:[#allocation4 + $0xac0] sm:$0xff] }
 0x35e   :  { %v1214_v60 = vsub.f32 %v813_v44, %v7774_v45  ;;  %v6938_v61 = vld [vmem:[#allocation2] sm:$0x1]  ;;  %v825_v44 = vld [vmem:[#allocation4 + $0xb20] sm:$0xff] }
 0x35f   :  { %v2820_v29 = vadd.f32 %v2819_v37, %v2420_v52  ;;  %v2431_v37 = vmul.f32 %v1212_v58, %v1212_v58  ;;  %6939 = vst [vmem:[#allocation9] sm:$0x1] %v6938_v61  ;;  %v824_v58 = vld [vmem:[#allocation4 + $0xb18] sm:$0xff]  ;;  %v833_v61 = vld [vmem:[#allocation4 + $0xb60] sm:$0xff] }
 0x360   :  { %v2433_v12 = vmul.f32 %v1214_v60, %v1214_v60  ;;  %v1225_v50 = vsub.f32 %v824_v58, %v7818_v46  ;;  %v839_v58 = vld [vmem:[#allocation4 + $0xb90] sm:$0xff] }
 0x361   :  { %v2821_v56 = vadd.f32 %v2820_v29, %v2421_v4  ;;  %v814_v4 = vld [vmem:[#allocation4 + $0xac8] sm:$0xff] }
 0x362   :  { %v1215_v57 = vsub.f32 %v814_v4, %v7778_v10 }
 0x363   :  { %v2822_v27 = vadd.f32 %v2821_v56, %v2422_v22  ;;  %v2432_v22 = vmul.f32 %v1213_v32, %v1213_v32  ;;  %v817_v56 = vld [vmem:[#allocation4 + $0xae0] sm:$0xff] }
 0x364   :  { %v2434_v1 = vmul.f32 %v1215_v57, %v1215_v57  ;;  %v1218_v45 = vsub.f32 %v817_v56, %v7790_v3  ;;  %v822_v3 = vld [vmem:[#allocation4 + $0xb08] sm:$0xff]  ;;  %v828_v57 = vld [vmem:[#allocation4 + $0xb38] sm:$0xff] }
 0x365   :  { %v2823_v9 = vadd.f32 %v2822_v27, %v2423_v62  ;;  %v2435_v27 = vmul.f32 %v1216_v54, %v1216_v54  ;;  %v1229_v46 = vsub.f32 %v828_v57, %v7834_v38 }
 0x367   :  { %v2824_v8 = vadd.f32 %v2823_v9, %v2424_v34  ;;  %v818_v34 = vld [vmem:[#allocation4 + $0xae8] sm:$0xff]  ;;  %v2436_v9 = vmul.f32 %v1217_v23, %v1217_v23 }
 0x368   :  { %v1219_v10 = vsub.f32 %v818_v34, %v7794_v14  ;;  %v1223_v14 = vsub.f32 %v822_v3, %v7810_v31  ;;  %v837_v3 = vld [vmem:[#allocation4 + $0xb80] sm:$0xff] }
 0x369   :  { %v2825_v47 = vadd.f32 %v2824_v8, %v2425_v6  ;;  %v819_v6 = vld [vmem:[#allocation4 + $0xaf0] sm:$0xff] }
 0x36a   :  { %v1220_v59 = vsub.f32 %v819_v6, %v7798_v28  ;;  %v2438_v55 = vmul.f32 %v1219_v10, %v1219_v10  ;;  %v2442_v32 = vmul.f32 %v1223_v14, %v1223_v14  ;;  %v8270_v14 = vld [vmem:[#allocation15_spill] sm:$0xff] }
 0x36b   :  { %v2826_v21 = vadd.f32 %v2825_v47, %v2426_v26  ;;  %v2437_v26 = vmul.f32 %v1218_v45, %v1218_v45  ;;  %v1222_v47 = vsub.f32 %v821_v18, %v7806_v36  ;;  %v1226_v36 = vsub.f32 %v825_v44, %v7822_v24  ;;  %v832_v45 = vld [vmem:[#allocation4 + $0xb58] sm:$0xff] }
 0x36c   :  { %v2439_v17 = vmul.f32 %v1220_v59, %v1220_v59  ;;  %v1230_v24 = vsub.f32 %v829_v40, %v7838_v30  ;;  %v1233_v38 = vsub.f32 %v832_v45, %v7850_v35  ;;  %v1234_v30 = vsub.f32 %v833_v61, %v7854_v63  ;;  %v835_v59 = vld [vmem:[#allocation4 + $0xb70] sm:$0xff]  ;;  %v836_v18 = vld [vmem:[#allocation4 + $0xb78] sm:$0xff] }
 0x36d   :  { %v2827_v52 = vadd.f32 %v2826_v21, %v2427_v33  ;;  %v2440_v21 = vmul.f32 %v1221_v43, %v1221_v43  ;;  %v8268_v43 = vld [vmem:[#allocation13_spill] sm:$0xff]  ;;  %v1238_v63 = vsub.f32 %v837_v3, %v8270_v14  ;;  %v8275_v40 = vld [vmem:[#allocation20_spill] sm:$0xff] }
 0x36e   :  { %v840_v44 = vld [vmem:[#allocation4 + $0xb98] sm:$0xff]  ;;  %v851_v14 = vld [vmem:[#allocation4 + $0xbf0] sm:$0xff] }
 0x36f   :  { %v2828_v51 = vadd.f32 %v2827_v52, %v2428_v7  ;;  %v823_v7 = vld [vmem:[#allocation4 + $0xb10] sm:$0xff] }
 0x370   :  { %v1224_v28 = vsub.f32 %v823_v7, %v7814_v25  ;;  %v838_v7 = vld [vmem:[#allocation4 + $0xb88] sm:$0xff] }
 0x371   :  { %v2829_v0 = vadd.f32 %v2828_v51, %v2429_v19  ;;  %v2441_v19 = vmul.f32 %v1222_v47, %v1222_v47  ;;  %v826_v51 = vld [vmem:[#allocation4 + $0xb28] sm:$0xff]  ;;  %v8269_v47 = vld [vmem:[#allocation14_spill] sm:$0xff] }
 0x372   :  { %v2443_v4 = vmul.f32 %v1224_v28, %v1224_v28  ;;  %v1227_v31 = vsub.f32 %v826_v51, %v7826_v2  ;;  %v1237_v35 = vsub.f32 %v836_v18, %v8269_v47  ;;  %v8271_v28 = vld [vmem:[#allocation16_spill] sm:$0xff] }
 0x373   :  { %v2830_v29 = vadd.f32 %v2829_v0, %v2430_v41  ;;  %v2444_v0 = vmul.f32 %v1225_v50, %v1225_v50  ;;  %v8272_v50 = vld [vmem:[#allocation17_spill] sm:$0xff]  ;;  %v850_v47 = vld [vmem:[#allocation4 + $0xbe8] sm:$0xff] }
 0x374   :  { %v2446_v54 = vmul.f32 %v1227_v31, %v1227_v31 }
 0x375   :  { %v2831_v62 = vadd.f32 %v2830_v29, %v2431_v37  ;;  %v827_v37 = vld [vmem:[#allocation4 + $0xb30] sm:$0xff] }
 0x376   :  { %v1228_v25 = vsub.f32 %v827_v37, %v7830_v16 }
 0x377   :  { %v2832_v20 = vadd.f32 %v2831_v62, %v2432_v22  ;;  %v2445_v22 = vmul.f32 %v1226_v36, %v1226_v36  ;;  %v830_v62 = vld [vmem:[#allocation4 + $0xb48] sm:$0xff]  ;;  %v841_v36 = vld [vmem:[#allocation4 + $0xba0] sm:$0xff] }
 0x378   :  { %v2447_v56 = vmul.f32 %v1228_v25, %v1228_v25  ;;  %v1231_v2 = vsub.f32 %v830_v62, %v7842_v39  ;;  %v844_v62 = vld [vmem:[#allocation4 + $0xbb8] sm:$0xff] }
 0x379   :  { %v2833_v5 = vadd.f32 %v2832_v20, %v2433_v12  ;;  %v2448_v20 = vmul.f32 %v1229_v46, %v1229_v46 }
 0x37a   :  { %v2450_v6 = vmul.f32 %v1231_v2, %v1231_v2  ;;  %v845_v2 = vld [vmem:[#allocation4 + $0xbc0] sm:$0xff] }
 0x37b   :  { %v2834_v42 = vadd.f32 %v2833_v5, %v2434_v1  ;;  %v831_v1 = vld [vmem:[#allocation4 + $0xb50] sm:$0xff] }
 0x37c   :  { %v1232_v16 = vsub.f32 %v831_v1, %v7846_v48  ;;  %v1236_v48 = vsub.f32 %v835_v59, %v8268_v43  ;;  %v848_v59 = vld [vmem:[#allocation4 + $0xbd8] sm:$0xff]  ;;  %v849_v43 = vld [vmem:[#allocation4 + $0xbe0] sm:$0xff] }
 0x37d   :  { %v2835_v8 = vadd.f32 %v2834_v42, %v2435_v27  ;;  %v2449_v27 = vmul.f32 %v1230_v24, %v1230_v24  ;;  %v8276_v24 = vld [vmem:[#allocation21_spill] sm:$0xff] }
 0x37e   :  { %v2451_v42 = vmul.f32 %v1232_v16, %v1232_v16 }
 0x37f   :  { %v2836_v33 = vadd.f32 %v2835_v8, %v2436_v9  ;;  %v834_v9 = vld [vmem:[#allocation4 + $0xb68] sm:$0xff] }
 0x380   :  { %v1235_v39 = vsub.f32 %v834_v9, %v7858_v13  ;;  %v1239_v13 = vsub.f32 %v838_v7, %v8271_v28  ;;  %v8279_v9 = vld [vmem:[#allocation24_spill] sm:$0xff]  ;;  %v852_v28 = vld [vmem:[#allocation4 + $0xbf8] sm:$0xff] }
 0x381   :  { %v2837_v15 = vadd.f32 %v2836_v33, %v2437_v26  ;;  %v2452_v26 = vmul.f32 %v1233_v38, %v1233_v38 }
 0x382   :  { %v2458_v37 = vmul.f32 %v1239_v13, %v1239_v13  ;;  %v8284_v13 = vld [vmem:[#allocation29_spill] sm:$0xff] }
 0x383   :  { %v2838_v49 = vadd.f32 %v2837_v15, %v2438_v55  ;;  %v2453_v55 = vmul.f32 %v1234_v30, %v1234_v30 }
 0x385   :  { %v2839_v52 = vadd.f32 %v2838_v49, %v2439_v17  ;;  %v2454_v17 = vmul.f32 %v1235_v39, %v1235_v39  ;;  %v8280_v39 = vld [vmem:[#allocation25_spill] sm:$0xff] }
 0x387   :  { %v2840_v41 = vadd.f32 %v2839_v52, %v2440_v21  ;;  %v2455_v21 = vmul.f32 %v1236_v48, %v1236_v48  ;;  %v8281_v48 = vld [vmem:[#allocation26_spill] sm:$0xff] }
 0x389   :  { %v2841_v60 = vadd.f32 %v2840_v41, %v2441_v19  ;;  %v2456_v19 = vmul.f32 %v1237_v35, %v1237_v35  ;;  %v2457_v41 = vmul.f32 %v1238_v63, %v1238_v63  ;;  %v8282_v35 = vld [vmem:[#allocation27_spill] sm:$0xff]  ;;  %v8283_v63 = vld [vmem:[#allocation28_spill] sm:$0xff] }
 0x38b   :  { %v2842_v53 = vadd.f32 %v2841_v60, %v2442_v32  ;;  %v1240_v32 = vsub.f32 %v839_v58, %v8272_v50  ;;  %v853_v50 = vld [vmem:[#allocation4 + $0xc00] sm:$0xff] }
 0x38d   :  { %v2843_v29 = vadd.f32 %v2842_v53, %v2443_v4  ;;  %v8273_v4 = vld [vmem:[#allocation18_spill] sm:$0xff]  ;;  %v8274_v53 = vld [vmem:[#allocation19_spill] sm:$0xff]  ;;  %v2459_v25 = vmul.f32 %v1240_v32, %v1240_v32 }
 0x38e   :  { %v1241_v60 = vsub.f32 %v840_v44, %v8273_v4  ;;  %v1242_v57 = vsub.f32 %v841_v36, %v8274_v53  ;;  %v8285_v32 = vld [vmem:[#allocation30_spill] sm:$0xff]  ;;  %v854_v4 = vld [vmem:[#allocation4 + $0xc08] sm:$0xff]  ;;  %v855_v53 = vld [vmem:[#allocation4 + $0xc10] sm:$0xff] }
 0x38f   :  { %v2844_v12 = vadd.f32 %v2843_v29, %v2444_v0  ;;  %v842_v0 = vld [vmem:[#allocation4 + $0xba8] sm:$0xff]  ;;  %v843_v29 = vld [vmem:[#allocation4 + $0xbb0] sm:$0xff] }
 0x390   :  { %v1243_v46 = vsub.f32 %v842_v0, %v8275_v40  ;;  %v856_v40 = vld [vmem:[#allocation4 + $0xc18] sm:$0xff] }
 0x391   :  { %v2845_v23 = vadd.f32 %v2844_v12, %v2445_v22 }
 0x392   :  { %v2462_v45 = vmul.f32 %v1243_v46, %v1243_v46  ;;  %v8288_v46 = vld [vmem:[#allocation33_spill] sm:$0xff] }
 0x393   :  { %v2846_v34 = vadd.f32 %v2845_v23, %v2446_v54  ;;  %v2460_v54 = vmul.f32 %v1241_v60, %v1241_v60  ;;  %v2461_v23 = vmul.f32 %v1242_v57, %v1242_v57  ;;  %v8286_v60 = vld [vmem:[#allocation31_spill] sm:$0xff]  ;;  %v8287_v57 = vld [vmem:[#allocation32_spill] sm:$0xff] }
 0x395   :  { %v2847_v5 = vadd.f32 %v2846_v34, %v2447_v56  ;;  %v1244_v56 = vsub.f32 %v843_v29, %v8276_v24  ;;  %v857_v24 = vld [vmem:[#allocation4 + $0xc20] sm:$0xff] }
 0x397   :  { %v2848_v10 = vadd.f32 %v2847_v5, %v2448_v20  ;;  %v8277_v20 = vld [vmem:[#allocation22_spill] sm:$0xff]  ;;  %v8278_v5 = vld [vmem:[#allocation23_spill] sm:$0xff]  ;;  %v2463_v38 = vmul.f32 %v1244_v56, %v1244_v56 }
 0x398   :  { %v1245_v34 = vsub.f32 %v844_v62, %v8277_v20  ;;  %v1246_v61 = vsub.f32 %v845_v2, %v8278_v5  ;;  %v8289_v56 = vld [vmem:[#allocation34_spill] sm:$0xff]  ;;  %v858_v20 = vld [vmem:[#allocation4 + $0xc28] sm:$0xff]  ;;  %v859_v5 = vld [vmem:[#allocation4 + $0xc30] sm:$0xff] }
 0x399   :  { %v2849_v11 = vadd.f32 %v2848_v10, %v2449_v27  ;;  %v846_v27 = vld [vmem:[#allocation4 + $0xbc8] sm:$0xff]  ;;  %v847_v10 = vld [vmem:[#allocation4 + $0xbd0] sm:$0xff] }
 0x39a   :  { %v1247_v30 = vsub.f32 %v846_v27, %v8279_v9  ;;  %v860_v9 = vld [vmem:[#allocation4 + $0xc38] sm:$0xff] }
 0x39b   :  { %v2850_v8 = vadd.f32 %v2849_v11, %v2450_v6 }
 0x39d   :  { %v2851_v33 = vadd.f32 %v2850_v8, %v2451_v42  ;;  %v2464_v42 = vmul.f32 %v1245_v34, %v1245_v34  ;;  %v2465_v8 = vmul.f32 %v1246_v61, %v1246_v61  ;;  %v8290_v34 = vld [vmem:[#allocation35_spill] sm:$0xff]  ;;  %v8291_v61 = vld [vmem:[#allocation36_spill] sm:$0xff] }
 0x39f   :  { %v2852_v15 = vadd.f32 %v2851_v33, %v2452_v26  ;;  %v1248_v26 = vsub.f32 %v847_v10, %v8280_v39  ;;  %v2466_v33 = vmul.f32 %v1247_v30, %v1247_v30  ;;  %v8292_v30 = vld [vmem:[#allocation37_spill] sm:$0xff]  ;;  %v861_v39 = vld [vmem:[#allocation4 + $0xc40] sm:$0xff] }
 0x3a1   :  { %v2853_v49 = vadd.f32 %v2852_v15, %v2453_v55  ;;  %v1249_v55 = vsub.f32 %v848_v59, %v8281_v48  ;;  %v2467_v15 = vmul.f32 %v1248_v26, %v1248_v26  ;;  %v8293_v26 = vld [vmem:[#allocation38_spill] sm:$0xff]  ;;  %v862_v48 = vld [vmem:[#allocation4 + $0xc48] sm:$0xff] }
 0x3a3   :  { %v2854_v52 = vadd.f32 %v2853_v49, %v2454_v17  ;;  %v1250_v17 = vsub.f32 %v849_v43, %v8282_v35  ;;  %v2468_v49 = vmul.f32 %v1249_v55, %v1249_v55  ;;  %v8294_v55 = vld [vmem:[#allocation39_spill] sm:$0xff]  ;;  %v863_v35 = vld [vmem:[#allocation4 + $0xc50] sm:$0xff] }
 0x3a5   :  { %v2855_v51 = vadd.f32 %v2854_v52, %v2455_v21  ;;  %v1251_v21 = vsub.f32 %v850_v47, %v8283_v63  ;;  %v2469_v52 = vmul.f32 %v1250_v17, %v1250_v17  ;;  %v8295_v17 = vld [vmem:[#allocation40_spill] sm:$0xff]  ;;  %v864_v63 = vld [vmem:[#allocation4 + $0xc58] sm:$0xff] }
 0x3a7   :  { %v2856_v31 = vadd.f32 %v2855_v51, %v2456_v19  ;;  %v1252_v19 = vsub.f32 %v851_v14, %v8284_v13  ;;  %v2470_v51 = vmul.f32 %v1251_v21, %v1251_v21  ;;  %v8296_v21 = vld [vmem:[#allocation41_spill] sm:$0xff]  ;;  %v865_v13 = vld [vmem:[#allocation4 + $0xc60] sm:$0xff] }
 0x3a9   :  { %v2857_v22 = vadd.f32 %v2856_v31, %v2457_v41  ;;  %v1253_v41 = vsub.f32 %v852_v28, %v8285_v32  ;;  %v2471_v31 = vmul.f32 %v1252_v19, %v1252_v19  ;;  %v8297_v19 = vld [vmem:[#allocation42_spill] sm:$0xff]  ;;  %v866_v32 = vld [vmem:[#allocation4 + $0xc68] sm:$0xff] }
 0x3ab   :  { %v2858_v12 = vadd.f32 %v2857_v22, %v2458_v37  ;;  %v1254_v37 = vsub.f32 %v853_v50, %v8286_v60  ;;  %v2472_v22 = vmul.f32 %v1253_v41, %v1253_v41  ;;  %v8298_v41 = vld [vmem:[#allocation43_spill] sm:$0xff]  ;;  %v867_v60 = vld [vmem:[#allocation4 + $0xc70] sm:$0xff] }
 0x3ad   :  { %v2859_v1 = vadd.f32 %v2858_v12, %v2459_v25  ;;  %v1255_v25 = vsub.f32 %v854_v4, %v8287_v57  ;;  %v2473_v12 = vmul.f32 %v1254_v37, %v1254_v37  ;;  %v869_v37 = vld [vmem:[#allocation4 + $0xc80] sm:$0x7f] }
 0x3af   :  { %v2860_v16 = vadd.f32 %v2859_v1, %v2460_v54  ;;  %v1256_v54 = vsub.f32 %v855_v53, %v8288_v46  ;;  %v2474_v1 = vmul.f32 %v1255_v25, %v1255_v25  ;;  %v868_v25 = vld [vmem:[#allocation4 + $0xc78] sm:$0xff] }
 0x3b1   :  { %v2861_v6 = vadd.f32 %v2860_v16, %v2461_v23  ;;  %v1257_v23 = vsub.f32 %v856_v40, %v8289_v56  ;;  %v2475_v16 = vmul.f32 %v1256_v54, %v1256_v54  ;;  %v8301_v54 = vld [vmem:[#allocation47_spill] sm:$0xff] }
 0x3b3   :  { %v2862_v11 = vadd.f32 %v2861_v6, %v2462_v45  ;;  %v1258_v45 = vsub.f32 %v857_v24, %v8290_v34  ;;  %v2476_v6 = vmul.f32 %v1257_v23, %v1257_v23 }
 0x3b5   :  { %v2863_v18 = vadd.f32 %v2862_v11, %v2463_v38  ;;  %v1259_v38 = vsub.f32 %v858_v20, %v8291_v61  ;;  %v2477_v11 = vmul.f32 %v1258_v45, %v1258_v45 }
 0x3b7   :  { %v2864_v3 = vadd.f32 %v2863_v18, %v2464_v42  ;;  %v1260_v42 = vsub.f32 %v859_v5, %v8292_v30  ;;  %v2478_v18 = vmul.f32 %v1259_v38, %v1259_v38 }
 0x3b9   :  { %v2865_v7 = vadd.f32 %v2864_v3, %v2465_v8  ;;  %v1261_v8 = vsub.f32 %v860_v9, %v8293_v26  ;;  %v2479_v3 = vmul.f32 %v1260_v42, %v1260_v42  ;;  %v2088_v42 = vld [vmem:[#allocation3] sm:$0x1] }
 0x3bb   :  { %v2866_v58 = vadd.f32 %v2865_v7, %v2466_v33  ;;  %v1262_v33 = vsub.f32 %v861_v39, %v8294_v55  ;;  %v2480_v7 = vmul.f32 %v1261_v8, %v1261_v8 }
 0x3bd   :  { %v2867_v44 = vadd.f32 %v2866_v58, %v2467_v15  ;;  %v1263_v15 = vsub.f32 %v862_v48, %v8295_v17  ;;  %v2481_v58 = vmul.f32 %v1262_v33, %v1262_v33 }
 0x3bf   :  { %v2868_v36 = vadd.f32 %v2867_v44, %v2468_v49  ;;  %v1264_v49 = vsub.f32 %v863_v35, %v8296_v21  ;;  %v2482_v44 = vmul.f32 %v1263_v15, %v1263_v15 }
 0x3c1   :  { %v2869_v0 = vadd.f32 %v2868_v36, %v2469_v52  ;;  %v1265_v52 = vsub.f32 %v864_v63, %v8297_v19  ;;  %v2483_v36 = vmul.f32 %v1264_v49, %v1264_v49 }
 0x3c3   :  { %v2870_v29 = vadd.f32 %v2869_v0, %v2470_v51  ;;  %v1266_v51 = vsub.f32 %v865_v13, %v8298_v41  ;;  %v2484_v53 = vmul.f32 %v1265_v52, %v1265_v52 }
 0x3c5   :  { %v2871_v62 = vadd.f32 %v2870_v29, %v2471_v31  ;;  %v8299_v31 = vld [vmem:[#allocation44_spill] sm:$0xff]  ;;  %v2485_v40 = vmul.f32 %v1266_v51, %v1266_v51 }
 0x3c6   :  { %v1267_v0 = vsub.f32 %v866_v32, %v8299_v31 }
 0x3c7   :  { %v2872_v2 = vadd.f32 %v2871_v62, %v2472_v22  ;;  %v8300_v22 = vld [vmem:[#allocation45_spill] sm:$0xff]  ;;  %v8302_v62 = vld [vmem:[#allocation46_spill] sm:$0xff] }
 0x3c8   :  { %v1268_v29 = vsub.f32 %v867_v60, %v8300_v22  ;;  %v1269_v24 = vsub.f32 %v868_v25, %v8302_v62  ;;  %v2486_v56 = vmul.f32 %v1267_v0, %v1267_v0 }
 0x3c9   :  { %v2873_v27 = vadd.f32 %v2872_v2, %v2473_v12  ;;  %v1270_v12 = vsub.f32 %v869_v37, %v8301_v54 }
 0x3ca   :  { %v2488_v34 = vmul.f32 %v1269_v24, %v1269_v24 }
 0x3cb   :  { %v2874_v10 = vadd.f32 %v2873_v27, %v2474_v1  ;;  %v2487_v1 = vmul.f32 %v1268_v29, %v1268_v29  ;;  %v2489_v20 = vmul.f32 %v1270_v12, %v1270_v12 }
 0x3cd   :  { %v2875_v59 = vadd.f32 %v2874_v10, %v2475_v16  ;;  %v2889_v27 = vsel %vm2077_vm0, %v2489_v20, 0.0 }
 0x3cf   :  { %v2876_v43 = vadd.f32 %v2875_v59, %v2476_v6 }
 0x3d1   :  { %v2877_v47 = vadd.f32 %v2876_v43, %v2477_v11 }
 0x3d3   :  { %v2878_v14 = vadd.f32 %v2877_v47, %v2478_v18 }
 0x3d5   :  { %v2879_v28 = vadd.f32 %v2878_v14, %v2479_v3 }
 0x3d7   :  { %v2880_v50 = vadd.f32 %v2879_v28, %v2480_v7 }
 0x3d9   :  { %v2881_v4 = vadd.f32 %v2880_v50, %v2481_v58 }
 0x3db   :  { %v2882_v57 = vadd.f32 %v2881_v4, %v2482_v44 }
 0x3dd   :  { %v2883_v46 = vadd.f32 %v2882_v57, %v2483_v36 }
 0x3df   :  { %v2884_v23 = vadd.f32 %v2883_v46, %v2484_v53 }
 0x3e1   :  { %v2885_v2 = vadd.f32 %v2884_v23, %v2485_v40 }
 0x3e3   :  { %v2886_v45 = vadd.f32 %v2885_v2, %v2486_v56 }
 0x3e5   :  { %v2887_v16 = vadd.f32 %v2886_v45, %v2487_v1 }
 0x3e7   :  { %v2888_v5 = vadd.f32 %v2887_v16, %v2488_v34 }
 0x3e9   :  { %v2890_v61 = vadd.f32 %v2889_v27, %v2888_v5 }
 0x3eb   :  { %v2891_v38 = vrot.slane %v2890_v61, 4 }
 0x3ed   :  { %v2892_v6 = vadd.f32 %v2891_v38, %v2890_v61 }
 0x3ef   :  { %v2893_v10 = vrot.slane %v2892_v6, 2 }
 0x3f1   :  { %v2894_v9 = vadd.f32 %v2893_v10, %v2892_v6 }
 0x3f3   :  { %v2895_v30 = vrot.slane %v2894_v9, 1 }
 0x3f5   :  { %v2896_v11 = vadd.f32 %v2895_v30, %v2894_v9 }
 0x3f7   :  { %v2897_v59 = vadd.f32 %v2896_v11, %v2088_v42 }
 0x3f9   :  { %2898 = vst [vmem:[#allocation3] sm:$0x1] %v2897_v59 }
 0x400   :  { %v6940_v39 = vld [vmem:[#allocation3] sm:$0x1] }
 0x401   :  { %6941 = vst [vmem:[#allocation9 + $0x1] sm:$0x1] %v6940_v39 }
 0x402   :  { %7278 = shalt.err (!%p7275_p6)
}
 0x403   :  { %s7279_s10 = scalar_lea.hbm %s8086_s2, 32 }
 0x404   :  { %p7280_p7 = scmp.ne.s32.totalorder %s8086_s2, %s7279_s10  ;;  %p7283_p8 = scmp.lt.u32.totalorder %s7279_s10, %s8086_s2 }
 0x406   :  { %p7285_p9 = pnand %p7283_p8, %p7280_p7 }
 0x408   :  { %7288 = shalt.err (!%p7285_p9)
}
 0x409   :  { %6951 = dma.vmem_to_hbm [thread:$0]  %s6949_s6, 32, %s8086_s2, [#allocation6]  }
 0x40a   :  { %7293 = dma.done.wait [#allocation6], 32  }
 0x40b   :  { %7294 = vsyncadd [#allocation6], 4294967264 }
 0x40c   :  { %6955 = vsyncpa [#allocation5], 1 }
 0x40d   :  { %6956 = vsyncpa [#allocation8], 1 }
 0x40e   :  { %6957 = vsyncpa [#allocation6], 1 }

</bundles_post_ra>
